<compile_context>
chip_gen: v7x
topology: tpu7x:2x2x1
jax: 0.10.0
libtpu: 0.0.40
codegen_flags: <defaults>
</compile_context>

<pallas_src>
import math
import functools

import jax
import jax.numpy as jnp
from jax.experimental import pallas as pl
from jax.experimental.pallas import tpu as pltpu

NEG = -1e30  # additive mask value (finite -> fully-masked rows cannot NaN)

# Order in which the stacked per-layer weights are passed to the kernel.
W_NAMES = (
    "sa_wqkv", "sa_bqkv", "sa_wo", "sa_bo", "ln1_w", "ln1_b",
    "ca_wq", "ca_bq", "ca_wkv", "ca_bkv", "ca_wo", "ca_bo", "ln2_w", "ln2_b",
    "ff1_w", "ff1_b", "ff2_w", "ff2_b", "ln3_w", "ln3_b",
)
N_W = len(W_NAMES)


def _pick_chunk(n, prefer=512):
    """Largest lane-dense chunk size (512/256/128) dividing n, else n."""
    for c in (prefer, 256, 128):
        if n % c == 0:
            return c
    return n


# ----------------------------- in-kernel helpers -----------------------------

def _layernorm(x, w, b, eps=1e-5):
    mu = jnp.mean(x, axis=-1, keepdims=True)
    var = jnp.mean((x - mu) ** 2, axis=-1, keepdims=True)
    return (x - mu) * jax.lax.rsqrt(var + eps) * w + b


# ------------------------ fused decoder-stack kernel -------------------------
# grid=(L,): one grid step == one decoder layer; x lives in a VMEM scratch and
# never leaves VMEM between layers.

def decoder_stack_kernel(*refs, n_head, n_batch, seq_len, mem_len, ff_chunk):
    x0_ref, mem_ref, bias_ref, mbias_ref = refs[:4]
    w = dict(zip(W_NAMES, refs[4:4 + N_W]))
    xout_ref = refs[4 + N_W]
    x_scr, ctx_scr = refs[5 + N_W], refs[6 + N_W]

    layer = pl.program_id(0)
    B, T, S, H = n_batch, seq_len, mem_len, n_head
    E = x_scr.shape[1]
    hd = E // H
    scale = 1.0 / math.sqrt(hd)
    bf16 = jnp.bfloat16
    f32 = jnp.float32

    @pl.when(layer == 0)
    def _():
        x_scr[...] = x0_ref[...]

    x = x_scr[...]                       # (B*T, E) f32
    sa_bias = bias_ref[...]              # (B, T, T)  causal + key-pad (additive)
    mem_bias = mbias_ref[...]            # (1, 1, S)  masks memory sublane padding

    def attend(q_rows, k_rows, v_rows, tq, tk, add_bias):
        """q_rows: (B*tq, E); k_rows/v_rows: (B*tk, E).  Writes ctx into
        ctx_scr lane slices per head (no concats / broadcasts)."""
        qb = q_rows.astype(bf16)
        kb = k_rows.astype(bf16)
        vb = v_rows.astype(bf16)
        for h in range(H):               # static, small; scratch stores bound liveness
            sl = slice(h * hd, (h + 1) * hd)
            qh = qb[:, sl].reshape(B, tq, hd)
            kh = kb[:, sl].reshape(B, tk, hd)
            vh = vb[:, sl].reshape(B, tk, hd)
            s = jnp.einsum("bqd,bkd->bqk", qh, kh,
                           preferred_element_type=f32) * scale
            s = s + add_bias
            m = jnp.max(s, axis=-1, keepdims=True)
            p = jnp.exp(s - m)
            p = p * pl.reciprocal(jnp.sum(p, axis=-1, keepdims=True), approx=True)
            ctx = jnp.einsum("bqk,bkd->bqd", p.astype(bf16), vh,
                             preferred_element_type=f32)
            ctx_scr[:, sl] = ctx.reshape(B * tq, hd).astype(bf16)
        return ctx_scr[...]              # (B*T, E) bf16

    # ---- self attention (fused QKV) + add & norm ----
    qkv = jnp.dot(x.astype(bf16), w["sa_wqkv"][...],
                  preferred_element_type=f32) + w["sa_bqkv"][...]     # (B*T, 3E)
    att = attend(qkv[:, :E], qkv[:, E:2 * E], qkv[:, 2 * E:], T, T, sa_bias)
    att = jnp.dot(att, w["sa_wo"][...], preferred_element_type=f32) + w["sa_bo"][...]
    x = _layernorm(x + att, w["ln1_w"][...], w["ln1_b"][...])

    # ---- cross attention over image memory (fused KV) + add & norm ----
    q = jnp.dot(x.astype(bf16), w["ca_wq"][...],
                preferred_element_type=f32) + w["ca_bq"][...]         # (B*T, E)
    kv = jnp.dot(mem_ref[...], w["ca_wkv"][...],
                 preferred_element_type=f32) + w["ca_bkv"][...]       # (B*S, 2E)
    att = attend(q, kv[:, :E], kv[:, E:], T, S, mem_bias)
    att = jnp.dot(att, w["ca_wo"][...], preferred_element_type=f32) + w["ca_bo"][...]
    x = _layernorm(x + att, w["ln2_w"][...], w["ln2_b"][...])

    # ---- feed-forward (relu), chunked over FF + add & norm ----
    FF = w["ff1_w"].shape[1]
    xb = x.astype(bf16)
    y = jnp.zeros_like(x)
    for c in range(FF // ff_chunk):      # static; accumulator bounds liveness
        csl = slice(c * ff_chunk, (c + 1) * ff_chunk)
        hcol = jnp.dot(xb, w["ff1_w"][:, csl],
                       preferred_element_type=f32) + w["ff1_b"][:, csl]
        hcol = jnp.maximum(hcol, 0.0).astype(bf16)
        y = y + jnp.dot(hcol, w["ff2_w"][csl, :], preferred_element_type=f32)
    y = y + w["ff2_b"][...]
    x = _layernorm(x + y, w["ln3_w"][...], w["ln3_b"][...])

    x_scr[...] = x                       # stays resident in VMEM across layers

    @pl.when(layer == pl.num_programs(0) - 1)
    def _():
        xout_ref[...] = x


# ------------------------ separate tiled vocab projection --------------------

def vocab_proj_kernel(x_ref, w_ref, b_ref, o_ref):
    o_ref[...] = (jnp.dot(x_ref[...].astype(jnp.bfloat16), w_ref[...],
                          preferred_element_type=jnp.float32) + b_ref[...])


# --------------------------------- forward ----------------------------------

def image_caption_forward(params, encoded_image, decoder_inp, n_head):
    """encoded_image: (B, S, E) float32; decoder_inp: (B, T) int32 tokens.
    Returns (logits (T, B, V), pad_mask (B, T)) like the PyTorch module."""
    B, T = decoder_inp.shape
    S = encoded_image.shape[1]
    E = params["embedding"].shape[1]
    V = params["lw_t"].shape[1]
    stacked = params["stacked"]
    L = stacked["sa_wqkv"].shape[0]
    FF = stacked["ff1_w"].shape[2]

    # embedding * sqrt(E) + sinusoidal positional encoding (dropout = identity)
    emb = jnp.take(params["embedding"], decoder_inp, axis=0) * math.sqrt(E)
    x0 = (emb + params["pe"][:T][None, :, :]).astype(jnp.float32).reshape(B * T, E)

    # pad image memory rows to a sublane multiple of 8 (tile-aligned reshapes)
    S_pad = ((S + 7) // 8) * 8
    img = encoded_image
    if S_pad != S:
        img = jnp.pad(img, ((0, 0), (0, S_pad - S), (0, 0)))
    mem = img.astype(jnp.bfloat16).reshape(B * S_pad, E)
    mem_bias = jnp.where(jnp.arange(S_pad)[None, None, :] < S, 0.0, NEG
                         ).astype(jnp.float32)                        # (1,1,S_pad)

    # causal + key-padding additive bias, built ONCE on the host
    rows = jnp.arange(T)[:, None]
    cols = jnp.arange(T)[None, :]
    causal = jnp.where(rows >= cols, 0.0, NEG).astype(jnp.float32)    # (T, T)
    kpad = jnp.where(decoder_inp == 0, NEG, 0.0).astype(jnp.float32)  # (B, T)
    attn_bias = causal[None, :, :] + kpad[:, None, :]                 # (B, T, T)
    pad_mask = (decoder_inp > 0).astype(jnp.float32)

    w_list = [stacked[n] for n in W_NAMES]

    def const_spec(a):
        nd = a.ndim
        return pl.BlockSpec(a.shape, lambda l, _nd=nd: (0,) * _nd)

    def layer_spec(a):
        nd = a.ndim
        return pl.BlockSpec((pl.Squeezed(),) + tuple(a.shape[1:]),
                            lambda l, _nd=nd: (l,) + (0,) * (_nd - 1))

    # VMEM budget from actual buffer math (double-buffered weights + acts), headroom.
    def nbytes(a):
        return a.size * a.dtype.itemsize
    per_layer_w = sum(nbytes(stacked[n]) // L for n in W_NAMES)
    need = (2 * per_layer_w
            + 2 * (nbytes(x0) + nbytes(mem) + nbytes(attn_bias) + nbytes(mem_bias))
            + 6 * B * T * E * 4)
    vmem_limit = int(min(max(need * 3 // 2, 32 * 1024 * 1024), 100 * 1024 * 1024))

    ff_chunk = _pick_chunk(FF)
    kernel = functools.partial(decoder_stack_kernel, n_head=n_head, n_batch=B,
                               seq_len=T, mem_len=S_pad, ff_chunk=ff_chunk)

    x_out = pl.pallas_call(
        kernel,
        out_shape=jax.ShapeDtypeStruct((B * T, E), jnp.float32),
        grid=(L,),
        in_specs=([const_spec(x0), const_spec(mem),
                   const_spec(attn_bias), const_spec(mem_bias)]
                  + [layer_spec(a) for a in w_list]),
        out_specs=pl.BlockSpec((B * T, E), lambda l: (0, 0)),
        scratch_shapes=[pltpu.VMEM((B * T, E), jnp.float32),   # running activation
                        pltpu.VMEM((B * T, E), jnp.bfloat16)], # attention context
        compiler_params=pltpu.CompilerParams(
            dimension_semantics=("arbitrary",),
            vmem_limit_bytes=vmem_limit),
    )(x0, mem, attn_bias, mem_bias, *w_list)

    # ---- separate lane-dense vocab projection, tiled over V, (T,B) row order ----
    x_tb = x_out.reshape(B, T, E).transpose(1, 0, 2).reshape(T * B, E)
    Vp = ((V + 127) // 128) * 128
    lw, lb = params["lw_t"], params["lb"]
    if Vp != V:
        lw = jnp.pad(lw, ((0, 0), (0, Vp - V)))
        lb = jnp.pad(lb, ((0, 0), (0, Vp - V)))
    tile_v = _pick_chunk(Vp)
    M = T * B

    logits_flat = pl.pallas_call(
        vocab_proj_kernel,
        out_shape=jax.ShapeDtypeStruct((M, Vp), jnp.float32),
        grid=(Vp // tile_v,),
        in_specs=[pl.BlockSpec((M, E), lambda j: (0, 0)),
                  pl.BlockSpec((E, tile_v), lambda j: (0, j)),
                  pl.BlockSpec((1, tile_v), lambda j: (0, j))],
        out_specs=pl.BlockSpec((M, tile_v), lambda j: (0, j)),
        compiler_params=pltpu.CompilerParams(
            dimension_semantics=("parallel",)),
    )(x_tb, lw, lb)

    logits = logits_flat.reshape(T, B, Vp)[:, :, :V]   # (T, B, V) as PyTorch
    return logits, pad_mask


# ----------------------------- parameter setup -------------------------------

def make_pe(max_len, d_model):
    pos = jnp.arange(max_len, dtype=jnp.float32)[:, None]
    div = jnp.exp(jnp.arange(0, d_model, 2, dtype=jnp.float32)
                  * (-math.log(10000.0) / d_model))
    pe = jnp.zeros((max_len, d_model), jnp.float32)
    pe = pe.at[:, 0::2].set(jnp.sin(pos * div))
    pe = pe.at[:, 1::2].set(jnp.cos(pos * div))
    return pe


def init_params(key, vocab_size, embed_size, n_head, ff_dim, n_layers, max_len=33):
    E, FF = embed_size, ff_dim
    k_emb, k_lin, k_layers = jax.random.split(key, 3)

    def u(k, shape, lim):
        return jax.random.uniform(k, shape, jnp.float32, -lim, lim)

    layers = []
    for kl in jax.random.split(k_layers, n_layers):
        ks = jax.random.split(kl, 8)
        xa = math.sqrt(6.0 / (E + 3 * E))     # xavier_uniform for MHA in_proj
        le = 1.0 / math.sqrt(E)
        lf = 1.0 / math.sqrt(FF)
        sa_w = u(ks[0], (3 * E, E), xa)       # in_proj_weight  (self-attn)
        ca_w = u(ks[1], (3 * E, E), xa)       # in_proj_weight  (cross-attn)
        sa_ow = u(ks[2], (E, E), le)          # out_proj.weight
        ca_ow = u(ks[3], (E, E), le)
        ff1_w = u(ks[4], (FF, E), le); ff1_b = u(ks[5], (FF,), le)
        ff2_w = u(ks[6], (E, FF), lf); ff2_b = u(ks[7], (E,), lf)
        zE = jnp.zeros((1, E), jnp.float32)
        oneE = jnp.ones((1, E), jnp.float32)

        layers.append(dict(
            sa_wqkv=sa_w.T.astype(jnp.bfloat16),              # (E, 3E)  x @ W^T
            sa_bqkv=jnp.zeros((1, 3 * E), jnp.float32),
            sa_wo=sa_ow.T.astype(jnp.bfloat16),               # (E, E)
            sa_bo=zE,
            ln1_w=oneE, ln1_b=zE,
            ca_wq=ca_w[:E].T.astype(jnp.bfloat16),            # (E, E)
            ca_bq=zE,
            ca_wkv=ca_w[E:].T.astype(jnp.bfloat16),           # (E, 2E)
            ca_bkv=jnp.zeros((1, 2 * E), jnp.float32),
            ca_wo=ca_ow.T.astype(jnp.bfloat16),
            ca_bo=zE,
            ln2_w=oneE, ln2_b=zE,
            ff1_w=ff1_w.T.astype(jnp.bfloat16),               # (E, FF)
            ff1_b=ff1_b.reshape(1, FF),
            ff2_w=ff2_w.T.astype(jnp.bfloat16),               # (FF, E)
            ff2_b=ff2_b.reshape(1, E),
            ln3_w=oneE, ln3_b=zE,
        ))

    stacked = {n: jnp.stack([lp[n] for lp in layers], axis=0) for n in W_NAMES}

    lw = u(k_lin, (vocab_size, E), 0.1)       # last_linear_layer.weight
    return dict(
        embedding=u(k_emb, (vocab_size, E), 0.1),
        lw_t=lw.T.astype(jnp.bfloat16),       # pre-transposed (E, V)
        lb=jnp.zeros((1, vocab_size), jnp.float32),
        pe=make_pe(max_len, E),
        stacked=stacked,
    )


# ----------------------------------- main ------------------------------------

if __name__ == "__main__":
    B, T, S, E, H, V, L, FF = 2, 8, 10, 32, 4, 64, 2, 2048

    key = jax.random.PRNGKey(0)
    k_img, k_tok, k_par = jax.random.split(key, 3)

    encoded_image = jax.random.normal(k_img, (B, S, E), jnp.float32)
    decoder_inp = jax.random.randint(k_tok, (B, T), 1, V).astype(jnp.int32)
    decoder_inp = decoder_inp.at[1, -2:].set(0)      # trailing pad tokens (id 0)

    params = init_params(k_par, V, E, H, FF, L)

    logits, pad_mask = image_caption_forward(params, encoded_image, decoder_inp, H)
    jax.block_until_ready(logits)
    jax.block_until_ready(pad_mask)

    assert logits.shape == (T, B, V), logits.shape
    assert pad_mask.shape == (B, T), pad_mask.shape
    assert bool(jnp.all(jnp.isfinite(logits)))
    print("KERNEL_OK")
</pallas_src>

<mosaic_0001>
module attributes {stable_mosaic.version = 11 : i64} {
  func.func @decoder_stack_kernel(%arg0: i32, %arg1: memref<16x32xf32, #tpu.memory_space<vmem>>, %arg2: memref<32x32xbf16, #tpu.memory_space<vmem>>, %arg3: memref<2x8x8xf32, #tpu.memory_space<vmem>>, %arg4: memref<1x1x16xf32, #tpu.memory_space<vmem>>, %arg5: memref<1x32x96xbf16, #tpu.memory_space<vmem>>, %arg6: memref<1x1x96xf32, #tpu.memory_space<vmem>>, %arg7: memref<1x32x32xbf16, #tpu.memory_space<vmem>>, %arg8: memref<1x1x32xf32, #tpu.memory_space<vmem>>, %arg9: memref<1x1x32xf32, #tpu.memory_space<vmem>>, %arg10: memref<1x1x32xf32, #tpu.memory_space<vmem>>, %arg11: memref<1x32x32xbf16, #tpu.memory_space<vmem>>, %arg12: memref<1x1x32xf32, #tpu.memory_space<vmem>>, %arg13: memref<1x32x64xbf16, #tpu.memory_space<vmem>>, %arg14: memref<1x1x64xf32, #tpu.memory_space<vmem>>, %arg15: memref<1x32x32xbf16, #tpu.memory_space<vmem>>, %arg16: memref<1x1x32xf32, #tpu.memory_space<vmem>>, %arg17: memref<1x1x32xf32, #tpu.memory_space<vmem>>, %arg18: memref<1x1x32xf32, #tpu.memory_space<vmem>>, %arg19: memref<1x32x2048xbf16, #tpu.memory_space<vmem>>, %arg20: memref<1x1x2048xf32, #tpu.memory_space<vmem>>, %arg21: memref<1x2048x32xbf16, #tpu.memory_space<vmem>>, %arg22: memref<1x1x32xf32, #tpu.memory_space<vmem>>, %arg23: memref<1x1x32xf32, #tpu.memory_space<vmem>>, %arg24: memref<1x1x32xf32, #tpu.memory_space<vmem>>, %arg25: memref<16x32xf32, #tpu.memory_space<vmem>>, %arg26: memref<16x32xf32, #tpu.memory_space<vmem>>, %arg27: memref<16x32xbf16, #tpu.memory_space<vmem>>) attributes {dimension_semantics = [#tpu.dimension_semantics<arbitrary>], iteration_bounds = array<i64: 2>, scalar_prefetch = 0 : i64, scratch_operands = 2 : i64, tpu.core_type = #tpu.core_type<tc>, window_params = [{pipeline_mode = #tpu.pipeline_mode<synchronous>, transform_indices = @transform_0, window_bounds = array<i64: 16, 32>}, {pipeline_mode = #tpu.pipeline_mode<synchronous>, transform_indices = @transform_1, window_bounds = array<i64: 32, 32>}, {pipeline_mode = #tpu.pipeline_mode<synchronous>, transform_indices = @transform_2, window_bounds = array<i64: 2, 8, 8>}, {pipeline_mode = #tpu.pipeline_mode<synchronous>, transform_indices = @transform_3, window_bounds = array<i64: 1, 1, 16>}, {transform_indices = @transform_4, window_bounds = array<i64: 1, 32, 96>}, {transform_indices = @transform_5, window_bounds = array<i64: 1, 1, 96>}, {transform_indices = @transform_6, window_bounds = array<i64: 1, 32, 32>}, {transform_indices = @transform_7, window_bounds = array<i64: 1, 1, 32>}, {transform_indices = @transform_8, window_bounds = array<i64: 1, 1, 32>}, {transform_indices = @transform_9, window_bounds = array<i64: 1, 1, 32>}, {transform_indices = @transform_10, window_bounds = array<i64: 1, 32, 32>}, {transform_indices = @transform_11, window_bounds = array<i64: 1, 1, 32>}, {transform_indices = @transform_12, window_bounds = array<i64: 1, 32, 64>}, {transform_indices = @transform_13, window_bounds = array<i64: 1, 1, 64>}, {transform_indices = @transform_14, window_bounds = array<i64: 1, 32, 32>}, {transform_indices = @transform_15, window_bounds = array<i64: 1, 1, 32>}, {transform_indices = @transform_16, window_bounds = array<i64: 1, 1, 32>}, {transform_indices = @transform_17, window_bounds = array<i64: 1, 1, 32>}, {transform_indices = @transform_18, window_bounds = array<i64: 1, 32, 2048>}, {transform_indices = @transform_19, window_bounds = array<i64: 1, 1, 2048>}, {transform_indices = @transform_20, window_bounds = array<i64: 1, 2048, 32>}, {transform_indices = @transform_21, window_bounds = array<i64: 1, 1, 32>}, {transform_indices = @transform_22, window_bounds = array<i64: 1, 1, 32>}, {transform_indices = @transform_23, window_bounds = array<i64: 1, 1, 32>}, {pipeline_mode = #tpu.pipeline_mode<synchronous>, transform_indices = @transform_24, window_bounds = array<i64: 16, 32>}]} {
    %c0_i32 = arith.constant 0 : i32
    %0 = arith.cmpi eq, %arg0, %c0_i32 : i32
    %1 = arith.extui %0 : i1 to i32
    %c0_i32_0 = arith.constant 0 : i32
    %2 = arith.cmpi ne, %1, %c0_i32_0 : i32
    scf.if %2 {
      %c0_186 = arith.constant 0 : index
      %c0_187 = arith.constant 0 : index
      %408 = vector.load %arg1[%c0_186, %c0_187] : memref<16x32xf32, #tpu.memory_space<vmem>>, vector<16x32xf32>
      %c0_188 = arith.constant 0 : index
      %c0_189 = arith.constant 0 : index
      %409 = vector.load %arg26[%c0_188, %c0_189] : memref<16x32xf32, #tpu.memory_space<vmem>>, vector<16x32xf32>
      tpu.vector_store %arg26[%c0_188, %c0_189], %408 {strides = array<i32>} : memref<16x32xf32, #tpu.memory_space<vmem>>, vector<16x32xf32>,
    } else {
    }
    %c0 = arith.constant 0 : index
    %c0_1 = arith.constant 0 : index
    %3 = vector.load %arg26[%c0, %c0_1] : memref<16x32xf32, #tpu.memory_space<vmem>>, vector<16x32xf32>
    %c0_2 = arith.constant 0 : index
    %c0_3 = arith.constant 0 : index
    %c0_4 = arith.constant 0 : index
    %4 = vector.load %arg3[%c0_2, %c0_3, %c0_4] : memref<2x8x8xf32, #tpu.memory_space<vmem>>, vector<2x8x8xf32>
    %c0_5 = arith.constant 0 : index
    %c0_6 = arith.constant 0 : index
    %c0_7 = arith.constant 0 : index
    %5 = vector.load %arg4[%c0_5, %c0_6, %c0_7] : memref<1x1x16xf32, #tpu.memory_space<vmem>>, vector<1x1x16xf32>
    %6 = arith.truncf %3 : vector<16x32xf32> to vector<16x32xbf16>
    %c0_8 = arith.constant 0 : index
    %c0_9 = arith.constant 0 : index
    %c0_10 = arith.constant 0 : index
    %7 = vector.load %arg5[%c0_8, %c0_9, %c0_10] : memref<1x32x96xbf16, #tpu.memory_space<vmem>>, vector<1x32x96xbf16>
    %8 = vector.shape_cast %7 : vector<1x32x96xbf16> to vector<32x96xbf16>
    %cst = arith.constant dense<0.000000e+00> : vector<16x96xf32>
    %9 = tpu.matmul %6, %8, %cst {dimension_numbers = #tpu.dot_dimension_numbers<[1], [0], [0], [1], [0, 0, 1, 1], [], []>} : vector<16x32xbf16>, vector<32x96xbf16>, vector<16x96xf32> -> vector<16x96xf32>
    %c0_11 = arith.constant 0 : index
    %c0_12 = arith.constant 0 : index
    %c0_13 = arith.constant 0 : index
    %10 = vector.load %arg6[%c0_11, %c0_12, %c0_13] : memref<1x1x96xf32, #tpu.memory_space<vmem>>, vector<1x1x96xf32>
    %11 = vector.shape_cast %10 : vector<1x1x96xf32> to vector<1x96xf32>
    %12 = vector.broadcast %11 : vector<1x96xf32> to vector<16x96xf32>
    %13 = arith.addf %9, %12 : vector<16x96xf32>
    %14 = vector.extract_strided_slice %13 {offsets = [0, 0], sizes = [16, 32], strides = [1, 1]} : vector<16x96xf32> to vector<16x32xf32>
    %15 = vector.extract_strided_slice %13 {offsets = [0, 32], sizes = [16, 32], strides = [1, 1]} : vector<16x96xf32> to vector<16x32xf32>
    %16 = vector.extract_strided_slice %13 {offsets = [0, 64], sizes = [16, 32], strides = [1, 1]} : vector<16x96xf32> to vector<16x32xf32>
    %17 = arith.truncf %14 : vector<16x32xf32> to vector<16x32xbf16>
    %18 = arith.truncf %15 : vector<16x32xf32> to vector<16x32xbf16>
    %19 = arith.truncf %16 : vector<16x32xf32> to vector<16x32xbf16>
    %20 = vector.extract_strided_slice %17 {offsets = [0, 0], sizes = [16, 8], strides = [1, 1]} : vector<16x32xbf16> to vector<16x8xbf16>
    %21 = vector.shape_cast %20 : vector<16x8xbf16> to vector<2x8x8xbf16>
    %22 = vector.extract_strided_slice %18 {offsets = [0, 0], sizes = [16, 8], strides = [1, 1]} : vector<16x32xbf16> to vector<16x8xbf16>
    %23 = vector.shape_cast %22 : vector<16x8xbf16> to vector<2x8x8xbf16>
    %24 = vector.extract_strided_slice %19 {offsets = [0, 0], sizes = [16, 8], strides = [1, 1]} : vector<16x32xbf16> to vector<16x8xbf16>
    %25 = vector.shape_cast %24 : vector<16x8xbf16> to vector<2x8x8xbf16>
    "tpu.trace_start"() <{level = 10 : i32, message = "bqd,bkd->bqk"}> : () -> ()
    %cst_14 = arith.constant dense<0.000000e+00> : vector<2x8x8xf32>
    %26 = tpu.matmul %21, %23, %cst_14 {dimension_numbers = #tpu.dot_dimension_numbers<[2], [2], [1], [1], [0, 0, 0, 1, 1, 1], [0], [0]>} : vector<2x8x8xbf16>, vector<2x8x8xbf16>, vector<2x8x8xf32> -> vector<2x8x8xf32>
    "tpu.trace_stop"() : () -> ()
    %cst_15 = arith.constant 0.353553385 : f32
    %27 = vector.broadcast %cst_15 : f32 to vector<2x8x8xf32>
    %28 = arith.mulf %26, %27 : vector<2x8x8xf32>
    %29 = arith.addf %28, %4 : vector<2x8x8xf32>
    %cst_16 = arith.constant dense<0xFF800000> : vector<2x8xf32>
    %30 = vector.multi_reduction <maximumf>, %29, %cst_16 [2] : vector<2x8x8xf32> to vector<2x8xf32>
    %31 = vector.shape_cast %30 : vector<2x8xf32> to vector<2x8x1xf32>
    %32 = vector.broadcast %31 : vector<2x8x1xf32> to vector<2x8x8xf32>
    %33 = arith.subf %29, %32 : vector<2x8x8xf32>
    %34 = math.exp %33 : vector<2x8x8xf32>
    %cst_17 = arith.constant dense<0.000000e+00> : vector<2x8xf32>
    %35 = vector.multi_reduction <add>, %34, %cst_17 [2] : vector<2x8x8xf32> to vector<2x8xf32>
    %36 = vector.shape_cast %35 : vector<2x8xf32> to vector<2x8x1xf32>
    %37 = tpu.reciprocal %36 {approx = true} : vector<2x8x1xf32> -> vector<2x8x1xf32>
    %38 = vector.broadcast %37 : vector<2x8x1xf32> to vector<2x8x8xf32>
    %39 = arith.mulf %34, %38 : vector<2x8x8xf32>
    %40 = arith.truncf %39 : vector<2x8x8xf32> to vector<2x8x8xbf16>
    "tpu.trace_start"() <{level = 10 : i32, message = "bqk,bkd->bqd"}> : () -> ()
    %cst_18 = arith.constant dense<0.000000e+00> : vector<2x8x8xf32>
    %41 = tpu.matmul %40, %25, %cst_18 {dimension_numbers = #tpu.dot_dimension_numbers<[2], [1], [1], [2], [0, 0, 0, 1, 1, 2], [0], [0]>} : vector<2x8x8xbf16>, vector<2x8x8xbf16>, vector<2x8x8xf32> -> vector<2x8x8xf32>
    "tpu.trace_stop"() : () -> ()
    %42 = vector.shape_cast %41 : vector<2x8x8xf32> to vector<16x8xf32>
    %43 = arith.truncf %42 : vector<16x8xf32> to vector<16x8xbf16>
    %c0_19 = arith.constant 0 : index
    %c0_20 = arith.constant 0 : index
    %44 = vector.load %arg27[%c0_19, %c0_20] : memref<16x32xbf16, #tpu.memory_space<vmem>>, vector<16x8xbf16>
    tpu.vector_store %arg27[%c0_19, %c0_20], %43 {strides = array<i32>} : memref<16x32xbf16, #tpu.memory_space<vmem>>, vector<16x8xbf16>,
    %45 = vector.extract_strided_slice %17 {offsets = [0, 8], sizes = [16, 8], strides = [1, 1]} : vector<16x32xbf16> to vector<16x8xbf16>
    %46 = vector.shape_cast %45 : vector<16x8xbf16> to vector<2x8x8xbf16>
    %47 = vector.extract_strided_slice %18 {offsets = [0, 8], sizes = [16, 8], strides = [1, 1]} : vector<16x32xbf16> to vector<16x8xbf16>
    %48 = vector.shape_cast %47 : vector<16x8xbf16> to vector<2x8x8xbf16>
    %49 = vector.extract_strided_slice %19 {offsets = [0, 8], sizes = [16, 8], strides = [1, 1]} : vector<16x32xbf16> to vector<16x8xbf16>
    %50 = vector.shape_cast %49 : vector<16x8xbf16> to vector<2x8x8xbf16>
    "tpu.trace_start"() <{level = 10 : i32, message = "bqd,bkd->bqk"}> : () -> ()
    %cst_21 = arith.constant dense<0.000000e+00> : vector<2x8x8xf32>
    %51 = tpu.matmul %46, %48, %cst_21 {dimension_numbers = #tpu.dot_dimension_numbers<[2], [2], [1], [1], [0, 0, 0, 1, 1, 1], [0], [0]>} : vector<2x8x8xbf16>, vector<2x8x8xbf16>, vector<2x8x8xf32> -> vector<2x8x8xf32>
    "tpu.trace_stop"() : () -> ()
    %cst_22 = arith.constant 0.353553385 : f32
    %52 = vector.broadcast %cst_22 : f32 to vector<2x8x8xf32>
    %53 = arith.mulf %51, %52 : vector<2x8x8xf32>
    %54 = arith.addf %53, %4 : vector<2x8x8xf32>
    %cst_23 = arith.constant dense<0xFF800000> : vector<2x8xf32>
    %55 = vector.multi_reduction <maximumf>, %54, %cst_23 [2] : vector<2x8x8xf32> to vector<2x8xf32>
    %56 = vector.shape_cast %55 : vector<2x8xf32> to vector<2x8x1xf32>
    %57 = vector.broadcast %56 : vector<2x8x1xf32> to vector<2x8x8xf32>
    %58 = arith.subf %54, %57 : vector<2x8x8xf32>
    %59 = math.exp %58 : vector<2x8x8xf32>
    %cst_24 = arith.constant dense<0.000000e+00> : vector<2x8xf32>
    %60 = vector.multi_reduction <add>, %59, %cst_24 [2] : vector<2x8x8xf32> to vector<2x8xf32>
    %61 = vector.shape_cast %60 : vector<2x8xf32> to vector<2x8x1xf32>
    %62 = tpu.reciprocal %61 {approx = true} : vector<2x8x1xf32> -> vector<2x8x1xf32>
    %63 = vector.broadcast %62 : vector<2x8x1xf32> to vector<2x8x8xf32>
    %64 = arith.mulf %59, %63 : vector<2x8x8xf32>
    %65 = arith.truncf %64 : vector<2x8x8xf32> to vector<2x8x8xbf16>
    "tpu.trace_start"() <{level = 10 : i32, message = "bqk,bkd->bqd"}> : () -> ()
    %cst_25 = arith.constant dense<0.000000e+00> : vector<2x8x8xf32>
    %66 = tpu.matmul %65, %50, %cst_25 {dimension_numbers = #tpu.dot_dimension_numbers<[2], [1], [1], [2], [0, 0, 0, 1, 1, 2], [0], [0]>} : vector<2x8x8xbf16>, vector<2x8x8xbf16>, vector<2x8x8xf32> -> vector<2x8x8xf32>
    "tpu.trace_stop"() : () -> ()
    %67 = vector.shape_cast %66 : vector<2x8x8xf32> to vector<16x8xf32>
    %68 = arith.truncf %67 : vector<16x8xf32> to vector<16x8xbf16>
    %c0_26 = arith.constant 0 : index
    %c8 = arith.constant 8 : index
    %69 = vector.load %arg27[%c0_26, %c8] : memref<16x32xbf16, #tpu.memory_space<vmem>>, vector<16x8xbf16>
    tpu.vector_store %arg27[%c0_26, %c8], %68 {strides = array<i32>} : memref<16x32xbf16, #tpu.memory_space<vmem>>, vector<16x8xbf16>,
    %70 = vector.extract_strided_slice %17 {offsets = [0, 16], sizes = [16, 8], strides = [1, 1]} : vector<16x32xbf16> to vector<16x8xbf16>
    %71 = vector.shape_cast %70 : vector<16x8xbf16> to vector<2x8x8xbf16>
    %72 = vector.extract_strided_slice %18 {offsets = [0, 16], sizes = [16, 8], strides = [1, 1]} : vector<16x32xbf16> to vector<16x8xbf16>
    %73 = vector.shape_cast %72 : vector<16x8xbf16> to vector<2x8x8xbf16>
    %74 = vector.extract_strided_slice %19 {offsets = [0, 16], sizes = [16, 8], strides = [1, 1]} : vector<16x32xbf16> to vector<16x8xbf16>
    %75 = vector.shape_cast %74 : vector<16x8xbf16> to vector<2x8x8xbf16>
    "tpu.trace_start"() <{level = 10 : i32, message = "bqd,bkd->bqk"}> : () -> ()
    %cst_27 = arith.constant dense<0.000000e+00> : vector<2x8x8xf32>
    %76 = tpu.matmul %71, %73, %cst_27 {dimension_numbers = #tpu.dot_dimension_numbers<[2], [2], [1], [1], [0, 0, 0, 1, 1, 1], [0], [0]>} : vector<2x8x8xbf16>, vector<2x8x8xbf16>, vector<2x8x8xf32> -> vector<2x8x8xf32>
    "tpu.trace_stop"() : () -> ()
    %cst_28 = arith.constant 0.353553385 : f32
    %77 = vector.broadcast %cst_28 : f32 to vector<2x8x8xf32>
    %78 = arith.mulf %76, %77 : vector<2x8x8xf32>
    %79 = arith.addf %78, %4 : vector<2x8x8xf32>
    %cst_29 = arith.constant dense<0xFF800000> : vector<2x8xf32>
    %80 = vector.multi_reduction <maximumf>, %79, %cst_29 [2] : vector<2x8x8xf32> to vector<2x8xf32>
    %81 = vector.shape_cast %80 : vector<2x8xf32> to vector<2x8x1xf32>
    %82 = vector.broadcast %81 : vector<2x8x1xf32> to vector<2x8x8xf32>
    %83 = arith.subf %79, %82 : vector<2x8x8xf32>
    %84 = math.exp %83 : vector<2x8x8xf32>
    %cst_30 = arith.constant dense<0.000000e+00> : vector<2x8xf32>
    %85 = vector.multi_reduction <add>, %84, %cst_30 [2] : vector<2x8x8xf32> to vector<2x8xf32>
    %86 = vector.shape_cast %85 : vector<2x8xf32> to vector<2x8x1xf32>
    %87 = tpu.reciprocal %86 {approx = true} : vector<2x8x1xf32> -> vector<2x8x1xf32>
    %88 = vector.broadcast %87 : vector<2x8x1xf32> to vector<2x8x8xf32>
    %89 = arith.mulf %84, %88 : vector<2x8x8xf32>
    %90 = arith.truncf %89 : vector<2x8x8xf32> to vector<2x8x8xbf16>
    "tpu.trace_start"() <{level = 10 : i32, message = "bqk,bkd->bqd"}> : () -> ()
    %cst_31 = arith.constant dense<0.000000e+00> : vector<2x8x8xf32>
    %91 = tpu.matmul %90, %75, %cst_31 {dimension_numbers = #tpu.dot_dimension_numbers<[2], [1], [1], [2], [0, 0, 0, 1, 1, 2], [0], [0]>} : vector<2x8x8xbf16>, vector<2x8x8xbf16>, vector<2x8x8xf32> -> vector<2x8x8xf32>
    "tpu.trace_stop"() : () -> ()
    %92 = vector.shape_cast %91 : vector<2x8x8xf32> to vector<16x8xf32>
    %93 = arith.truncf %92 : vector<16x8xf32> to vector<16x8xbf16>
    %c0_32 = arith.constant 0 : index
    %c16 = arith.constant 16 : index
    %94 = vector.load %arg27[%c0_32, %c16] : memref<16x32xbf16, #tpu.memory_space<vmem>>, vector<16x8xbf16>
    tpu.vector_store %arg27[%c0_32, %c16], %93 {strides = array<i32>} : memref<16x32xbf16, #tpu.memory_space<vmem>>, vector<16x8xbf16>,
    %95 = vector.extract_strided_slice %17 {offsets = [0, 24], sizes = [16, 8], strides = [1, 1]} : vector<16x32xbf16> to vector<16x8xbf16>
    %96 = vector.shape_cast %95 : vector<16x8xbf16> to vector<2x8x8xbf16>
    %97 = vector.extract_strided_slice %18 {offsets = [0, 24], sizes = [16, 8], strides = [1, 1]} : vector<16x32xbf16> to vector<16x8xbf16>
    %98 = vector.shape_cast %97 : vector<16x8xbf16> to vector<2x8x8xbf16>
    %99 = vector.extract_strided_slice %19 {offsets = [0, 24], sizes = [16, 8], strides = [1, 1]} : vector<16x32xbf16> to vector<16x8xbf16>
    %100 = vector.shape_cast %99 : vector<16x8xbf16> to vector<2x8x8xbf16>
    "tpu.trace_start"() <{level = 10 : i32, message = "bqd,bkd->bqk"}> : () -> ()
    %cst_33 = arith.constant dense<0.000000e+00> : vector<2x8x8xf32>
    %101 = tpu.matmul %96, %98, %cst_33 {dimension_numbers = #tpu.dot_dimension_numbers<[2], [2], [1], [1], [0, 0, 0, 1, 1, 1], [0], [0]>} : vector<2x8x8xbf16>, vector<2x8x8xbf16>, vector<2x8x8xf32> -> vector<2x8x8xf32>
    "tpu.trace_stop"() : () -> ()
    %cst_34 = arith.constant 0.353553385 : f32
    %102 = vector.broadcast %cst_34 : f32 to vector<2x8x8xf32>
    %103 = arith.mulf %101, %102 : vector<2x8x8xf32>
    %104 = arith.addf %103, %4 : vector<2x8x8xf32>
    %cst_35 = arith.constant dense<0xFF800000> : vector<2x8xf32>
    %105 = vector.multi_reduction <maximumf>, %104, %cst_35 [2] : vector<2x8x8xf32> to vector<2x8xf32>
    %106 = vector.shape_cast %105 : vector<2x8xf32> to vector<2x8x1xf32>
    %107 = vector.broadcast %106 : vector<2x8x1xf32> to vector<2x8x8xf32>
    %108 = arith.subf %104, %107 : vector<2x8x8xf32>
    %109 = math.exp %108 : vector<2x8x8xf32>
    %cst_36 = arith.constant dense<0.000000e+00> : vector<2x8xf32>
    %110 = vector.multi_reduction <add>, %109, %cst_36 [2] : vector<2x8x8xf32> to vector<2x8xf32>
    %111 = vector.shape_cast %110 : vector<2x8xf32> to vector<2x8x1xf32>
    %112 = tpu.reciprocal %111 {approx = true} : vector<2x8x1xf32> -> vector<2x8x1xf32>
    %113 = vector.broadcast %112 : vector<2x8x1xf32> to vector<2x8x8xf32>
    %114 = arith.mulf %109, %113 : vector<2x8x8xf32>
    %115 = arith.truncf %114 : vector<2x8x8xf32> to vector<2x8x8xbf16>
    "tpu.trace_start"() <{level = 10 : i32, message = "bqk,bkd->bqd"}> : () -> ()
    %cst_37 = arith.constant dense<0.000000e+00> : vector<2x8x8xf32>
    %116 = tpu.matmul %115, %100, %cst_37 {dimension_numbers = #tpu.dot_dimension_numbers<[2], [1], [1], [2], [0, 0, 0, 1, 1, 2], [0], [0]>} : vector<2x8x8xbf16>, vector<2x8x8xbf16>, vector<2x8x8xf32> -> vector<2x8x8xf32>
    "tpu.trace_stop"() : () -> ()
    %117 = vector.shape_cast %116 : vector<2x8x8xf32> to vector<16x8xf32>
    %118 = arith.truncf %117 : vector<16x8xf32> to vector<16x8xbf16>
    %c0_38 = arith.constant 0 : index
    %c24 = arith.constant 24 : index
    %119 = vector.load %arg27[%c0_38, %c24] : memref<16x32xbf16, #tpu.memory_space<vmem>>, vector<16x8xbf16>
    tpu.vector_store %arg27[%c0_38, %c24], %118 {strides = array<i32>} : memref<16x32xbf16, #tpu.memory_space<vmem>>, vector<16x8xbf16>,
    %c0_39 = arith.constant 0 : index
    %c0_40 = arith.constant 0 : index
    %120 = vector.load %arg27[%c0_39, %c0_40] : memref<16x32xbf16, #tpu.memory_space<vmem>>, vector<16x32xbf16>
    %c0_41 = arith.constant 0 : index
    %c0_42 = arith.constant 0 : index
    %c0_43 = arith.constant 0 : index
    %121 = vector.load %arg7[%c0_41, %c0_42, %c0_43] : memref<1x32x32xbf16, #tpu.memory_space<vmem>>, vector<1x32x32xbf16>
    %122 = vector.shape_cast %121 : vector<1x32x32xbf16> to vector<32x32xbf16>
    %cst_44 = arith.constant dense<0.000000e+00> : vector<16x32xf32>
    %123 = tpu.matmul %120, %122, %cst_44 {dimension_numbers = #tpu.dot_dimension_numbers<[1], [0], [0], [1], [0, 0, 1, 1], [], []>} : vector<16x32xbf16>, vector<32x32xbf16>, vector<16x32xf32> -> vector<16x32xf32>
    %c0_45 = arith.constant 0 : index
    %c0_46 = arith.constant 0 : index
    %c0_47 = arith.constant 0 : index
    %124 = vector.load %arg8[%c0_45, %c0_46, %c0_47] : memref<1x1x32xf32, #tpu.memory_space<vmem>>, vector<1x1x32xf32>
    %125 = vector.shape_cast %124 : vector<1x1x32xf32> to vector<1x32xf32>
    %126 = vector.broadcast %125 : vector<1x32xf32> to vector<16x32xf32>
    %127 = arith.addf %123, %126 : vector<16x32xf32>
    %128 = arith.addf %3, %127 : vector<16x32xf32>
    %c0_48 = arith.constant 0 : index
    %c0_49 = arith.constant 0 : index
    %c0_50 = arith.constant 0 : index
    %129 = vector.load %arg9[%c0_48, %c0_49, %c0_50] : memref<1x1x32xf32, #tpu.memory_space<vmem>>, vector<1x1x32xf32>
    %130 = vector.shape_cast %129 : vector<1x1x32xf32> to vector<1x32xf32>
    %c0_51 = arith.constant 0 : index
    %c0_52 = arith.constant 0 : index
    %c0_53 = arith.constant 0 : index
    %131 = vector.load %arg10[%c0_51, %c0_52, %c0_53] : memref<1x1x32xf32, #tpu.memory_space<vmem>>, vector<1x1x32xf32>
    %132 = vector.shape_cast %131 : vector<1x1x32xf32> to vector<1x32xf32>
    %cst_54 = arith.constant dense<0.000000e+00> : vector<16xf32>
    %133 = vector.multi_reduction <add>, %128, %cst_54 [1] : vector<16x32xf32> to vector<16xf32>
    %134 = vector.shape_cast %133 : vector<16xf32> to vector<16x1xf32>
    %cst_55 = arith.constant 3.200000e+01 : f32
    %135 = vector.broadcast %cst_55 : f32 to vector<16x1xf32>
    %136 = arith.divf %134, %135 : vector<16x1xf32>
    %137 = vector.broadcast %136 : vector<16x1xf32> to vector<16x32xf32>
    %138 = arith.subf %128, %137 : vector<16x32xf32>
    %139 = arith.mulf %138, %138 : vector<16x32xf32>
    %cst_56 = arith.constant dense<0.000000e+00> : vector<16xf32>
    %140 = vector.multi_reduction <add>, %139, %cst_56 [1] : vector<16x32xf32> to vector<16xf32>
    %141 = vector.shape_cast %140 : vector<16xf32> to vector<16x1xf32>
    %cst_57 = arith.constant 3.200000e+01 : f32
    %142 = vector.broadcast %cst_57 : f32 to vector<16x1xf32>
    %143 = arith.divf %141, %142 : vector<16x1xf32>
    %144 = vector.broadcast %136 : vector<16x1xf32> to vector<16x32xf32>
    %145 = arith.subf %128, %144 : vector<16x32xf32>
    %cst_58 = arith.constant 9.99999974E-6 : f32
    %146 = vector.broadcast %cst_58 : f32 to vector<16x1xf32>
    %147 = arith.addf %143, %146 : vector<16x1xf32>
    %148 = math.rsqrt %147 : vector<16x1xf32>
    %149 = vector.broadcast %148 : vector<16x1xf32> to vector<16x32xf32>
    %150 = arith.mulf %145, %149 : vector<16x32xf32>
    %151 = vector.broadcast %130 : vector<1x32xf32> to vector<16x32xf32>
    %152 = arith.mulf %150, %151 : vector<16x32xf32>
    %153 = vector.broadcast %132 : vector<1x32xf32> to vector<16x32xf32>
    %154 = arith.addf %152, %153 : vector<16x32xf32>
    %155 = arith.truncf %154 : vector<16x32xf32> to vector<16x32xbf16>
    %c0_59 = arith.constant 0 : index
    %c0_60 = arith.constant 0 : index
    %c0_61 = arith.constant 0 : index
    %156 = vector.load %arg11[%c0_59, %c0_60, %c0_61] : memref<1x32x32xbf16, #tpu.memory_space<vmem>>, vector<1x32x32xbf16>
    %157 = vector.shape_cast %156 : vector<1x32x32xbf16> to vector<32x32xbf16>
    %cst_62 = arith.constant dense<0.000000e+00> : vector<16x32xf32>
    %158 = tpu.matmul %155, %157, %cst_62 {dimension_numbers = #tpu.dot_dimension_numbers<[1], [0], [0], [1], [0, 0, 1, 1], [], []>} : vector<16x32xbf16>, vector<32x32xbf16>, vector<16x32xf32> -> vector<16x32xf32>
    %c0_63 = arith.constant 0 : index
    %c0_64 = arith.constant 0 : index
    %c0_65 = arith.constant 0 : index
    %159 = vector.load %arg12[%c0_63, %c0_64, %c0_65] : memref<1x1x32xf32, #tpu.memory_space<vmem>>, vector<1x1x32xf32>
    %160 = vector.shape_cast %159 : vector<1x1x32xf32> to vector<1x32xf32>
    %161 = vector.broadcast %160 : vector<1x32xf32> to vector<16x32xf32>
    %162 = arith.addf %158, %161 : vector<16x32xf32>
    %c0_66 = arith.constant 0 : index
    %c0_67 = arith.constant 0 : index
    %163 = vector.load %arg2[%c0_66, %c0_67] : memref<32x32xbf16, #tpu.memory_space<vmem>>, vector<32x32xbf16>
    %c0_68 = arith.constant 0 : index
    %c0_69 = arith.constant 0 : index
    %c0_70 = arith.constant 0 : index
    %164 = vector.load %arg13[%c0_68, %c0_69, %c0_70] : memref<1x32x64xbf16, #tpu.memory_space<vmem>>, vector<1x32x64xbf16>
    %165 = vector.shape_cast %164 : vector<1x32x64xbf16> to vector<32x64xbf16>
    %cst_71 = arith.constant dense<0.000000e+00> : vector<32x64xf32>
    %166 = tpu.matmul %163, %165, %cst_71 {dimension_numbers = #tpu.dot_dimension_numbers<[1], [0], [0], [1], [0, 0, 1, 1], [], []>} : vector<32x32xbf16>, vector<32x64xbf16>, vector<32x64xf32> -> vector<32x64xf32>
    %c0_72 = arith.constant 0 : index
    %c0_73 = arith.constant 0 : index
    %c0_74 = arith.constant 0 : index
    %167 = vector.load %arg14[%c0_72, %c0_73, %c0_74] : memref<1x1x64xf32, #tpu.memory_space<vmem>>, vector<1x1x64xf32>
    %168 = vector.shape_cast %167 : vector<1x1x64xf32> to vector<1x64xf32>
    %169 = vector.broadcast %168 : vector<1x64xf32> to vector<32x64xf32>
    %170 = arith.addf %166, %169 : vector<32x64xf32>
    %171 = vector.extract_strided_slice %170 {offsets = [0, 0], sizes = [32, 32], strides = [1, 1]} : vector<32x64xf32> to vector<32x32xf32>
    %172 = vector.extract_strided_slice %170 {offsets = [0, 32], sizes = [32, 32], strides = [1, 1]} : vector<32x64xf32> to vector<32x32xf32>
    %173 = arith.truncf %162 : vector<16x32xf32> to vector<16x32xbf16>
    %174 = arith.truncf %171 : vector<32x32xf32> to vector<32x32xbf16>
    %175 = arith.truncf %172 : vector<32x32xf32> to vector<32x32xbf16>
    %176 = vector.extract_strided_slice %173 {offsets = [0, 0], sizes = [16, 8], strides = [1, 1]} : vector<16x32xbf16> to vector<16x8xbf16>
    %177 = vector.shape_cast %176 : vector<16x8xbf16> to vector<2x8x8xbf16>
    %178 = vector.extract_strided_slice %174 {offsets = [0, 0], sizes = [32, 8], strides = [1, 1]} : vector<32x32xbf16> to vector<32x8xbf16>
    %179 = vector.shape_cast %178 : vector<32x8xbf16> to vector<2x16x8xbf16>
    %180 = vector.extract_strided_slice %175 {offsets = [0, 0], sizes = [32, 8], strides = [1, 1]} : vector<32x32xbf16> to vector<32x8xbf16>
    %181 = vector.shape_cast %180 : vector<32x8xbf16> to vector<2x16x8xbf16>
    "tpu.trace_start"() <{level = 10 : i32, message = "bqd,bkd->bqk"}> : () -> ()
    %cst_75 = arith.constant dense<0.000000e+00> : vector<2x8x16xf32>
    %182 = tpu.matmul %177, %179, %cst_75 {dimension_numbers = #tpu.dot_dimension_numbers<[2], [2], [1], [1], [0, 0, 0, 1, 1, 1], [0], [0]>} : vector<2x8x8xbf16>, vector<2x16x8xbf16>, vector<2x8x16xf32> -> vector<2x8x16xf32>
    "tpu.trace_stop"() : () -> ()
    %cst_76 = arith.constant 0.353553385 : f32
    %183 = vector.broadcast %cst_76 : f32 to vector<2x8x16xf32>
    %184 = arith.mulf %182, %183 : vector<2x8x16xf32>
    %185 = vector.broadcast %5 : vector<1x1x16xf32> to vector<2x8x16xf32>
    %186 = arith.addf %184, %185 : vector<2x8x16xf32>
    %cst_77 = arith.constant dense<0xFF800000> : vector<2x8xf32>
    %187 = vector.multi_reduction <maximumf>, %186, %cst_77 [2] : vector<2x8x16xf32> to vector<2x8xf32>
    %188 = vector.shape_cast %187 : vector<2x8xf32> to vector<2x8x1xf32>
    %189 = vector.broadcast %188 : vector<2x8x1xf32> to vector<2x8x16xf32>
    %190 = arith.subf %186, %189 : vector<2x8x16xf32>
    %191 = math.exp %190 : vector<2x8x16xf32>
    %cst_78 = arith.constant dense<0.000000e+00> : vector<2x8xf32>
    %192 = vector.multi_reduction <add>, %191, %cst_78 [2] : vector<2x8x16xf32> to vector<2x8xf32>
    %193 = vector.shape_cast %192 : vector<2x8xf32> to vector<2x8x1xf32>
    %194 = tpu.reciprocal %193 {approx = true} : vector<2x8x1xf32> -> vector<2x8x1xf32>
    %195 = vector.broadcast %194 : vector<2x8x1xf32> to vector<2x8x16xf32>
    %196 = arith.mulf %191, %195 : vector<2x8x16xf32>
    %197 = arith.truncf %196 : vector<2x8x16xf32> to vector<2x8x16xbf16>
    "tpu.trace_start"() <{level = 10 : i32, message = "bqk,bkd->bqd"}> : () -> ()
    %cst_79 = arith.constant dense<0.000000e+00> : vector<2x8x8xf32>
    %198 = tpu.matmul %197, %181, %cst_79 {dimension_numbers = #tpu.dot_dimension_numbers<[2], [1], [1], [2], [0, 0, 0, 1, 1, 2], [0], [0]>} : vector<2x8x16xbf16>, vector<2x16x8xbf16>, vector<2x8x8xf32> -> vector<2x8x8xf32>
    "tpu.trace_stop"() : () -> ()
    %199 = vector.shape_cast %198 : vector<2x8x8xf32> to vector<16x8xf32>
    %200 = arith.truncf %199 : vector<16x8xf32> to vector<16x8xbf16>
    %c0_80 = arith.constant 0 : index
    %c0_81 = arith.constant 0 : index
    %201 = vector.load %arg27[%c0_80, %c0_81] : memref<16x32xbf16, #tpu.memory_space<vmem>>, vector<16x8xbf16>
    tpu.vector_store %arg27[%c0_80, %c0_81], %200 {strides = array<i32>} : memref<16x32xbf16, #tpu.memory_space<vmem>>, vector<16x8xbf16>,
    %202 = vector.extract_strided_slice %173 {offsets = [0, 8], sizes = [16, 8], strides = [1, 1]} : vector<16x32xbf16> to vector<16x8xbf16>
    %203 = vector.shape_cast %202 : vector<16x8xbf16> to vector<2x8x8xbf16>
    %204 = vector.extract_strided_slice %174 {offsets = [0, 8], sizes = [32, 8], strides = [1, 1]} : vector<32x32xbf16> to vector<32x8xbf16>
    %205 = vector.shape_cast %204 : vector<32x8xbf16> to vector<2x16x8xbf16>
    %206 = vector.extract_strided_slice %175 {offsets = [0, 8], sizes = [32, 8], strides = [1, 1]} : vector<32x32xbf16> to vector<32x8xbf16>
    %207 = vector.shape_cast %206 : vector<32x8xbf16> to vector<2x16x8xbf16>
    "tpu.trace_start"() <{level = 10 : i32, message = "bqd,bkd->bqk"}> : () -> ()
    %cst_82 = arith.constant dense<0.000000e+00> : vector<2x8x16xf32>
    %208 = tpu.matmul %203, %205, %cst_82 {dimension_numbers = #tpu.dot_dimension_numbers<[2], [2], [1], [1], [0, 0, 0, 1, 1, 1], [0], [0]>} : vector<2x8x8xbf16>, vector<2x16x8xbf16>, vector<2x8x16xf32> -> vector<2x8x16xf32>
    "tpu.trace_stop"() : () -> ()
    %cst_83 = arith.constant 0.353553385 : f32
    %209 = vector.broadcast %cst_83 : f32 to vector<2x8x16xf32>
    %210 = arith.mulf %208, %209 : vector<2x8x16xf32>
    %211 = vector.broadcast %5 : vector<1x1x16xf32> to vector<2x8x16xf32>
    %212 = arith.addf %210, %211 : vector<2x8x16xf32>
    %cst_84 = arith.constant dense<0xFF800000> : vector<2x8xf32>
    %213 = vector.multi_reduction <maximumf>, %212, %cst_84 [2] : vector<2x8x16xf32> to vector<2x8xf32>
    %214 = vector.shape_cast %213 : vector<2x8xf32> to vector<2x8x1xf32>
    %215 = vector.broadcast %214 : vector<2x8x1xf32> to vector<2x8x16xf32>
    %216 = arith.subf %212, %215 : vector<2x8x16xf32>
    %217 = math.exp %216 : vector<2x8x16xf32>
    %cst_85 = arith.constant dense<0.000000e+00> : vector<2x8xf32>
    %218 = vector.multi_reduction <add>, %217, %cst_85 [2] : vector<2x8x16xf32> to vector<2x8xf32>
    %219 = vector.shape_cast %218 : vector<2x8xf32> to vector<2x8x1xf32>
    %220 = tpu.reciprocal %219 {approx = true} : vector<2x8x1xf32> -> vector<2x8x1xf32>
    %221 = vector.broadcast %220 : vector<2x8x1xf32> to vector<2x8x16xf32>
    %222 = arith.mulf %217, %221 : vector<2x8x16xf32>
    %223 = arith.truncf %222 : vector<2x8x16xf32> to vector<2x8x16xbf16>
    "tpu.trace_start"() <{level = 10 : i32, message = "bqk,bkd->bqd"}> : () -> ()
    %cst_86 = arith.constant dense<0.000000e+00> : vector<2x8x8xf32>
    %224 = tpu.matmul %223, %207, %cst_86 {dimension_numbers = #tpu.dot_dimension_numbers<[2], [1], [1], [2], [0, 0, 0, 1, 1, 2], [0], [0]>} : vector<2x8x16xbf16>, vector<2x16x8xbf16>, vector<2x8x8xf32> -> vector<2x8x8xf32>
    "tpu.trace_stop"() : () -> ()
    %225 = vector.shape_cast %224 : vector<2x8x8xf32> to vector<16x8xf32>
    %226 = arith.truncf %225 : vector<16x8xf32> to vector<16x8xbf16>
    %c0_87 = arith.constant 0 : index
    %c8_88 = arith.constant 8 : index
    %227 = vector.load %arg27[%c0_87, %c8_88] : memref<16x32xbf16, #tpu.memory_space<vmem>>, vector<16x8xbf16>
    tpu.vector_store %arg27[%c0_87, %c8_88], %226 {strides = array<i32>} : memref<16x32xbf16, #tpu.memory_space<vmem>>, vector<16x8xbf16>,
    %228 = vector.extract_strided_slice %173 {offsets = [0, 16], sizes = [16, 8], strides = [1, 1]} : vector<16x32xbf16> to vector<16x8xbf16>
    %229 = vector.shape_cast %228 : vector<16x8xbf16> to vector<2x8x8xbf16>
    %230 = vector.extract_strided_slice %174 {offsets = [0, 16], sizes = [32, 8], strides = [1, 1]} : vector<32x32xbf16> to vector<32x8xbf16>
    %231 = vector.shape_cast %230 : vector<32x8xbf16> to vector<2x16x8xbf16>
    %232 = vector.extract_strided_slice %175 {offsets = [0, 16], sizes = [32, 8], strides = [1, 1]} : vector<32x32xbf16> to vector<32x8xbf16>
    %233 = vector.shape_cast %232 : vector<32x8xbf16> to vector<2x16x8xbf16>
    "tpu.trace_start"() <{level = 10 : i32, message = "bqd,bkd->bqk"}> : () -> ()
    %cst_89 = arith.constant dense<0.000000e+00> : vector<2x8x16xf32>
    %234 = tpu.matmul %229, %231, %cst_89 {dimension_numbers = #tpu.dot_dimension_numbers<[2], [2], [1], [1], [0, 0, 0, 1, 1, 1], [0], [0]>} : vector<2x8x8xbf16>, vector<2x16x8xbf16>, vector<2x8x16xf32> -> vector<2x8x16xf32>
    "tpu.trace_stop"() : () -> ()
    %cst_90 = arith.constant 0.353553385 : f32
    %235 = vector.broadcast %cst_90 : f32 to vector<2x8x16xf32>
    %236 = arith.mulf %234, %235 : vector<2x8x16xf32>
    %237 = vector.broadcast %5 : vector<1x1x16xf32> to vector<2x8x16xf32>
    %238 = arith.addf %236, %237 : vector<2x8x16xf32>
    %cst_91 = arith.constant dense<0xFF800000> : vector<2x8xf32>
    %239 = vector.multi_reduction <maximumf>, %238, %cst_91 [2] : vector<2x8x16xf32> to vector<2x8xf32>
    %240 = vector.shape_cast %239 : vector<2x8xf32> to vector<2x8x1xf32>
    %241 = vector.broadcast %240 : vector<2x8x1xf32> to vector<2x8x16xf32>
    %242 = arith.subf %238, %241 : vector<2x8x16xf32>
    %243 = math.exp %242 : vector<2x8x16xf32>
    %cst_92 = arith.constant dense<0.000000e+00> : vector<2x8xf32>
    %244 = vector.multi_reduction <add>, %243, %cst_92 [2] : vector<2x8x16xf32> to vector<2x8xf32>
    %245 = vector.shape_cast %244 : vector<2x8xf32> to vector<2x8x1xf32>
    %246 = tpu.reciprocal %245 {approx = true} : vector<2x8x1xf32> -> vector<2x8x1xf32>
    %247 = vector.broadcast %246 : vector<2x8x1xf32> to vector<2x8x16xf32>
    %248 = arith.mulf %243, %247 : vector<2x8x16xf32>
    %249 = arith.truncf %248 : vector<2x8x16xf32> to vector<2x8x16xbf16>
    "tpu.trace_start"() <{level = 10 : i32, message = "bqk,bkd->bqd"}> : () -> ()
    %cst_93 = arith.constant dense<0.000000e+00> : vector<2x8x8xf32>
    %250 = tpu.matmul %249, %233, %cst_93 {dimension_numbers = #tpu.dot_dimension_numbers<[2], [1], [1], [2], [0, 0, 0, 1, 1, 2], [0], [0]>} : vector<2x8x16xbf16>, vector<2x16x8xbf16>, vector<2x8x8xf32> -> vector<2x8x8xf32>
    "tpu.trace_stop"() : () -> ()
    %251 = vector.shape_cast %250 : vector<2x8x8xf32> to vector<16x8xf32>
    %252 = arith.truncf %251 : vector<16x8xf32> to vector<16x8xbf16>
    %c0_94 = arith.constant 0 : index
    %c16_95 = arith.constant 16 : index
    %253 = vector.load %arg27[%c0_94, %c16_95] : memref<16x32xbf16, #tpu.memory_space<vmem>>, vector<16x8xbf16>
    tpu.vector_store %arg27[%c0_94, %c16_95], %252 {strides = array<i32>} : memref<16x32xbf16, #tpu.memory_space<vmem>>, vector<16x8xbf16>,
    %254 = vector.extract_strided_slice %173 {offsets = [0, 24], sizes = [16, 8], strides = [1, 1]} : vector<16x32xbf16> to vector<16x8xbf16>
    %255 = vector.shape_cast %254 : vector<16x8xbf16> to vector<2x8x8xbf16>
    %256 = vector.extract_strided_slice %174 {offsets = [0, 24], sizes = [32, 8], strides = [1, 1]} : vector<32x32xbf16> to vector<32x8xbf16>
    %257 = vector.shape_cast %256 : vector<32x8xbf16> to vector<2x16x8xbf16>
    %258 = vector.extract_strided_slice %175 {offsets = [0, 24], sizes = [32, 8], strides = [1, 1]} : vector<32x32xbf16> to vector<32x8xbf16>
    %259 = vector.shape_cast %258 : vector<32x8xbf16> to vector<2x16x8xbf16>
    "tpu.trace_start"() <{level = 10 : i32, message = "bqd,bkd->bqk"}> : () -> ()
    %cst_96 = arith.constant dense<0.000000e+00> : vector<2x8x16xf32>
    %260 = tpu.matmul %255, %257, %cst_96 {dimension_numbers = #tpu.dot_dimension_numbers<[2], [2], [1], [1], [0, 0, 0, 1, 1, 1], [0], [0]>} : vector<2x8x8xbf16>, vector<2x16x8xbf16>, vector<2x8x16xf32> -> vector<2x8x16xf32>
    "tpu.trace_stop"() : () -> ()
    %cst_97 = arith.constant 0.353553385 : f32
    %261 = vector.broadcast %cst_97 : f32 to vector<2x8x16xf32>
    %262 = arith.mulf %260, %261 : vector<2x8x16xf32>
    %263 = vector.broadcast %5 : vector<1x1x16xf32> to vector<2x8x16xf32>
    %264 = arith.addf %262, %263 : vector<2x8x16xf32>
    %cst_98 = arith.constant dense<0xFF800000> : vector<2x8xf32>
    %265 = vector.multi_reduction <maximumf>, %264, %cst_98 [2] : vector<2x8x16xf32> to vector<2x8xf32>
    %266 = vector.shape_cast %265 : vector<2x8xf32> to vector<2x8x1xf32>
    %267 = vector.broadcast %266 : vector<2x8x1xf32> to vector<2x8x16xf32>
    %268 = arith.subf %264, %267 : vector<2x8x16xf32>
    %269 = math.exp %268 : vector<2x8x16xf32>
    %cst_99 = arith.constant dense<0.000000e+00> : vector<2x8xf32>
    %270 = vector.multi_reduction <add>, %269, %cst_99 [2] : vector<2x8x16xf32> to vector<2x8xf32>
    %271 = vector.shape_cast %270 : vector<2x8xf32> to vector<2x8x1xf32>
    %272 = tpu.reciprocal %271 {approx = true} : vector<2x8x1xf32> -> vector<2x8x1xf32>
    %273 = vector.broadcast %272 : vector<2x8x1xf32> to vector<2x8x16xf32>
    %274 = arith.mulf %269, %273 : vector<2x8x16xf32>
    %275 = arith.truncf %274 : vector<2x8x16xf32> to vector<2x8x16xbf16>
    "tpu.trace_start"() <{level = 10 : i32, message = "bqk,bkd->bqd"}> : () -> ()
    %cst_100 = arith.constant dense<0.000000e+00> : vector<2x8x8xf32>
    %276 = tpu.matmul %275, %259, %cst_100 {dimension_numbers = #tpu.dot_dimension_numbers<[2], [1], [1], [2], [0, 0, 0, 1, 1, 2], [0], [0]>} : vector<2x8x16xbf16>, vector<2x16x8xbf16>, vector<2x8x8xf32> -> vector<2x8x8xf32>
    "tpu.trace_stop"() : () -> ()
    %277 = vector.shape_cast %276 : vector<2x8x8xf32> to vector<16x8xf32>
    %278 = arith.truncf %277 : vector<16x8xf32> to vector<16x8xbf16>
    %c0_101 = arith.constant 0 : index
    %c24_102 = arith.constant 24 : index
    %279 = vector.load %arg27[%c0_101, %c24_102] : memref<16x32xbf16, #tpu.memory_space<vmem>>, vector<16x8xbf16>
    tpu.vector_store %arg27[%c0_101, %c24_102], %278 {strides = array<i32>} : memref<16x32xbf16, #tpu.memory_space<vmem>>, vector<16x8xbf16>,
    %c0_103 = arith.constant 0 : index
    %c0_104 = arith.constant 0 : index
    %280 = vector.load %arg27[%c0_103, %c0_104] : memref<16x32xbf16, #tpu.memory_space<vmem>>, vector<16x32xbf16>
    %c0_105 = arith.constant 0 : index
    %c0_106 = arith.constant 0 : index
    %c0_107 = arith.constant 0 : index
    %281 = vector.load %arg15[%c0_105, %c0_106, %c0_107] : memref<1x32x32xbf16, #tpu.memory_space<vmem>>, vector<1x32x32xbf16>
    %282 = vector.shape_cast %281 : vector<1x32x32xbf16> to vector<32x32xbf16>
    %cst_108 = arith.constant dense<0.000000e+00> : vector<16x32xf32>
    %283 = tpu.matmul %280, %282, %cst_108 {dimension_numbers = #tpu.dot_dimension_numbers<[1], [0], [0], [1], [0, 0, 1, 1], [], []>} : vector<16x32xbf16>, vector<32x32xbf16>, vector<16x32xf32> -> vector<16x32xf32>
    %c0_109 = arith.constant 0 : index
    %c0_110 = arith.constant 0 : index
    %c0_111 = arith.constant 0 : index
    %284 = vector.load %arg16[%c0_109, %c0_110, %c0_111] : memref<1x1x32xf32, #tpu.memory_space<vmem>>, vector<1x1x32xf32>
    %285 = vector.shape_cast %284 : vector<1x1x32xf32> to vector<1x32xf32>
    %286 = vector.broadcast %285 : vector<1x32xf32> to vector<16x32xf32>
    %287 = arith.addf %283, %286 : vector<16x32xf32>
    %288 = arith.addf %154, %287 : vector<16x32xf32>
    %c0_112 = arith.constant 0 : index
    %c0_113 = arith.constant 0 : index
    %c0_114 = arith.constant 0 : index
    %289 = vector.load %arg17[%c0_112, %c0_113, %c0_114] : memref<1x1x32xf32, #tpu.memory_space<vmem>>, vector<1x1x32xf32>
    %290 = vector.shape_cast %289 : vector<1x1x32xf32> to vector<1x32xf32>
    %c0_115 = arith.constant 0 : index
    %c0_116 = arith.constant 0 : index
    %c0_117 = arith.constant 0 : index
    %291 = vector.load %arg18[%c0_115, %c0_116, %c0_117] : memref<1x1x32xf32, #tpu.memory_space<vmem>>, vector<1x1x32xf32>
    %292 = vector.shape_cast %291 : vector<1x1x32xf32> to vector<1x32xf32>
    %cst_118 = arith.constant dense<0.000000e+00> : vector<16xf32>
    %293 = vector.multi_reduction <add>, %288, %cst_118 [1] : vector<16x32xf32> to vector<16xf32>
    %294 = vector.shape_cast %293 : vector<16xf32> to vector<16x1xf32>
    %cst_119 = arith.constant 3.200000e+01 : f32
    %295 = vector.broadcast %cst_119 : f32 to vector<16x1xf32>
    %296 = arith.divf %294, %295 : vector<16x1xf32>
    %297 = vector.broadcast %296 : vector<16x1xf32> to vector<16x32xf32>
    %298 = arith.subf %288, %297 : vector<16x32xf32>
    %299 = arith.mulf %298, %298 : vector<16x32xf32>
    %cst_120 = arith.constant dense<0.000000e+00> : vector<16xf32>
    %300 = vector.multi_reduction <add>, %299, %cst_120 [1] : vector<16x32xf32> to vector<16xf32>
    %301 = vector.shape_cast %300 : vector<16xf32> to vector<16x1xf32>
    %cst_121 = arith.constant 3.200000e+01 : f32
    %302 = vector.broadcast %cst_121 : f32 to vector<16x1xf32>
    %303 = arith.divf %301, %302 : vector<16x1xf32>
    %304 = vector.broadcast %296 : vector<16x1xf32> to vector<16x32xf32>
    %305 = arith.subf %288, %304 : vector<16x32xf32>
    %cst_122 = arith.constant 9.99999974E-6 : f32
    %306 = vector.broadcast %cst_122 : f32 to vector<16x1xf32>
    %307 = arith.addf %303, %306 : vector<16x1xf32>
    %308 = math.rsqrt %307 : vector<16x1xf32>
    %309 = vector.broadcast %308 : vector<16x1xf32> to vector<16x32xf32>
    %310 = arith.mulf %305, %309 : vector<16x32xf32>
    %311 = vector.broadcast %290 : vector<1x32xf32> to vector<16x32xf32>
    %312 = arith.mulf %310, %311 : vector<16x32xf32>
    %313 = vector.broadcast %292 : vector<1x32xf32> to vector<16x32xf32>
    %314 = arith.addf %312, %313 : vector<16x32xf32>
    %315 = arith.truncf %314 : vector<16x32xf32> to vector<16x32xbf16>
    %cst_123 = arith.constant 0.000000e+00 : f32
    %316 = vector.broadcast %cst_123 : f32 to vector<16x32xf32>
    %c0_124 = arith.constant 0 : index
    %c0_125 = arith.constant 0 : index
    %c0_126 = arith.constant 0 : index
    %317 = vector.load %arg19[%c0_124, %c0_125, %c0_126] : memref<1x32x2048xbf16, #tpu.memory_space<vmem>>, vector<1x32x512xbf16>
    %318 = vector.shape_cast %317 : vector<1x32x512xbf16> to vector<32x512xbf16>
    %cst_127 = arith.constant dense<0.000000e+00> : vector<16x512xf32>
    %319 = tpu.matmul %315, %318, %cst_127 {dimension_numbers = #tpu.dot_dimension_numbers<[1], [0], [0], [1], [0, 0, 1, 1], [], []>} : vector<16x32xbf16>, vector<32x512xbf16>, vector<16x512xf32> -> vector<16x512xf32>
    %c0_128 = arith.constant 0 : index
    %c0_129 = arith.constant 0 : index
    %c0_130 = arith.constant 0 : index
    %320 = vector.load %arg20[%c0_128, %c0_129, %c0_130] : memref<1x1x2048xf32, #tpu.memory_space<vmem>>, vector<1x1x512xf32>
    %321 = vector.shape_cast %320 : vector<1x1x512xf32> to vector<1x512xf32>
    %322 = vector.broadcast %321 : vector<1x512xf32> to vector<16x512xf32>
    %323 = arith.addf %319, %322 : vector<16x512xf32>
    %cst_131 = arith.constant 0.000000e+00 : f32
    %324 = vector.broadcast %cst_131 : f32 to vector<16x512xf32>
    %325 = arith.maximumf %323, %324 : vector<16x512xf32>
    %326 = arith.truncf %325 : vector<16x512xf32> to vector<16x512xbf16>
    %c0_132 = arith.constant 0 : index
    %c0_133 = arith.constant 0 : index
    %c0_134 = arith.constant 0 : index
    %327 = vector.load %arg21[%c0_132, %c0_133, %c0_134] : memref<1x2048x32xbf16, #tpu.memory_space<vmem>>, vector<1x512x32xbf16>
    %328 = vector.shape_cast %327 : vector<1x512x32xbf16> to vector<512x32xbf16>
    %cst_135 = arith.constant dense<0.000000e+00> : vector<16x32xf32>
    %329 = tpu.matmul %326, %328, %cst_135 {dimension_numbers = #tpu.dot_dimension_numbers<[1], [0], [0], [1], [0, 0, 1, 1], [], []>} : vector<16x512xbf16>, vector<512x32xbf16>, vector<16x32xf32> -> vector<16x32xf32>
    %330 = arith.addf %316, %329 : vector<16x32xf32>
    %c0_136 = arith.constant 0 : index
    %c0_137 = arith.constant 0 : index
    %c512 = arith.constant 512 : index
    %331 = vector.load %arg19[%c0_136, %c0_137, %c512] : memref<1x32x2048xbf16, #tpu.memory_space<vmem>>, vector<1x32x512xbf16>
    %332 = vector.shape_cast %331 : vector<1x32x512xbf16> to vector<32x512xbf16>
    %cst_138 = arith.constant dense<0.000000e+00> : vector<16x512xf32>
    %333 = tpu.matmul %315, %332, %cst_138 {dimension_numbers = #tpu.dot_dimension_numbers<[1], [0], [0], [1], [0, 0, 1, 1], [], []>} : vector<16x32xbf16>, vector<32x512xbf16>, vector<16x512xf32> -> vector<16x512xf32>
    %c0_139 = arith.constant 0 : index
    %c0_140 = arith.constant 0 : index
    %c512_141 = arith.constant 512 : index
    %334 = vector.load %arg20[%c0_139, %c0_140, %c512_141] : memref<1x1x2048xf32, #tpu.memory_space<vmem>>, vector<1x1x512xf32>
    %335 = vector.shape_cast %334 : vector<1x1x512xf32> to vector<1x512xf32>
    %336 = vector.broadcast %335 : vector<1x512xf32> to vector<16x512xf32>
    %337 = arith.addf %333, %336 : vector<16x512xf32>
    %cst_142 = arith.constant 0.000000e+00 : f32
    %338 = vector.broadcast %cst_142 : f32 to vector<16x512xf32>
    %339 = arith.maximumf %337, %338 : vector<16x512xf32>
    %340 = arith.truncf %339 : vector<16x512xf32> to vector<16x512xbf16>
    %c0_143 = arith.constant 0 : index
    %c512_144 = arith.constant 512 : index
    %c0_145 = arith.constant 0 : index
    %341 = vector.load %arg21[%c0_143, %c512_144, %c0_145] : memref<1x2048x32xbf16, #tpu.memory_space<vmem>>, vector<1x512x32xbf16>
    %342 = vector.shape_cast %341 : vector<1x512x32xbf16> to vector<512x32xbf16>
    %cst_146 = arith.constant dense<0.000000e+00> : vector<16x32xf32>
    %343 = tpu.matmul %340, %342, %cst_146 {dimension_numbers = #tpu.dot_dimension_numbers<[1], [0], [0], [1], [0, 0, 1, 1], [], []>} : vector<16x512xbf16>, vector<512x32xbf16>, vector<16x32xf32> -> vector<16x32xf32>
    %344 = arith.addf %330, %343 : vector<16x32xf32>
    %c0_147 = arith.constant 0 : index
    %c0_148 = arith.constant 0 : index
    %c1024 = arith.constant 1024 : index
    %345 = vector.load %arg19[%c0_147, %c0_148, %c1024] : memref<1x32x2048xbf16, #tpu.memory_space<vmem>>, vector<1x32x512xbf16>
    %346 = vector.shape_cast %345 : vector<1x32x512xbf16> to vector<32x512xbf16>
    %cst_149 = arith.constant dense<0.000000e+00> : vector<16x512xf32>
    %347 = tpu.matmul %315, %346, %cst_149 {dimension_numbers = #tpu.dot_dimension_numbers<[1], [0], [0], [1], [0, 0, 1, 1], [], []>} : vector<16x32xbf16>, vector<32x512xbf16>, vector<16x512xf32> -> vector<16x512xf32>
    %c0_150 = arith.constant 0 : index
    %c0_151 = arith.constant 0 : index
    %c1024_152 = arith.constant 1024 : index
    %348 = vector.load %arg20[%c0_150, %c0_151, %c1024_152] : memref<1x1x2048xf32, #tpu.memory_space<vmem>>, vector<1x1x512xf32>
    %349 = vector.shape_cast %348 : vector<1x1x512xf32> to vector<1x512xf32>
    %350 = vector.broadcast %349 : vector<1x512xf32> to vector<16x512xf32>
    %351 = arith.addf %347, %350 : vector<16x512xf32>
    %cst_153 = arith.constant 0.000000e+00 : f32
    %352 = vector.broadcast %cst_153 : f32 to vector<16x512xf32>
    %353 = arith.maximumf %351, %352 : vector<16x512xf32>
    %354 = arith.truncf %353 : vector<16x512xf32> to vector<16x512xbf16>
    %c0_154 = arith.constant 0 : index
    %c1024_155 = arith.constant 1024 : index
    %c0_156 = arith.constant 0 : index
    %355 = vector.load %arg21[%c0_154, %c1024_155, %c0_156] : memref<1x2048x32xbf16, #tpu.memory_space<vmem>>, vector<1x512x32xbf16>
    %356 = vector.shape_cast %355 : vector<1x512x32xbf16> to vector<512x32xbf16>
    %cst_157 = arith.constant dense<0.000000e+00> : vector<16x32xf32>
    %357 = tpu.matmul %354, %356, %cst_157 {dimension_numbers = #tpu.dot_dimension_numbers<[1], [0], [0], [1], [0, 0, 1, 1], [], []>} : vector<16x512xbf16>, vector<512x32xbf16>, vector<16x32xf32> -> vector<16x32xf32>
    %358 = arith.addf %344, %357 : vector<16x32xf32>
    %c0_158 = arith.constant 0 : index
    %c0_159 = arith.constant 0 : index
    %c1536 = arith.constant 1536 : index
    %359 = vector.load %arg19[%c0_158, %c0_159, %c1536] : memref<1x32x2048xbf16, #tpu.memory_space<vmem>>, vector<1x32x512xbf16>
    %360 = vector.shape_cast %359 : vector<1x32x512xbf16> to vector<32x512xbf16>
    %cst_160 = arith.constant dense<0.000000e+00> : vector<16x512xf32>
    %361 = tpu.matmul %315, %360, %cst_160 {dimension_numbers = #tpu.dot_dimension_numbers<[1], [0], [0], [1], [0, 0, 1, 1], [], []>} : vector<16x32xbf16>, vector<32x512xbf16>, vector<16x512xf32> -> vector<16x512xf32>
    %c0_161 = arith.constant 0 : index
    %c0_162 = arith.constant 0 : index
    %c1536_163 = arith.constant 1536 : index
    %362 = vector.load %arg20[%c0_161, %c0_162, %c1536_163] : memref<1x1x2048xf32, #tpu.memory_space<vmem>>, vector<1x1x512xf32>
    %363 = vector.shape_cast %362 : vector<1x1x512xf32> to vector<1x512xf32>
    %364 = vector.broadcast %363 : vector<1x512xf32> to vector<16x512xf32>
    %365 = arith.addf %361, %364 : vector<16x512xf32>
    %cst_164 = arith.constant 0.000000e+00 : f32
    %366 = vector.broadcast %cst_164 : f32 to vector<16x512xf32>
    %367 = arith.maximumf %365, %366 : vector<16x512xf32>
    %368 = arith.truncf %367 : vector<16x512xf32> to vector<16x512xbf16>
    %c0_165 = arith.constant 0 : index
    %c1536_166 = arith.constant 1536 : index
    %c0_167 = arith.constant 0 : index
    %369 = vector.load %arg21[%c0_165, %c1536_166, %c0_167] : memref<1x2048x32xbf16, #tpu.memory_space<vmem>>, vector<1x512x32xbf16>
    %370 = vector.shape_cast %369 : vector<1x512x32xbf16> to vector<512x32xbf16>
    %cst_168 = arith.constant dense<0.000000e+00> : vector<16x32xf32>
    %371 = tpu.matmul %368, %370, %cst_168 {dimension_numbers = #tpu.dot_dimension_numbers<[1], [0], [0], [1], [0, 0, 1, 1], [], []>} : vector<16x512xbf16>, vector<512x32xbf16>, vector<16x32xf32> -> vector<16x32xf32>
    %372 = arith.addf %358, %371 : vector<16x32xf32>
    %c0_169 = arith.constant 0 : index
    %c0_170 = arith.constant 0 : index
    %c0_171 = arith.constant 0 : index
    %373 = vector.load %arg22[%c0_169, %c0_170, %c0_171] : memref<1x1x32xf32, #tpu.memory_space<vmem>>, vector<1x1x32xf32>
    %374 = vector.shape_cast %373 : vector<1x1x32xf32> to vector<1x32xf32>
    %375 = vector.broadcast %374 : vector<1x32xf32> to vector<16x32xf32>
    %376 = arith.addf %372, %375 : vector<16x32xf32>
    %377 = arith.addf %314, %376 : vector<16x32xf32>
    %c0_172 = arith.constant 0 : index
    %c0_173 = arith.constant 0 : index
    %c0_174 = arith.constant 0 : index
    %378 = vector.load %arg23[%c0_172, %c0_173, %c0_174] : memref<1x1x32xf32, #tpu.memory_space<vmem>>, vector<1x1x32xf32>
    %379 = vector.shape_cast %378 : vector<1x1x32xf32> to vector<1x32xf32>
    %c0_175 = arith.constant 0 : index
    %c0_176 = arith.constant 0 : index
    %c0_177 = arith.constant 0 : index
    %380 = vector.load %arg24[%c0_175, %c0_176, %c0_177] : memref<1x1x32xf32, #tpu.memory_space<vmem>>, vector<1x1x32xf32>
    %381 = vector.shape_cast %380 : vector<1x1x32xf32> to vector<1x32xf32>
    %cst_178 = arith.constant dense<0.000000e+00> : vector<16xf32>
    %382 = vector.multi_reduction <add>, %377, %cst_178 [1] : vector<16x32xf32> to vector<16xf32>
    %383 = vector.shape_cast %382 : vector<16xf32> to vector<16x1xf32>
    %cst_179 = arith.constant 3.200000e+01 : f32
    %384 = vector.broadcast %cst_179 : f32 to vector<16x1xf32>
    %385 = arith.divf %383, %384 : vector<16x1xf32>
    %386 = vector.broadcast %385 : vector<16x1xf32> to vector<16x32xf32>
    %387 = arith.subf %377, %386 : vector<16x32xf32>
    %388 = arith.mulf %387, %387 : vector<16x32xf32>
    %cst_180 = arith.constant dense<0.000000e+00> : vector<16xf32>
    %389 = vector.multi_reduction <add>, %388, %cst_180 [1] : vector<16x32xf32> to vector<16xf32>
    %390 = vector.shape_cast %389 : vector<16xf32> to vector<16x1xf32>
    %cst_181 = arith.constant 3.200000e+01 : f32
    %391 = vector.broadcast %cst_181 : f32 to vector<16x1xf32>
    %392 = arith.divf %390, %391 : vector<16x1xf32>
    %393 = vector.broadcast %385 : vector<16x1xf32> to vector<16x32xf32>
    %394 = arith.subf %377, %393 : vector<16x32xf32>
    %cst_182 = arith.constant 9.99999974E-6 : f32
    %395 = vector.broadcast %cst_182 : f32 to vector<16x1xf32>
    %396 = arith.addf %392, %395 : vector<16x1xf32>
    %397 = math.rsqrt %396 : vector<16x1xf32>
    %398 = vector.broadcast %397 : vector<16x1xf32> to vector<16x32xf32>
    %399 = arith.mulf %394, %398 : vector<16x32xf32>
    %400 = vector.broadcast %379 : vector<1x32xf32> to vector<16x32xf32>
    %401 = arith.mulf %399, %400 : vector<16x32xf32>
    %402 = vector.broadcast %381 : vector<1x32xf32> to vector<16x32xf32>
    %403 = arith.addf %401, %402 : vector<16x32xf32>
    %c0_183 = arith.constant 0 : index
    %c0_184 = arith.constant 0 : index
    %404 = vector.load %arg26[%c0_183, %c0_184] : memref<16x32xf32, #tpu.memory_space<vmem>>, vector<16x32xf32>
    tpu.vector_store %arg26[%c0_183, %c0_184], %403 {strides = array<i32>} : memref<16x32xf32, #tpu.memory_space<vmem>>, vector<16x32xf32>,
    %c1_i32 = arith.constant 1 : i32
    %405 = arith.cmpi eq, %arg0, %c1_i32 : i32
    %406 = arith.extui %405 : i1 to i32
    %c0_i32_185 = arith.constant 0 : i32
    %407 = arith.cmpi ne, %406, %c0_i32_185 : i32
    scf.if %407 {
      %c0_186 = arith.constant 0 : index
      %c0_187 = arith.constant 0 : index
      %408 = vector.load %arg25[%c0_186, %c0_187] : memref<16x32xf32, #tpu.memory_space<vmem>>, vector<16x32xf32>
      tpu.vector_store %arg25[%c0_186, %c0_187], %403 {strides = array<i32>} : memref<16x32xf32, #tpu.memory_space<vmem>>, vector<16x32xf32>,
    } else {
    }
    return
  }
  func.func @transform_0(%arg0: i32) -> (i32, i32) {
    %c0_i32 = arith.constant 0 : i32
    %c0_i32_0 = arith.constant 0 : i32
    %c0_i32_1 = arith.constant 0 : i32
    return %c0_i32, %c0_i32_0 : i32, i32
  }
  func.func @transform_1(%arg0: i32) -> (i32, i32) {
    %c0_i32 = arith.constant 0 : i32
    %c0_i32_0 = arith.constant 0 : i32
    %c0_i32_1 = arith.constant 0 : i32
    return %c0_i32, %c0_i32_0 : i32, i32
  }
  func.func @transform_2(%arg0: i32) -> (i32, i32, i32) {
    %c0_i32 = arith.constant 0 : i32
    %c0_i32_0 = arith.constant 0 : i32
    %c0_i32_1 = arith.constant 0 : i32
    %c0_i32_2 = arith.constant 0 : i32
    return %c0_i32, %c0_i32_0, %c0_i32_1 : i32, i32, i32
  }
  func.func @transform_3(%arg0: i32) -> (i32, i32, i32) {
    %c0_i32 = arith.constant 0 : i32
    %c0_i32_0 = arith.constant 0 : i32
    %c0_i32_1 = arith.constant 0 : i32
    %c0_i32_2 = arith.constant 0 : i32
    return %c0_i32, %c0_i32_0, %c0_i32_1 : i32, i32, i32
  }
  func.func @transform_4(%arg0: i32) -> (i32, i32, i32) {
    %c0_i32 = arith.constant 0 : i32
    %c0_i32_0 = arith.constant 0 : i32
    %c0_i32_1 = arith.constant 0 : i32
    return %arg0, %c0_i32, %c0_i32_0 : i32, i32, i32
  }
  func.func @transform_5(%arg0: i32) -> (i32, i32, i32) {
    %c0_i32 = arith.constant 0 : i32
    %c0_i32_0 = arith.constant 0 : i32
    %c0_i32_1 = arith.constant 0 : i32
    return %arg0, %c0_i32, %c0_i32_0 : i32, i32, i32
  }
  func.func @transform_6(%arg0: i32) -> (i32, i32, i32) {
    %c0_i32 = arith.constant 0 : i32
    %c0_i32_0 = arith.constant 0 : i32
    %c0_i32_1 = arith.constant 0 : i32
    return %arg0, %c0_i32, %c0_i32_0 : i32, i32, i32
  }
  func.func @transform_7(%arg0: i32) -> (i32, i32, i32) {
    %c0_i32 = arith.constant 0 : i32
    %c0_i32_0 = arith.constant 0 : i32
    %c0_i32_1 = arith.constant 0 : i32
    return %arg0, %c0_i32, %c0_i32_0 : i32, i32, i32
  }
  func.func @transform_8(%arg0: i32) -> (i32, i32, i32) {
    %c0_i32 = arith.constant 0 : i32
    %c0_i32_0 = arith.constant 0 : i32
    %c0_i32_1 = arith.constant 0 : i32
    return %arg0, %c0_i32, %c0_i32_0 : i32, i32, i32
  }
  func.func @transform_9(%arg0: i32) -> (i32, i32, i32) {
    %c0_i32 = arith.constant 0 : i32
    %c0_i32_0 = arith.constant 0 : i32
    %c0_i32_1 = arith.constant 0 : i32
    return %arg0, %c0_i32, %c0_i32_0 : i32, i32, i32
  }
  func.func @transform_10(%arg0: i32) -> (i32, i32, i32) {
    %c0_i32 = arith.constant 0 : i32
    %c0_i32_0 = arith.constant 0 : i32
    %c0_i32_1 = arith.constant 0 : i32
    return %arg0, %c0_i32, %c0_i32_0 : i32, i32, i32
  }
  func.func @transform_11(%arg0: i32) -> (i32, i32, i32) {
    %c0_i32 = arith.constant 0 : i32
    %c0_i32_0 = arith.constant 0 : i32
    %c0_i32_1 = arith.constant 0 : i32
    return %arg0, %c0_i32, %c0_i32_0 : i32, i32, i32
  }
  func.func @transform_12(%arg0: i32) -> (i32, i32, i32) {
    %c0_i32 = arith.constant 0 : i32
    %c0_i32_0 = arith.constant 0 : i32
    %c0_i32_1 = arith.constant 0 : i32
    return %arg0, %c0_i32, %c0_i32_0 : i32, i32, i32
  }
  func.func @transform_13(%arg0: i32) -> (i32, i32, i32) {
    %c0_i32 = arith.constant 0 : i32
    %c0_i32_0 = arith.constant 0 : i32
    %c0_i32_1 = arith.constant 0 : i32
    return %arg0, %c0_i32, %c0_i32_0 : i32, i32, i32
  }
  func.func @transform_14(%arg0: i32) -> (i32, i32, i32) {
    %c0_i32 = arith.constant 0 : i32
    %c0_i32_0 = arith.constant 0 : i32
    %c0_i32_1 = arith.constant 0 : i32
    return %arg0, %c0_i32, %c0_i32_0 : i32, i32, i32
  }
  func.func @transform_15(%arg0: i32) -> (i32, i32, i32) {
    %c0_i32 = arith.constant 0 : i32
    %c0_i32_0 = arith.constant 0 : i32
    %c0_i32_1 = arith.constant 0 : i32
    return %arg0, %c0_i32, %c0_i32_0 : i32, i32, i32
  }
  func.func @transform_16(%arg0: i32) -> (i32, i32, i32) {
    %c0_i32 = arith.constant 0 : i32
    %c0_i32_0 = arith.constant 0 : i32
    %c0_i32_1 = arith.constant 0 : i32
    return %arg0, %c0_i32, %c0_i32_0 : i32, i32, i32
  }
  func.func @transform_17(%arg0: i32) -> (i32, i32, i32) {
    %c0_i32 = arith.constant 0 : i32
    %c0_i32_0 = arith.constant 0 : i32
    %c0_i32_1 = arith.constant 0 : i32
    return %arg0, %c0_i32, %c0_i32_0 : i32, i32, i32
  }
  func.func @transform_18(%arg0: i32) -> (i32, i32, i32) {
    %c0_i32 = arith.constant 0 : i32
    %c0_i32_0 = arith.constant 0 : i32
    %c0_i32_1 = arith.constant 0 : i32
    return %arg0, %c0_i32, %c0_i32_0 : i32, i32, i32
  }
  func.func @transform_19(%arg0: i32) -> (i32, i32, i32) {
    %c0_i32 = arith.constant 0 : i32
    %c0_i32_0 = arith.constant 0 : i32
    %c0_i32_1 = arith.constant 0 : i32
    return %arg0, %c0_i32, %c0_i32_0 : i32, i32, i32
  }
  func.func @transform_20(%arg0: i32) -> (i32, i32, i32) {
    %c0_i32 = arith.constant 0 : i32
    %c0_i32_0 = arith.constant 0 : i32
    %c0_i32_1 = arith.constant 0 : i32
    return %arg0, %c0_i32, %c0_i32_0 : i32, i32, i32
  }
  func.func @transform_21(%arg0: i32) -> (i32, i32, i32) {
    %c0_i32 = arith.constant 0 : i32
    %c0_i32_0 = arith.constant 0 : i32
    %c0_i32_1 = arith.constant 0 : i32
    return %arg0, %c0_i32, %c0_i32_0 : i32, i32, i32
  }
  func.func @transform_22(%arg0: i32) -> (i32, i32, i32) {
    %c0_i32 = arith.constant 0 : i32
    %c0_i32_0 = arith.constant 0 : i32
    %c0_i32_1 = arith.constant 0 : i32
    return %arg0, %c0_i32, %c0_i32_0 : i32, i32, i32
  }
  func.func @transform_23(%arg0: i32) -> (i32, i32, i32) {
    %c0_i32 = arith.constant 0 : i32
    %c0_i32_0 = arith.constant 0 : i32
    %c0_i32_1 = arith.constant 0 : i32
    return %arg0, %c0_i32, %c0_i32_0 : i32, i32, i32
  }
  func.func @transform_24(%arg0: i32) -> (i32, i32) {
    %c0_i32 = arith.constant 0 : i32
    %c0_i32_0 = arith.constant 0 : i32
    %c0_i32_1 = arith.constant 0 : i32
    return %c0_i32, %c0_i32_0 : i32, i32
  }
}

</mosaic_0001>

<bundles_post_ra>
// kernel: tpu_custom_call.1
= control target key start
LH: loop header
LB: loop body
LE: loop exit
PB: predicated region body
PF: predicated region fallthrough
CT: control target
= control target key end

     0   :  { %s7720_s0 = inlined_call_operand.vmem [shape: f32[16,32], index: 0, kind: input, shape index: {}]   ;;  %s7721_s1 = inlined_call_operand.vmem [shape: bf16[32,32], index: 1, kind: input, shape index: {}]   ;;  %s7722_s2 = inlined_call_operand.vmem [shape: f32[2,8,8], index: 2, kind: input, shape index: {}]   ;;  %s7723_s3 = inlined_call_operand.vmem [shape: f32[1,1,16], index: 3, kind: input, shape index: {}]   ;;  %s7724_s4 = inlined_call_operand.vmem [shape: bf16[2,32,96], index: 4, kind: input, shape index: {}]   ;;  %s7725_s5 = inlined_call_operand.vmem [shape: f32[2,1,96], index: 5, kind: input, shape index: {}]   ;;  %s7726_s6 = inlined_call_operand.vmem [shape: bf16[2,32,32], index: 6, kind: input, shape index: {}]   ;;  %s7727_s7 = inlined_call_operand.vmem [shape: f32[2,1,32], index: 7, kind: input, shape index: {}]   ;;  %s7728_s8 = inlined_call_operand.vmem [shape: f32[2,1,32], index: 8, kind: input, shape index: {}]   ;;  %s7729_s9 = inlined_call_operand.vmem [shape: f32[2,1,32], index: 9, kind: input, shape index: {}]   ;;  %s7730_s10 = inlined_call_operand.vmem [shape: bf16[2,32,32], index: 10, kind: input, shape index: {}]   ;;  %s7731_s11 = inlined_call_operand.vmem [shape: f32[2,1,32], index: 11, kind: input, shape index: {}]   ;;  %s7732_s12 = inlined_call_operand.vmem [shape: bf16[2,32,64], index: 12, kind: input, shape index: {}]   ;;  %s7733_s13 = inlined_call_operand.vmem [shape: f32[2,1,64], index: 13, kind: input, shape index: {}]   ;;  %s7734_s14 = inlined_call_operand.vmem [shape: bf16[2,32,32], index: 14, kind: input, shape index: {}]   ;;  %s7735_s15 = inlined_call_operand.vmem [shape: f32[2,1,32], index: 15, kind: input, shape index: {}]   ;;  %s7736_s16 = inlined_call_operand.vmem [shape: f32[2,1,32], index: 16, kind: input, shape index: {}]   ;;  %s7737_s17 = inlined_call_operand.vmem [shape: f32[2,1,32], index: 17, kind: input, shape index: {}]   ;;  %s7738_s18 = inlined_call_operand.vmem [shape: bf16[2,32,2048], index: 18, kind: input, shape index: {}]   ;;  %s7739_s19 = inlined_call_operand.vmem [shape: f32[2,1,2048], index: 19, kind: input, shape index: {}]   ;;  %s7740_s20 = inlined_call_operand.vmem [shape: bf16[2,2048,32], index: 20, kind: input, shape index: {}]   ;;  %s7741_s21 = inlined_call_operand.vmem [shape: f32[2,1,32], index: 21, kind: input, shape index: {}]   ;;  %s7742_s22 = inlined_call_operand.vmem [shape: f32[2,1,32], index: 22, kind: input, shape index: {}]   ;;  %s7743_s23 = inlined_call_operand.vmem [shape: f32[2,1,32], index: 23, kind: input, shape index: {}]   ;;  %s7744_s24 = inlined_call_operand.hbm [shape: f32[16,32], index: 24, kind: output, shape index: {}]  }
   0x1   :  { %7753 = sst [smem:[#allocation10_spill]] %s7720_s0 }
   0x2   :  { %7754 = sst [smem:[#allocation11_spill]] %s7721_s1 }
   0x3   :  { %7755 = sst [smem:[#allocation12_spill]] %s7722_s2 }
   0x4   :  { %7756 = sst [smem:[#allocation13_spill]] %s7723_s3 }
   0x5   :  { %7757 = sst [smem:[#allocation14_spill]] %s7724_s4 }
   0x6   :  { %7758 = sst [smem:[#allocation15_spill]] %s7725_s5 }
   0x7   :  { %7759 = sst [smem:[#allocation16_spill]] %s7726_s6 }
   0x8   :  { %7760 = sst [smem:[#allocation17_spill]] %s7727_s7 }
   0x9   :  { %7761 = sst [smem:[#allocation18_spill]] %s7728_s8 }
   0xa   :  { %7762 = sst [smem:[#allocation19_spill]] %s7730_s10 }
   0xb   :  { %7763 = sst [smem:[#allocation20_spill]] %s7732_s12 }
   0xc   :  { %7764 = sst [smem:[#allocation21_spill]] %s7734_s14 }
   0xd   :  { %7765 = sst [smem:[#allocation22_spill]] %s7736_s16 }
   0xe   :  { %7766 = sst [smem:[#allocation23_spill]] %s7737_s17 }
   0xf   :  { %7767 = sst [smem:[#allocation24_spill]] %s7738_s18 }
  0x10   :  { %7768 = sst [smem:[#allocation25_spill]] %s7739_s19 }
  0x11   :  { %7769 = sst [smem:[#allocation26_spill]] %s7740_s20 }
  0x12   :  { %7770 = sst [smem:[#allocation27_spill]] %s7741_s21 }
  0x13   :  { %7771 = sst [smem:[#allocation28_spill]] %s7742_s22 }
  0x14   :  { %7772 = sst [smem:[#allocation29_spill]] %s7743_s23 }
  0x15   :  { %7773 = sst [smem:[#allocation30_spill]] %s7744_s24 }
  0x16   :  { %29 = vsyncpa [#allocation5], 0  ;;  %s6861_s5 = smov 0  }
  0x17 LB: > { %7774 = sst [smem:[#allocation7_spill]] %s6715_s5  ;;  %s6867_s26 = sadd.s32 4294967295, %s6715_s5   ;;  %s6715_s5 = sphi %s6861_s5, %s35_s5  }
  0x18   : > { %7775 = sst [smem:[#allocation8_spill]] %s6867_s26  ;;  %p5672_p0 = scmp.ge.s32.totalorder %s6715_s5, 1 }
  0x19   : > { %p823_p1 = scmp.lt.s32.totalorder %s6715_s5, 3 }
  0x1b   : > { %p824_p2 = pnand %p5672_p0, %p823_p1 }
  0x1d   : > { %827 = sbr.rel (%p824_p2) target bundleno = 7976 (0x1f28), region = 116 }
  0x24   : > { %p954_p3 = scmp.lt.s32.totalorder %s6867_s26, 1  ;;  %s7777_s3 = sld [smem:[#allocation14_spill]] }
  0x25   : > { %s7778_s1 = sld [smem:[#allocation16_spill]]  ;;  %s7781_s10 = sld [smem:[#allocation19_spill]] }
  0x26   : > { %s6873_s27 = scalar_select %p954_p3, %s6867_s26, 1 }
  0x27   : > { %s7782_s12 = sld [smem:[#allocation20_spill]]  ;;  %s7783_s14 = sld [smem:[#allocation21_spill]] }
  0x28   : > { %s5929_s28 = sshll.u32 %s6873_s27, 4  ;;  %s7786_s18 = sld [smem:[#allocation24_spill]] }
  0x29   : > { %s7788_s19 = sld [smem:[#allocation25_spill]]  ;;  %s5935_s2 = sshll.u32 %s6873_s27, 10 }
  0x2a   : > { %s6883_s25 = scalar_lea.vmem %s7777_s3, %s5929_s28  ;;  %s7789_s4 = sld [smem:[#allocation27_spill]] }
  0x2b   : > { %s6888_s5 = scalar_lea.vmem %s7778_s1, %s5929_s28  ;;  %s6905_s8 = scalar_lea.vmem %s7781_s10, %s5929_s28 }
  0x2c   : > { %s7790_s23 = sld [smem:[#allocation26_spill]]  ;;  %s7791_s21 = sld [smem:[#allocation28_spill]] }
  0x2d   : > { %s6914_s20 = scalar_lea.vmem %s7782_s12, %s5929_s28  ;;  %s6923_s30 = scalar_lea.vmem %s7783_s14, %s5929_s28 }
  0x2e   : > { %s5934_s12 = sshll.u32 %s6873_s27, 8 }
  0x2f   : > { %s6941_s0 = scalar_lea.vmem %s7786_s18, %s5934_s12  ;;  %s6946_s14 = scalar_lea.vmem %s7788_s19, %s5929_s28 }
  0x30   : > { %7787 = sst [smem:[#allocation9_spill]] %s6941_s0  ;;  %s1022_s1 = scalar_lea.vmem %s7789_s4, %s6873_s27 }
  0x31   : > { %s7792_s0 = sld [smem:[#allocation29_spill]]  ;;  %s7793_s28 = sld [smem:[#allocation8_spill]] }
  0x32   : > { %s6956_s26 = scalar_lea.vmem %s7790_s23, %s5935_s2  ;;  %s1025_s12 = scalar_lea.vmem %s7791_s21, %s6873_s27 }
  0x37   : > { %s1028_s7 = scalar_lea.vmem %s7792_s0, %s6873_s27  ;;  %p5688_p4 = scmp.ne.s32.totalorder %s7793_s28, 0 }
  0x38   : > { %s7794_s22 = sld [smem:[#allocation10_spill]] (!%p5688_p4)  ;;  %vm1036_vm0 = vcmask (!%p5688_p4), 261120  }
  0x39   : > { %1033 = sbr.rel (%p5688_p4) target bundleno = 64 (0x40), region = 120 }
  0x3e   : > { %v1034_v0 = vld [vmem:[%s7794_s22] sm:$0xff] (!%p5688_p4)  ;;  %v1035_v1 = vld [vmem:[%s7794_s22 + $0x8] sm:$0xff] (!%p5688_p4) }
  0x3f   : > { %1037 = vst.msk [vmem:[#allocation2] sm:$0xff] (!%p5688_p4), %vm1036_vm0, %v1034_v0  ;;  %1038 = vst.msk [vmem:[#allocation2 + $0x8] sm:$0xff] (!%p5688_p4), %vm1036_vm0, %v1035_v1 }
  0x40 PF: > { %v6461_v2 = vld [vmem:[%s6883_s25] sm:$0xff]   ;;  %v6717_v3 = vmov 0.0   ;;  %v6462_v4 = vld [vmem:[%s6883_s25 + $0x8] sm:$0xff]   ;;  %vm6718_vm1 = vmmov 0   ;;  %vm1068_vm2 = vcmask 261120   ;;  %s7795_s18 = sld [smem:[#allocation15_spill]] }
  0x41   : > { %6196 = vmatprep.subr.bf16.mxu0 %v6717_v3  ;;  %6204 = vmatprep.subr.bf16.mxu1 %v6717_v3  ;;  %s6719_s25 = smov 96   ;;  %vm1121_vm3 = vcmask 64512   ;;  %s7797_s2 = sld [smem:[#allocation12_spill]]  ;;  %vm1249_vm4 = vcmask 1043456   ;;  %vm1572_vm5 = vcmask 130112   ;;  %vm1803_vm6 = vcmask 195712  }
  0x42   : > { %6197 = vmatpush3.bf16.msra.mxu0 %v6461_v2  ;;  %6200 = vmatprep.mubr.msk.bf16.mxu0 %vm6718_vm1, %v6717_v3  ;;  %s6720_s21 = smov 64   ;;  %s6721_s6 = smov 88   ;;  %vm2034_vm7 = vcmask 261312   ;;  %vm2421_vm8 = vcmask 130048  }
  0x43   : > { %6198 = vmatprep.subr.bf16.mxu0 %v6717_v3  ;;  %6206 = vmatprep.mubr.msk.bf16.mxu1 %vm6718_vm1, %v6717_v3  ;;  %s6722_s28 = smov 120   ;;  %s6723_s29 = smov 56  }
  0x44   : > { %s6724_s3 = smov 80   ;;  %s6725_s16 = smov 112  }
  0x45   : > { %s6726_s10 = smov 48   ;;  %s6727_s17 = smov 72  }
  0x46   : > { %v1039_v5 = vld [vmem:[#allocation2] sm:$0xff]  ;;  %v1040_v6 = vld [vmem:[#allocation2 + $0x8] sm:$0xff]  ;;  %6199 = vmatpush3.bf16.msra.mxu0 %v6462_v4  ;;  %s7796_s19 = scalar_lea.vmem %s7795_s18, %s6873_s27  ;;  %s6728_s18 = smov 104  }
  0x47   : > { %v1044_v7 = vpack.c.bf16 %v1040_v6, %v1039_v5  ;;  %6210 = vmatprep.subr.bf16.mxu0 %v6717_v3  ;;  %v5689_v8 = vld [vmem:[%s7796_s19] ss:$0 sm:$0xff]  ;;  %v7020_v29 = vld [vmem:[%s7797_s2 + $0x8] sm:$0xff]  ;;  %s6729_s19 = smov 40   ;;  %s6730_s24 = smov 8  }
  0x48   : > { %v7014_v22 = vld [vmem:[%s7797_s2] sm:$0xff]  ;;  %s6731_s0 = smov 16   ;;  %s6732_s4 = smov 24  }
  0x49   : > { %6201 = vmatmul.mubr.msk.bf16.vlgmr.msra.gmra.mrb[0].mxu0 %vm1068_vm2, %v1044_v7 }
  0x4a   : > { %6212 = vmatprep.mubr.msk.bf16.mxu0 %vm6718_vm1, %v6717_v3 }
 0x11c   : > { %v1106_v9 = vpop.f32.mrb[0].mxu0 }
 0x11d   : > { %v1107_v10 = vadd.f32 %v5689_v8, %v1106_v9  ;;  %v6202_v11 = vpop.f32.mrb[1].mxu0 }
 0x11e   : > { %v1109_v12 = vpop.f32.mrb[2].mxu0 }
 0x11f   : > { %v6991_v13 = vpack.c.bf16 %v1107_v10, %v1107_v10  ;;  %v1110_v14 = vadd.f32 %v5689_v8, %v1109_v12  ;;  %v6203_v15 = vpop.f32.mrb[3].mxu0 }
 0x121   : > { %1119 = vrot.lane.b32.xlu0 %v6991_v13, %s6719_s25  ;;  %v6995_v16 = vpack.c.bf16 %v1110_v14, %v1110_v14 }
 0x125   : > { %1168 = vrot.lane.b32.xlu0 %v6995_v16, %s6719_s25 }
 0x193   : > { %v1120_v17 = vpop.permute.xlu0 %1119 }
 0x194   : > { %v1126_v18 = vsel %vm1121_vm3, %v1120_v17, 0 }
 0x195   : > { %6205 = vmatpush3.bf16.xpose.msra.mxu1 %v1126_v18 }
 0x196   : > { %6216 = vmatprep.subr.bf16.mxu1 %v6717_v3 }
 0x197   : > { %v1169_v19 = vpop.permute.xlu0 %1168 }
 0x198   : > { %v1174_v20 = vsel %vm1121_vm3, %v1169_v19, 0 }
 0x199   : > { %6211 = vmatpush3.bf16.xpose.msra.mxu0 %v1174_v20 }
 0x19a   : > { %6222 = vmatprep.subr.bf16.mxu0 %v6717_v3 }
 0x19c   : > { %6207 = vmatmul.mubr.msk.bf16.vlgmr.msra.gmra.mrb[0].mxu1 %vm1121_vm3, %v6991_v13 }
 0x19d   : > { %6218 = vmatprep.mubr.msk.bf16.mxu1 %vm6718_vm1, %v6717_v3 }
 0x1a0   : > { %6213 = vmatmul.mubr.msk.bf16.vlgmr.msra.gmra.mrb[4].mxu0 %vm1121_vm3, %v6995_v16 }
 0x1a1   : > { %6224 = vmatprep.mubr.msk.bf16.mxu0 %vm6718_vm1, %v6717_v3 }
 0x26f   : > { %v1162_v21 = vpop.f32.mrb[0].mxu1 }
 0x270   : > { %v1216_v23 = vmul.f32 0.35355338, %v1162_v21  ;;  %v6208_v24 = vpop.f32.mrb[1].mxu1 }
 0x271   : > { %v1165_v25 = vpop.f32.mrb[2].mxu1 }
 0x272   : > { %v6209_v26 = vpop.f32.mrb[3].mxu1  ;;  %v1218_v27 = vadd.f32 %v1216_v23, %v7014_v22 }
 0x273   : > { %v1210_v28 = vpop.f32.mrb[4].mxu0 }
 0x274   : > { %v1217_v30 = vmul.f32 0.35355338, %v1210_v28  ;;  %v6214_v31 = vpop.f32.mrb[5].mxu0  ;;  %v1220_v32 = vsel %vm1121_vm3, %v1218_v27, -inf }
 0x275   : > { %1221 = vmax.xlane.f32.xlu1 %v1220_v32  ;;  %v1213_v33 = vpop.f32.mrb[6].mxu0 }
 0x276   : > { %v6215_v34 = vpop.f32.mrb[7].mxu0  ;;  %v1219_v35 = vadd.f32 %v1217_v30, %v7020_v29 }
 0x278   : > { %v1223_v36 = vsel %vm1121_vm3, %v1219_v35, -inf }
 0x279   : > { %1224 = vmax.xlane.f32.xlu1 %v1223_v36 }
 0x28a   : > { %1244 = vrot.lane.b32.xlu1 %v6991_v13, %s6720_s21 }
 0x28e   : > { %1293 = vrot.lane.b32.xlu1 %v6995_v16, %s6720_s21  ;;  %s7798_s21 = sld [smem:[#allocation17_spill]] }
 0x292   : > { %1345 = vrot.lane.b32.xlu1 %v6991_v13, %s6721_s6 }
 0x302   : > { %v1222_v37 = vpop.xlane.xlu1 %1221 }
 0x303   : > { %v1226_v38 = vsub.f32 %v1218_v27, %v1222_v37 }
 0x305   : > { %v1228_v39 = vmul.f32 1.442695, %v1226_v38 }
 0x306   : > { %v1225_v40 = vpop.xlane.xlu1 %1224 }
 0x307   : > { %6601 = vpow2.f32 %v1228_v39  ;;  %v1227_v41 = vsub.f32 %v1219_v35, %v1225_v40 }
 0x309   : > { %v1230_v42 = vmul.f32 1.442695, %v1227_v41 }
 0x30a   : > { %v1245_v43 = vpop.permute.xlu1 %1244 }
 0x30b   : > { %6603 = vpow2.f32 %v1230_v42  ;;  %v1251_v44 = vsel %vm1249_vm4, %v1245_v43, 0 }
 0x30c   : > { %6217 = vmatpush3.bf16.msra.mxu1 %v1251_v44 }
 0x30d   : > { %6228 = vmatprep.subr.bf16.mxu1 %v6717_v3 }
 0x30e   : > { %v1294_v45 = vpop.permute.xlu1 %1293 }
 0x30f   : > { %v1299_v46 = vsel %vm1249_vm4, %v1294_v45, 0 }
 0x310   : > { %6223 = vmatpush3.bf16.msra.mxu0 %v1299_v46 }
 0x311   : > { %v6602_v47 = vpop.eup %6601  ;;  %6234 = vmatprep.subr.bf16.mxu0 %v6717_v3 }
 0x312   : > { %v1232_v48 = vsel %vm1121_vm3, %v6602_v47, 0.0  ;;  %v1346_v51 = vpop.permute.xlu1 %1345 }
 0x313   : > { %1233 = vadd.xlane.f32.xlu0 %v1232_v48  ;;  %v1351_v58 = vsel %vm1121_vm3, %v1346_v51, 0 }
 0x315   : > { %v6604_v49 = vpop.eup %6603 }
 0x316   : > { %v1235_v50 = vsel %vm1121_vm3, %v6604_v49, 0.0 }
 0x317   : > { %1236 = vadd.xlane.f32.xlu1 %v1235_v50 }
 0x328   : > { %1395 = vrot.lane.b32.xlu1 %v6995_v16, %s6721_s6 }
 0x329   : > { %1343 = vrot.lane.b32.xlu0 %v6991_v13, %s6722_s28 }
 0x32c   : > { %1393 = vrot.lane.b32.xlu1 %v6995_v16, %s6722_s28 }
 0x3a0   : > { %v1234_v52 = vpop.xlane.xlu0 %1233 }
 0x3a1   : > { %6605 = vrcp.f32 %v1234_v52 }
 0x3a4   : > { %v1237_v53 = vpop.xlane.xlu1 %1236  ;;  %v1344_v63 = vpop.permute.xlu0 %1343 }
 0x3a5   : > { %6607 = vrcp.f32 %v1237_v53 }
 0x3a8   : > { %v1396_v60 = vpop.permute.xlu1 %1395 }
 0x3a9   : > { %v1401_v62 = vsel %vm1121_vm3, %v1396_v60, 0 }
 0x3ab   : > { %v6606_v54 = vpop.eup %6605 }
 0x3ac   : > { %v1240_v55 = vmul.f32 %v6606_v54, %v6602_v47  ;;  %v1394_v0 = vpop.permute.xlu1 %1393 }
 0x3ae   : > { %v1242_v56 = vpack.c.bf16 %v1240_v55, %v1240_v55 }
 0x3af   : > { %v6608_v57 = vpop.eup %6607 }
 0x3b0   : > { %v1241_v59 = vmul.f32 %v6608_v57, %v6604_v49  ;;  %6219 = vmatmul.mubr.msk.bf16.vlgmr.msra.gmra.mrb[4].mxu1 %vm1121_vm3, %v1242_v56 }
 0x3b1   : > { %6229 = vmatpush3.bf16.xpose.msra.mxu1 %v1351_v58  ;;  %6230 = vmatprep.mubr.msk.bf16.mxu1 %vm6718_vm1, %v6717_v3 }
 0x3b2   : > { %v1243_v61 = vpack.c.bf16 %v1241_v59, %v1241_v59  ;;  %6240 = vmatprep.subr.bf16.mxu1 %v6717_v3 }
 0x3b4   : > { %6225 = vmatmul.mubr.msk.bf16.vlgmr.msra.gmra.mrb[8].mxu0 %vm1121_vm3, %v1243_v61 }
 0x3b5   : > { %6235 = vmatpush3.bf16.xpose.msra.mxu0 %v1401_v62  ;;  %6236 = vmatprep.mubr.msk.bf16.mxu0 %vm6718_vm1, %v6717_v3 }
 0x3b6   : > { %6246 = vmatprep.subr.bf16.mxu0 %v6717_v3 }
 0x3b8   : > { %6231 = vmatmul.mubr.msk.bf16.vlgmr.msra.gmra.mrb[8].mxu1 %vm1121_vm3, %v1344_v63 }
 0x3b9   : > { %6242 = vmatprep.mubr.msk.bf16.mxu1 %vm6718_vm1, %v6717_v3 }
 0x3bc   : > { %6237 = vmatmul.mubr.msk.bf16.vlgmr.msra.gmra.mrb[12].mxu0 %vm1121_vm3, %v1394_v0 }
 0x3bd   : > { %6248 = vmatprep.mubr.msk.bf16.mxu0 %vm6718_vm1, %v6717_v3 }
 0x483   : > { %v1287_v1 = vpop.f32.mrb[4].mxu1 }
 0x484   : > { %v6220_v2 = vpop.f32.mrb[5].mxu1 }
 0x485   : > { %v1290_v4 = vpop.f32.mrb[6].mxu1 }
 0x486   : > { %v6221_v5 = vpop.f32.mrb[7].mxu1 }
 0x487   : > { %v1335_v6 = vpop.f32.mrb[8].mxu0 }
 0x488   : > { %v1341_v7 = vpack.c.bf16 %v1335_v6, %v1287_v1  ;;  %v6226_v8 = vpop.f32.mrb[9].mxu0 }
 0x489   : > { %v1338_v9 = vpop.f32.mrb[10].mxu0 }
 0x48a   : > { %1342 = vst.msk [vmem:[#allocation3] sm:$0xff] %vm1121_vm3, %v1341_v7  ;;  %v6227_v10 = vpop.f32.mrb[11].mxu0 }
 0x48b   : > { %v1387_v11 = vpop.f32.mrb[8].mxu1 }
 0x48c   : > { %v1443_v12 = vmul.f32 0.35355338, %v1387_v11  ;;  %v6232_v14 = vpop.f32.mrb[9].mxu1 }
 0x48d   : > { %v1390_v15 = vpop.f32.mrb[10].mxu1 }
 0x48e   : > { %v6233_v17 = vpop.f32.mrb[11].mxu1  ;;  %v1445_v18 = vadd.f32 %v1443_v12, %v7014_v22 }
 0x48f   : > { %v1437_v19 = vpop.f32.mrb[12].mxu0 }
 0x490   : > { %v1444_v20 = vmul.f32 0.35355338, %v1437_v19  ;;  %v6238_v21 = vpop.f32.mrb[13].mxu0  ;;  %v1447_v23 = vsel %vm1121_vm3, %v1445_v18, -inf }
 0x491   : > { %1448 = vmax.xlane.f32.xlu1 %v1447_v23  ;;  %v1440_v24 = vpop.f32.mrb[14].mxu0 }
 0x492   : > { %v6239_v25 = vpop.f32.mrb[15].mxu0  ;;  %v1446_v26 = vadd.f32 %v1444_v20, %v7020_v29 }
 0x494   : > { %v1450_v27 = vsel %vm1121_vm3, %v1446_v26, -inf }
 0x495   : > { %1451 = vmax.xlane.f32.xlu0 %v1450_v27 }
 0x4a2   : > { %1471 = vrot.lane.b32.xlu1 %v6991_v13, %s6723_s29 }
 0x4a6   : > { %1576 = vrot.lane.b32.xlu1 %v6991_v13, %s6724_s3 }
 0x4ab   : > { %1519 = vrot.lane.b32.xlu0 %v6995_v16, %s6723_s29  ;;  %s7799_s29 = scalar_lea.vmem %s7798_s21, %s6873_s27  ;;  %s7806_s21 = scalar_lea.vmem %s7731_s11, %s6873_s27 }
 0x4af   : > { %1574 = vrot.lane.b32.xlu0 %v6991_v13, %s6725_s16 }
 0x51e   : > { %v1449_v28 = vpop.xlane.xlu1 %1448 }
 0x51f   : > { %v1453_v30 = vsub.f32 %v1445_v18, %v1449_v28 }
 0x521   : > { %v1455_v31 = vmul.f32 1.442695, %v1453_v30 }
 0x522   : > { %v1472_v32 = vpop.permute.xlu1 %1471  ;;  %v1452_v33 = vpop.xlane.xlu0 %1451 }
 0x523   : > { %6609 = vpow2.f32 %v1455_v31  ;;  %v1477_v34 = vsel %vm1249_vm4, %v1472_v32, 0  ;;  %v1454_v35 = vsub.f32 %v1446_v26, %v1452_v33 }
 0x524   : > { %6241 = vmatpush3.bf16.msra.mxu1 %v1477_v34 }
 0x525   : > { %v1457_v36 = vmul.f32 1.442695, %v1454_v35  ;;  %6252 = vmatprep.subr.bf16.mxu1 %v6717_v3 }
 0x526   : > { %v1520_v37 = vpop.permute.xlu0 %1519  ;;  %v1577_v43 = vpop.permute.xlu1 %1576 }
 0x527   : > { %6611 = vpow2.f32 %v1457_v36  ;;  %v1525_v38 = vsel %vm1249_vm4, %v1520_v37, 0  ;;  %v1582_v50 = vsel %vm1121_vm3, %v1577_v43, 0 }
 0x528   : > { %6247 = vmatpush3.bf16.msra.mxu0 %v1525_v38 }
 0x529   : > { %6258 = vmatprep.subr.bf16.mxu0 %v6717_v3 }
 0x52a   : > { %v1575_v55 = vpop.permute.xlu0 %1574 }
 0x52d   : > { %v6610_v39 = vpop.eup %6609 }
 0x52e   : > { %v1459_v40 = vsel %vm1121_vm3, %v6610_v39, 0.0 }
 0x52f   : > { %1460 = vadd.xlane.f32.xlu1 %v1459_v40 }
 0x531   : > { %v6612_v41 = vpop.eup %6611 }
 0x532   : > { %v1462_v42 = vsel %vm1121_vm3, %v6612_v41, 0.0 }
 0x533   : > { %1463 = vadd.xlane.f32.xlu1 %v1462_v42 }
 0x544   : > { %1626 = vrot.lane.b32.xlu1 %v6995_v16, %s6724_s3 }
 0x548   : > { %1624 = vrot.lane.b32.xlu1 %v6995_v16, %s6725_s16 }
 0x5bc   : > { %v1461_v44 = vpop.xlane.xlu1 %1460 }
 0x5bd   : > { %6613 = vrcp.f32 %v1461_v44 }
 0x5c0   : > { %v1464_v45 = vpop.xlane.xlu1 %1463 }
 0x5c1   : > { %6615 = vrcp.f32 %v1464_v45 }
 0x5c4   : > { %v1627_v52 = vpop.permute.xlu1 %1626 }
 0x5c5   : > { %v1632_v54 = vsel %vm1121_vm3, %v1627_v52, 0 }
 0x5c7   : > { %v6614_v46 = vpop.eup %6613 }
 0x5c8   : > { %v1467_v47 = vmul.f32 %v6614_v46, %v6610_v39  ;;  %v1625_v56 = vpop.permute.xlu1 %1624 }
 0x5ca   : > { %v1469_v48 = vpack.c.bf16 %v1467_v47, %v1467_v47 }
 0x5cb   : > { %v6616_v49 = vpop.eup %6615 }
 0x5cc   : > { %v1468_v51 = vmul.f32 %v6616_v49, %v6612_v41  ;;  %6243 = vmatmul.mubr.msk.bf16.vlgmr.msra.gmra.mrb[12].mxu1 %vm1121_vm3, %v1469_v48 }
 0x5cd   : > { %6253 = vmatpush3.bf16.xpose.msra.mxu1 %v1582_v50  ;;  %6254 = vmatprep.mubr.msk.bf16.mxu1 %vm6718_vm1, %v6717_v3 }
 0x5ce   : > { %v1470_v53 = vpack.c.bf16 %v1468_v51, %v1468_v51  ;;  %6264 = vmatprep.subr.bf16.mxu1 %v6717_v3 }
 0x5d0   : > { %6249 = vmatmul.mubr.msk.bf16.vlgmr.msra.gmra.mrb[16].mxu0 %vm1121_vm3, %v1470_v53 }
 0x5d1   : > { %6259 = vmatpush3.bf16.xpose.msra.mxu0 %v1632_v54  ;;  %6260 = vmatprep.mubr.msk.bf16.mxu0 %vm6718_vm1, %v6717_v3 }
 0x5d2   : > { %6270 = vmatprep.subr.bf16.mxu0 %v6717_v3 }
 0x5d4   : > { %6255 = vmatmul.mubr.msk.bf16.vlgmr.msra.gmra.mrb[16].mxu1 %vm1121_vm3, %v1575_v55 }
 0x5d5   : > { %6266 = vmatprep.mubr.msk.bf16.mxu1 %vm6718_vm1, %v6717_v3 }
 0x5d8   : > { %6261 = vmatmul.mubr.msk.bf16.vlgmr.msra.gmra.mrb[20].mxu0 %vm1121_vm3, %v1625_v56 }
 0x5d9   : > { %6272 = vmatprep.mubr.msk.bf16.mxu0 %vm6718_vm1, %v6717_v3 }
 0x69f   : > { %v7094_v57 = vpop.f32.mrb[12].mxu1 }
 0x6a0   : > { %v6244_v58 = vpop.f32.mrb[13].mxu1 }
 0x6a1   : > { %v1516_v59 = vpop.f32.mrb[14].mxu1 }
 0x6a2   : > { %v6245_v60 = vpop.f32.mrb[15].mxu1 }
 0x6a3   : > { %v7096_v61 = vpop.f32.mrb[16].mxu0 }
 0x6a4   : > { %v1567_v62 = vpack.c.bf16 %v7096_v61, %v7094_v57  ;;  %v6250_v63 = vpop.f32.mrb[17].mxu0 }
 0x6a5   : > { %v1564_v0 = vpop.f32.mrb[18].mxu0 }
 0x6a6   : > { %v6251_v1 = vpop.f32.mrb[19].mxu0 }
 0x6a7   : > { %v1618_v2 = vpop.f32.mrb[16].mxu1 }
 0x6a8   : > { %v1674_v4 = vmul.f32 0.35355338, %v1618_v2  ;;  %v6256_v5 = vpop.f32.mrb[17].mxu1 }
 0x6a9   : > { %v1621_v6 = vpop.f32.mrb[18].mxu1 }
 0x6aa   : > { %v6257_v7 = vpop.f32.mrb[19].mxu1  ;;  %v1676_v8 = vadd.f32 %v1674_v4, %v7014_v22 }
 0x6ab   : > { %v1668_v9 = vpop.f32.mrb[20].mxu0 }
 0x6ac   : > { %v1675_v10 = vmul.f32 0.35355338, %v1668_v9  ;;  %v6262_v11 = vpop.f32.mrb[21].mxu0  ;;  %v1678_v12 = vsel %vm1121_vm3, %v1676_v8, -inf }
 0x6ad   : > { %1679 = vmax.xlane.f32.xlu0 %v1678_v12  ;;  %v1671_v14 = vpop.f32.mrb[22].mxu0 }
 0x6ae   : > { %v6263_v15 = vpop.f32.mrb[23].mxu0  ;;  %v1677_v17 = vadd.f32 %v1675_v10, %v7020_v29 }
 0x6b0   : > { %v1681_v18 = vsel %vm1121_vm3, %v1677_v17, -inf }
 0x6b1   : > { %1682 = vmax.xlane.f32.xlu1 %v1681_v18 }
 0x6c2   : > { %1702 = vrot.lane.b32.xlu1 %v6991_v13, %s6726_s10 }
 0x6c6   : > { %1807 = vrot.lane.b32.xlu1 %v6991_v13, %s6727_s17 }
 0x6ca   : > { %1857 = vrot.lane.b32.xlu1 %v6995_v16, %s6727_s17 }
 0x6ce   : > { %1855 = vrot.lane.b32.xlu1 %v6995_v16, %s6728_s18 }
 0x73a   : > { %v1680_v19 = vpop.xlane.xlu0 %1679 }
 0x73b   : > { %v1684_v20 = vsub.f32 %v1676_v8, %v1680_v19 }
 0x73d   : > { %v1686_v21 = vmul.f32 1.442695, %v1684_v20 }
 0x73e   : > { %v1683_v23 = vpop.xlane.xlu1 %1682 }
 0x73f   : > { %6617 = vpow2.f32 %v1686_v21  ;;  %v1685_v24 = vsub.f32 %v1677_v17, %v1683_v23 }
 0x741   : > { %v1688_v25 = vmul.f32 1.442695, %v1685_v24 }
 0x742   : > { %v1703_v26 = vpop.permute.xlu1 %1702 }
 0x743   : > { %6619 = vpow2.f32 %v1688_v25  ;;  %v1708_v27 = vsel %vm1249_vm4, %v1703_v26, 0 }
 0x744   : > { %6265 = vmatpush3.bf16.msra.mxu1 %v1708_v27 }
 0x745   : > { %6276 = vmatprep.subr.bf16.mxu1 %v6717_v3 }
 0x746   : > { %v1808_v38 = vpop.permute.xlu1 %1807 }
 0x747   : > { %v1813_v42 = vsel %vm1121_vm3, %v1808_v38, 0 }
 0x749   : > { %v6618_v28 = vpop.eup %6617 }
 0x74a   : > { %v1690_v30 = vsel %vm1121_vm3, %v6618_v28, 0.0  ;;  %v1858_v44 = vpop.permute.xlu1 %1857 }
 0x74b   : > { %1691 = vadd.xlane.f32.xlu0 %v1690_v30  ;;  %v1863_v46 = vsel %vm1121_vm3, %v1858_v44, 0 }
 0x74d   : > { %v6620_v31 = vpop.eup %6619 }
 0x74e   : > { %v1693_v32 = vsel %vm1121_vm3, %v6620_v31, 0.0  ;;  %v1856_v48 = vpop.permute.xlu1 %1855 }
 0x74f   : > { %1694 = vadd.xlane.f32.xlu0 %v1693_v32 }
 0x765   : > { %1750 = vrot.lane.b32.xlu0 %v6995_v16, %s6726_s10  ;;  %s7807_s10 = sld [smem:[#allocation13_spill]] }
 0x769   : > { %1805 = vrot.lane.b32.xlu0 %v6991_v13, %s6728_s18 }
 0x7d8   : > { %v1692_v33 = vpop.xlane.xlu0 %1691 }
 0x7d9   : > { %6621 = vrcp.f32 %v1692_v33  ;;  %v6463_v33 = vld [vmem:[%s6888_s5] sm:$0xff]  }
 0x7dc   : > { %v1695_v34 = vpop.xlane.xlu0 %1694 }
 0x7dd   : > { %6623 = vrcp.f32 %v1695_v34  ;;  %v6464_v34 = vld [vmem:[%s6888_s5 + $0x8] sm:$0xff]   ;;  %s7800_s5 = sld [smem:[#allocation11_spill]] }
 0x7e0   : > { %v1751_v35 = vpop.permute.xlu0 %1750 }
 0x7e1   : > { %v1756_v36 = vsel %vm1249_vm4, %v1751_v35, 0 }
 0x7e2   : > { %6271 = vmatpush3.bf16.msra.mxu0 %v1756_v36 }
 0x7e3   : > { %v6622_v37 = vpop.eup %6621  ;;  %6282 = vmatprep.subr.bf16.mxu0 %v6717_v3  ;;  %s7801_s23 = smov %s7800_s5 }
 0x7e4   : > { %v1698_v39 = vmul.f32 %v6622_v37, %v6618_v28  ;;  %v1806_v47 = vpop.permute.xlu0 %1805 }
 0x7e6   : > { %v1700_v40 = vpack.c.bf16 %v1698_v39, %v1698_v39 }
 0x7e7   : > { %v6624_v41 = vpop.eup %6623 }
 0x7e8   : > { %v1699_v43 = vmul.f32 %v6624_v41, %v6620_v31  ;;  %6267 = vmatmul.mubr.msk.bf16.vlgmr.msra.gmra.mrb[20].mxu1 %vm1121_vm3, %v1700_v40 }
 0x7e9   : > { %6277 = vmatpush3.bf16.xpose.msra.mxu1 %v1813_v42  ;;  %6278 = vmatprep.mubr.msk.bf16.mxu1 %vm6718_vm1, %v6717_v3 }
 0x7ea   : > { %v1701_v45 = vpack.c.bf16 %v1699_v43, %v1699_v43  ;;  %6288 = vmatprep.subr.bf16.mxu1 %v6717_v3 }
 0x7ec   : > { %6273 = vmatmul.mubr.msk.bf16.vlgmr.msra.gmra.mrb[24].mxu0 %vm1121_vm3, %v1701_v45 }
 0x7ed   : > { %6283 = vmatpush3.bf16.xpose.msra.mxu0 %v1863_v46  ;;  %6284 = vmatprep.mubr.msk.bf16.mxu0 %vm6718_vm1, %v6717_v3  ;;  %v5711_v46 = vld [vmem:[%s7799_s29] ss:$0 sm:$0xff]  ;;  %s7804_s29 = scalar_lea.vmem %s7729_s9, %s6873_s27 }
 0x7ee   : > { %6294 = vmatprep.subr.bf16.mxu0 %v6717_v3 }
 0x7f0   : > { %6279 = vmatmul.mubr.msk.bf16.vlgmr.msra.gmra.mrb[24].mxu1 %vm1121_vm3, %v1806_v47 }
 0x7f1   : > { %6290 = vmatprep.mubr.msk.bf16.mxu1 %vm6718_vm1, %v6717_v3 }
 0x7f4   : > { %6285 = vmatmul.mubr.msk.bf16.vlgmr.msra.gmra.mrb[28].mxu0 %vm1121_vm3, %v1856_v48 }
 0x7f5   : > { %6296 = vmatprep.mubr.msk.bf16.mxu0 %vm6718_vm1, %v6717_v3 }
 0x8bb   : > { %v1744_v49 = vpop.f32.mrb[20].mxu1 }
 0x8bc   : > { %v6268_v50 = vpop.f32.mrb[21].mxu1 }
 0x8bd   : > { %v1747_v51 = vpop.f32.mrb[22].mxu1 }
 0x8be   : > { %v6269_v52 = vpop.f32.mrb[23].mxu1 }
 0x8bf   : > { %v1792_v53 = vpop.f32.mrb[24].mxu0 }
 0x8c0   : > { %v1798_v54 = vpack.c.bf16 %v1792_v53, %v1744_v49  ;;  %v6274_v55 = vpop.f32.mrb[25].mxu0  ;;  %v6677_v53 = vld [vmem:[#allocation2] sm:$0xff] }
 0x8c1   : > { %v1795_v56 = vpop.f32.mrb[26].mxu0 }
 0x8c2   : > { %v6275_v58 = vpop.f32.mrb[27].mxu0  ;;  %v6678_v56 = vld [vmem:[#allocation2 + $0x8] sm:$0xff] }
 0x8c3   : > { %v1849_v59 = vpop.f32.mrb[24].mxu1 }
 0x8c4   : > { %v1905_v60 = vmul.f32 0.35355338, %v1849_v59  ;;  %v6280_v63 = vpop.f32.mrb[25].mxu1 }
 0x8c5   : > { %v1852_v0 = vpop.f32.mrb[26].mxu1 }
 0x8c6   : > { %v6281_v1 = vpop.f32.mrb[27].mxu1  ;;  %v1907_v2 = vadd.f32 %v1905_v60, %v7014_v22 }
 0x8c7   : > { %v1899_v4 = vpop.f32.mrb[28].mxu0 }
 0x8c8   : > { %v1906_v5 = vmul.f32 0.35355338, %v1899_v4  ;;  %v6286_v6 = vpop.f32.mrb[29].mxu0  ;;  %v1909_v7 = vsel %vm1121_vm3, %v1907_v2, -inf }
 0x8c9   : > { %1910 = vmax.xlane.f32.xlu0 %v1909_v7  ;;  %v1902_v8 = vpop.f32.mrb[30].mxu0 }
 0x8ca   : > { %v6287_v9 = vpop.f32.mrb[31].mxu0  ;;  %v1908_v10 = vadd.f32 %v1906_v5, %v7020_v29 }
 0x8cb   : > { %v6465_v9 = vld [vmem:[%s6914_s20] sm:$0xff]  }
 0x8cc   : > { %v1912_v11 = vsel %vm1121_vm3, %v1908_v10, -inf }
 0x8cd   : > { %1913 = vmax.xlane.f32.xlu1 %v1912_v11  ;;  %v6467_v11 = vld [vmem:[%s7800_s5] sm:$0xff]  }
 0x8de   : > { %1933 = vrot.lane.b32.xlu1 %v6991_v13, %s6729_s19 }
 0x8e2   : > { %1569 = vrot.lane.b32.xlu1 %v1567_v62, %s6730_s24 }
 0x8e6   : > { %1800 = vrot.lane.b32.xlu1 %v1798_v54, %s6731_s0 }
 0x956   : > { %v1911_v22 = vpop.xlane.xlu0 %1910 }
 0x957   : > { %v1915_v12 = vsub.f32 %v1907_v2, %v1911_v22  ;;  %v6468_v22 = vld [vmem:[%s7801_s23 + $0x8] sm:$0xff]  }
 0x959   : > { %v1917_v14 = vmul.f32 1.442695, %v1915_v12  ;;  %v6469_v12 = vld [vmem:[%s6905_s8] sm:$0xff]  }
 0x95a   : > { %v1914_v15 = vpop.xlane.xlu1 %1913 }
 0x95b   : > { %6625 = vpow2.f32 %v1917_v14  ;;  %v1916_v29 = vsub.f32 %v1908_v10, %v1914_v15  ;;  %v6466_v10 = vld [vmem:[%s6914_s20 + $0x8] sm:$0xff]  }
 0x95c   : > { %v6470_v14 = vld [vmem:[%s6905_s8 + $0x8] sm:$0xff]  }
 0x95d   : > { %v1919_v17 = vmul.f32 1.442695, %v1916_v29 }
 0x95e   : > { %v1934_v18 = vpop.permute.xlu1 %1933 }
 0x95f   : > { %6627 = vpow2.f32 %v1919_v17  ;;  %v1939_v13 = vsel %vm1249_vm4, %v1934_v18, 0 }
 0x960   : > { %6289 = vmatpush3.bf16.msra.mxu1 %v1939_v13 }
 0x961   : > { %6300 = vmatprep.subr.bf16.mxu1 %v6717_v3 }
 0x962   : > { %v1570_v57 = vpop.permute.xlu1 %1569 }
 0x963   : > { %1573 = vst.msk [vmem:[#allocation3] sm:$0xff] %vm1572_vm5, %v1570_v57 }
 0x965   : > { %v6626_v61 = vpop.eup %6625 }
 0x966   : > { %v1801_v62 = vpop.permute.xlu1 %1800  ;;  %v1921_v19 = vsel %vm1121_vm3, %v6626_v61, 0.0 }
 0x967   : > { %1804 = vst.msk [vmem:[#allocation3] sm:$0xff] %vm1803_vm6, %v1801_v62  ;;  %1922 = vadd.xlane.f32.xlu0 %v1921_v19 }
 0x969   : > { %v6628_v20 = vpop.eup %6627 }
 0x96a   : > { %v1924_v21 = vsel %vm1121_vm3, %v6628_v20, 0.0 }
 0x96b   : > { %1925 = vadd.xlane.f32.xlu0 %v1924_v21 }
 0x981   : > { %1981 = vrot.lane.b32.xlu0 %v6995_v16, %s6729_s19  ;;  %s7802_s19 = sld [smem:[#allocation18_spill]] }
 0x987   : > { %s7803_s8 = scalar_lea.vmem %s7802_s19, %s6873_s27  ;;  %s7805_s19 = scalar_lea.vmem %s7733_s13, %s6873_s27 }
 0x988   : > { %v5715_v62 = vld [vmem:[%s7803_s8] ss:$0 sm:$0xff] }
 0x9f4   : > { %v1923_v23 = vpop.xlane.xlu0 %1922 }
 0x9f5   : > { %6629 = vrcp.f32 %v1923_v23 }
 0x9f8   : > { %v1926_v24 = vpop.xlane.xlu0 %1925 }
 0x9f9   : > { %6631 = vrcp.f32 %v1926_v24  ;;  %v5716_v24 = vld [vmem:[%s7804_s29] ss:$0 sm:$0xff] }
 0x9fc   : > { %v1982_v25 = vpop.permute.xlu0 %1981 }
 0x9fd   : > { %v1987_v26 = vsel %vm1249_vm4, %v1982_v25, 0 }
 0x9fe   : > { %6295 = vmatpush3.bf16.msra.mxu0 %v1987_v26 }
 0x9ff   : > { %v6630_v27 = vpop.eup %6629  ;;  %6308 = vmatprep.subr.bf16.mxu0 %v6717_v3 }
 0xa00   : > { %v1929_v28 = vmul.f32 %v6630_v27, %v6626_v61 }
 0xa02   : > { %v1931_v30 = vpack.c.bf16 %v1929_v28, %v1929_v28 }
 0xa03   : > { %v6632_v31 = vpop.eup %6631 }
 0xa04   : > { %v1930_v32 = vmul.f32 %v6632_v31, %v6628_v20  ;;  %6291 = vmatmul.mubr.msk.bf16.vlgmr.msra.gmra.mrb[28].mxu1 %vm1121_vm3, %v1931_v30  ;;  %v5721_v30 = vld [vmem:[%s7805_s19] ss:$0 sm:$0xff]  ;;  %s7812_s19 = sld [smem:[#allocation23_spill]] }
 0xa05   : > { %6304 = vmatprep.mubr.msk.bf16.mxu1 %vm6718_vm1, %v6717_v3  ;;  %6301 = vmatpush3.bf16.msra.mxu1 %v6463_v33 }
 0xa06   : > { %v1932_v16 = vpack.c.bf16 %v1930_v32, %v1930_v32  ;;  %6302 = vmatprep.subr.bf16.mxu1 %v6717_v3 }
 0xa08   : > { %6297 = vmatmul.mubr.msk.bf16.vlgmr.msra.gmra.mrb[32].mxu0 %vm1121_vm3, %v1932_v16 }
 0xa09   : > { %6312 = vmatprep.mubr.msk.bf16.mxu0 %vm6718_vm1, %v6717_v3  ;;  %6303 = vmatpush3.bf16.msra.mxu1 %v6464_v34 }
 0xa0a   : > { %6316 = vmatprep.subr.bf16.mxu1 %v6465_v9  ;;  %6309 = vmatpush3.bf16.msra.mxu0 %v6469_v12  ;;  %s7813_s8 = scalar_lea.vmem %s7812_s19, %s6873_s27 }
 0xa0b   : > { %6310 = vmatprep.subr.bf16.mxu0 %v6717_v3 }
 0xa0e   : > { %6311 = vmatpush3.bf16.msra.mxu0 %v6470_v14 }
 0xa0f   : > { %6324 = vmatprep.subr.bf16.mxu0 %v6717_v3 }
 0xad7   : > { %v1975_v35 = vpop.f32.mrb[28].mxu1 }
 0xad8   : > { %v6292_v36 = vpop.f32.mrb[29].mxu1 }
 0xad9   : > { %v1978_v37 = vpop.f32.mrb[30].mxu1 }
 0xada   : > { %v6293_v38 = vpop.f32.mrb[31].mxu1 }
 0xadb   : > { %v2023_v39 = vpop.f32.mrb[32].mxu0 }
 0xadc   : > { %v2029_v40 = vpack.c.bf16 %v2023_v39, %v1975_v35  ;;  %v6298_v41 = vpop.f32.mrb[33].mxu0 }
 0xadd   : > { %v2026_v42 = vpop.f32.mrb[34].mxu0 }
 0xade   : > { %2031 = vrot.lane.b32.xlu0 %v2029_v40, %s6732_s4  ;;  %v6299_v43 = vpop.f32.mrb[35].mxu0  ;;  %v5717_v42 = vld [vmem:[%s7806_s21] ss:$0 sm:$0xff] }
 0xb50   : > { %v2032_v44 = vpop.permute.xlu0 %2031 }
 0xb51   : > { %2035 = vst.msk [vmem:[#allocation3] sm:$0xff] %vm2034_vm7, %v2032_v44 }
 0xb58   : > { %v2036_v45 = vld [vmem:[#allocation3] sm:$0xff] }
 0xb59   : > { %6305 = vmatmul.mubr.msk.bf16.vlgmr.msra.gmra.mrb[32].mxu1 %vm1068_vm2, %v2036_v45 }
 0xb5a   : > { %6317 = vmatpush3.bf16.msra.mxu1 %v6465_v9  ;;  %6320 = vmatprep.mubr.msk.bf16.mxu1 %vm1068_vm2, %v6467_v11 }
 0xb5b   : > { %6318 = vmatprep.subr.bf16.mxu1 %v6466_v10 }
 0xb5e   : > { %6319 = vmatpush3.bf16.msra.mxu1 %v6466_v10 }
 0xb5f   : > { %6330 = vmatprep.subr.bf16.mxu1 %v6717_v3 }
 0xb61   : > { %6321 = vmatmul.mubr.msk.bf16.vlgmr.msra.gmra.mrb[36].mxu1 %vm1068_vm2, %v6468_v22 }
 0xb62   : > { %6332 = vmatprep.mubr.msk.bf16.mxu1 %vm6718_vm1, %v6717_v3 }
 0xc2c   : > { %v2097_v47 = vpop.f32.mrb[32].mxu1 }
 0xc2d   : > { %v2098_v48 = vadd.f32 %v5711_v46, %v2097_v47  ;;  %v6306_v49 = vpop.f32.mrb[33].mxu1 }
 0xc2e   : > { %v2100_v50 = vpop.f32.mrb[34].mxu1 }
 0xc2f   : > { %v2101_v51 = vadd.f32 %v5711_v46, %v2100_v50  ;;  %v6307_v52 = vpop.f32.mrb[35].mxu1  ;;  %v2104_v54 = vadd.f32 %v6677_v53, %v2098_v48 }
 0xc30   : > { %v7247_v52 = vld [vmem:[%s7807_s10] ss:$0 sm:$0xff] }
 0xc31   : > { %v2108_v55 = vsel %vm1068_vm2, %v2104_v54, 0.0  ;;  %v2105_v58 = vadd.f32 %v6678_v56, %v2101_v51 }
 0xc32   : > { %2109 = vadd.xlane.f32.xlu1 %v2108_v55 }
 0xc33   : > { %v2111_v59 = vsel %vm1068_vm2, %v2105_v58, 0.0 }
 0xc34   : > { %2112 = vadd.xlane.f32.xlu0 %v2111_v59  ;;  %v6322_v31 = vpop.f32.mrb[36].mxu1 }
 0xc35   : > { %v2305_v32 = vadd.f32 %v6322_v31, %v5721_v30  ;;  %v2296_v16 = vpop.f32.mrb[37].mxu1 }
 0xc36   : > { %v2297_v33 = vadd.f32 %v5721_v30, %v2296_v16  ;;  %v6323_v34 = vpop.f32.mrb[38].mxu1 }
 0xc37   : > { %v2308_v35 = vadd.f32 %v6323_v34, %v5721_v30  ;;  %v2299_v36 = vpop.f32.mrb[39].mxu1 }
 0xc38   : > { %v2300_v37 = vadd.f32 %v5721_v30, %v2299_v36 }
 0xc39   : > { %v7217_v38 = vpack.c.bf16 %v2308_v35, %v2305_v32 }
 0xc3a   : > { %v7219_v39 = vpack.c.bf16 %v2300_v37, %v2297_v33 }
 0xc3b   : > { %v2369_v40 = vsel %vm1121_vm3, %v7217_v38, 0 }
 0xc3c   : > { %v2323_v41 = vsel %vm1121_vm3, %v7219_v39, 0  ;;  %6331 = vmatpush3.bf16.xpose.msra.mxu1 %v2369_v40 }
 0xc3d   : > { %6342 = vmatprep.subr.bf16.mxu1 %v6717_v3 }
 0xcbf   : > { %v2110_v60 = vpop.xlane.xlu1 %2109 }
 0xcc0   : > { %v2115_v63 = vmul.f32 0.03125, %v2110_v60 }
 0xcc1   : > { %v2113_v0 = vpop.xlane.xlu0 %2112 }
 0xcc2   : > { %v2117_v1 = vsub.f32 %v2104_v54, %v2115_v63  ;;  %v2116_v2 = vmul.f32 0.03125, %v2113_v0 }
 0xcc4   : > { %v2118_v4 = vsub.f32 %v2105_v58, %v2116_v2  ;;  %v2119_v5 = vmul.f32 %v2117_v1, %v2117_v1 }
 0xcc6   : > { %v2121_v6 = vsel %vm1068_vm2, %v2119_v5, 0.0  ;;  %v2120_v7 = vmul.f32 %v2118_v4, %v2118_v4 }
 0xcc7   : > { %2122 = vadd.xlane.f32.xlu0 %v2121_v6 }
 0xcc8   : > { %v2124_v8 = vsel %vm1068_vm2, %v2120_v7, 0.0 }
 0xcc9   : > { %2125 = vadd.xlane.f32.xlu1 %v2124_v8 }
 0xd54   : > { %v2123_v15 = vpop.xlane.xlu0 %2122 }
 0xd55   : > { %v2127_v29 = vmul.f32 0.03125, %v2123_v15 }
 0xd56   : > { %v2126_v17 = vpop.xlane.xlu1 %2125 }
 0xd57   : > { %v2129_v18 = vadd.f32 1e-05, %v2127_v29  ;;  %v2128_v13 = vmul.f32 0.03125, %v2126_v17 }
 0xd59   : > { %6633 = vrsqrt.f32 %v2129_v18  ;;  %v2130_v57 = vadd.f32 1e-05, %v2128_v13 }
 0xd5b   : > { %6635 = vrsqrt.f32 %v2130_v57 }
 0xd63   : > { %v6634_v61 = vpop.eup %6633 }
 0xd64   : > { %v2133_v19 = vmul.f32 %v6634_v61, %v2117_v1 }
 0xd65   : > { %v6636_v20 = vpop.eup %6635 }
 0xd66   : > { %v2141_v21 = vmul.f32 %v5715_v62, %v2133_v19  ;;  %v2134_v23 = vmul.f32 %v6636_v20, %v2118_v4 }
 0xd68   : > { %v2142_v25 = vmul.f32 %v5715_v62, %v2134_v23  ;;  %v7203_v26 = vadd.f32 %v5716_v24, %v2141_v21 }
 0xd6a   : > { %v7205_v27 = vadd.f32 %v5716_v24, %v2142_v25 }
 0xd6c   : > { %v2151_v28 = vpack.c.bf16 %v7205_v27, %v7203_v26 }
 0xd6e   : > { %6313 = vmatmul.mubr.msk.bf16.vlgmr.msra.gmra.mrb[36].mxu0 %vm1068_vm2, %v2151_v28 }
 0xd6f   : > { %6326 = vmatprep.mubr.msk.bf16.mxu0 %vm6718_vm1, %v6717_v3  ;;  %6325 = vmatpush3.bf16.xpose.msra.mxu0 %v2323_v41 }
 0xd70   : > { %6336 = vmatprep.subr.bf16.mxu0 %v6717_v3 }
 0xe41   : > { %v2212_v43 = vpop.f32.mrb[36].mxu0 }
 0xe42   : > { %v2213_v44 = vadd.f32 %v5717_v42, %v2212_v43  ;;  %v6314_v45 = vpop.f32.mrb[37].mxu0 }
 0xe43   : > { %v2215_v46 = vpop.f32.mrb[38].mxu0 }
 0xe44   : > { %v7232_v47 = vpack.c.bf16 %v2213_v44, %v2213_v44  ;;  %v2216_v48 = vadd.f32 %v5717_v42, %v2215_v46  ;;  %v6315_v49 = vpop.f32.mrb[39].mxu0 }
 0xe46   : > { %v7234_v50 = vpack.c.bf16 %v2216_v48, %v2216_v48  ;;  %6327 = vmatmul.mubr.msk.bf16.vlgmr.msra.gmra.mrb[40].mxu0 %vm1121_vm3, %v7232_v47 }
 0xe47   : > { %6338 = vmatprep.mubr.msk.bf16.mxu0 %vm6718_vm1, %v6717_v3 }
 0xe48   : > { %6333 = vmatmul.mubr.msk.bf16.vlgmr.msra.gmra.mrb[40].mxu1 %vm1121_vm3, %v7234_v50 }
 0xe49   : > { %6344 = vmatprep.mubr.msk.bf16.mxu1 %vm6718_vm1, %v6717_v3 }
 0xf19   : > { %v2359_v51 = vpop.f32.mrb[40].mxu0 }
 0xf1a   : > { %v2411_v53 = vmul.f32 0.35355338, %v2359_v51  ;;  %v6328_v54 = vpop.f32.mrb[41].mxu0 }
 0xf1b   : > { %v2362_v55 = vpop.f32.mrb[42].mxu0  ;;  %v2405_v56 = vpop.f32.mrb[40].mxu1 }
 0xf1c   : > { %v2412_v58 = vmul.f32 0.35355338, %v2405_v56  ;;  %v6329_v59 = vpop.f32.mrb[43].mxu0  ;;  %v6334_v60 = vpop.f32.mrb[41].mxu1  ;;  %v2419_v63 = vadd.f32 %v7247_v52, %v2411_v53 }
 0xf1d   : > { %v2408_v0 = vpop.f32.mrb[42].mxu1 }
 0xf1e   : > { %v6335_v1 = vpop.f32.mrb[43].mxu1  ;;  %v2422_v2 = vsel %vm2421_vm8, %v2419_v63, -inf  ;;  %v2420_v4 = vadd.f32 %v7247_v52, %v2412_v58 }
 0xf1f   : > { %2423 = vmax.xlane.f32.xlu0 %v2422_v2 }
 0xf20   : > { %v2425_v5 = vsel %vm2421_vm8, %v2420_v4, -inf }
 0xf21   : > { %2426 = vmax.xlane.f32.xlu1 %v2425_v5 }
 0xf32   : > { %2494 = vrot.lane.b32.xlu1 %v7217_v38, %s6719_s25 }
 0xf35   : > { %2447 = vrot.lane.b32.xlu0 %v7219_v39, %s6719_s25  ;;  %s7817_s25 = sld [smem:[#allocation8_spill]] }
 0xf3b   : > { %p5924_p5 = scmp.ne.s32.totalorder %s7817_s25, 1 }
 0xfac   : > { %v2424_v6 = vpop.xlane.xlu0 %2423 }
 0xfad   : > { %v2428_v7 = vsub.f32 %v2419_v63, %v2424_v6 }
 0xfae   : > { %v2427_v8 = vpop.xlane.xlu1 %2426 }
 0xfaf   : > { %v2430_v9 = vmul.f32 1.442695, %v2428_v7  ;;  %v2429_v10 = vsub.f32 %v2420_v4, %v2427_v8 }
 0xfb0   : > { %v2448_v11 = vpop.permute.xlu0 %2447 }
 0xfb1   : > { %6637 = vpow2.f32 %v2430_v9  ;;  %v2432_v22 = vmul.f32 1.442695, %v2429_v10  ;;  %6337 = vmatpush3.bf16.msra.mxu0 %v2448_v11 }
 0xfb2   : > { %v2495_v12 = vpop.permute.xlu1 %2494  ;;  %6348 = vmatprep.subr.bf16.mxu0 %v6717_v3 }
 0xfb3   : > { %6639 = vpow2.f32 %v2432_v22  ;;  %6343 = vmatpush3.bf16.msra.mxu1 %v2495_v12 }
 0xfb4   : > { %6354 = vmatprep.subr.bf16.mxu1 %v6717_v3 }
 0xfbb   : > { %v6638_v14 = vpop.eup %6637 }
 0xfbc   : > { %v2434_v15 = vsel %vm2421_vm8, %v6638_v14, 0.0 }
 0xfbd   : > { %v6640_v29 = vpop.eup %6639  ;;  %2435 = vadd.xlane.f32.xlu0 %v2434_v15 }
 0xfbe   : > { %v2437_v17 = vsel %vm2421_vm8, %v6640_v29, 0.0 }
 0xfbf   : > { %2438 = vadd.xlane.f32.xlu1 %v2437_v17 }
 0xfd0   : > { %2544 = vrot.lane.b32.xlu1 %v7219_v39, %s6722_s28 }
 0xfd3   : > { %2594 = vrot.lane.b32.xlu0 %v7217_v38, %s6722_s28 }
 0xfd4   : > { %2542 = vrot.lane.b32.xlu1 %v7232_v47, %s6722_s28 }
 0xfd7   : > { %2592 = vrot.lane.b32.xlu0 %v7234_v50, %s6722_s28  ;;  %s7809_s28 = sld [smem:[#allocation9_spill]] }
0x104a   : > { %v2436_v18 = vpop.xlane.xlu0 %2435 }
0x104b   : > { %6641 = vrcp.f32 %v2436_v18 }
0x104c   : > { %v2439_v13 = vpop.xlane.xlu1 %2438 }
0x104d   : > { %6643 = vrcp.f32 %v2439_v13 }
0x104e   : > { %v2595_v23 = vpop.permute.xlu0 %2594 }
0x104f   : > { %v2600_v28 = vsel %vm1121_vm3, %v2595_v23, 0 }
0x1050   : > { %v2545_v19 = vpop.permute.xlu1 %2544 }
0x1051   : > { %v2550_v24 = vsel %vm1121_vm3, %v2545_v19, 0 }
0x1052   : > { %v2593_v31 = vpop.permute.xlu0 %2592 }
0x1054   : > { %v2543_v30 = vpop.permute.xlu1 %2542 }
0x1055   : > { %v6642_v57 = vpop.eup %6641 }
0x1056   : > { %v2442_v61 = vmul.f32 %v6642_v57, %v6638_v14 }
0x1057   : > { %v6644_v62 = vpop.eup %6643 }
0x1058   : > { %v2443_v20 = vmul.f32 %v6644_v62, %v6640_v29  ;;  %v2444_v21 = vpack.c.bf16 %v2442_v61, %v2442_v61 }
0x105a   : > { %6339 = vmatmul.mubr.msk.bf16.vlgmr.msra.gmra.mrb[44].mxu0 %vm2421_vm8, %v2444_v21  ;;  %v2445_v25 = vpack.c.bf16 %v2443_v20, %v2443_v20 }
0x105b   : > { %6349 = vmatpush3.bf16.xpose.msra.mxu0 %v2550_v24  ;;  %6350 = vmatprep.mubr.msk.bf16.mxu0 %vm6718_vm1, %v6717_v3 }
0x105c   : > { %6345 = vmatmul.mubr.msk.bf16.vlgmr.msra.gmra.mrb[44].mxu1 %vm2421_vm8, %v2445_v25  ;;  %6360 = vmatprep.subr.bf16.mxu0 %v6717_v3 }
0x105d   : > { %6355 = vmatpush3.bf16.xpose.msra.mxu1 %v2600_v28  ;;  %6356 = vmatprep.mubr.msk.bf16.mxu1 %vm6718_vm1, %v6717_v3 }
0x105e   : > { %6366 = vmatprep.subr.bf16.mxu1 %v6717_v3 }
0x1062   : > { %6351 = vmatmul.mubr.msk.bf16.vlgmr.msra.gmra.mrb[48].mxu0 %vm1121_vm3, %v2543_v30 }
0x1063   : > { %6362 = vmatprep.mubr.msk.bf16.mxu0 %vm6718_vm1, %v6717_v3 }
0x1064   : > { %6357 = vmatmul.mubr.msk.bf16.vlgmr.msra.gmra.mrb[48].mxu1 %vm1121_vm3, %v2593_v31 }
0x1065   : > { %6368 = vmatprep.mubr.msk.bf16.mxu1 %vm6718_vm1, %v6717_v3 }
0x112d   : > { %v2487_v32 = vpop.f32.mrb[44].mxu0 }
0x112e   : > { %v6340_v16 = vpop.f32.mrb[45].mxu0 }
0x112f   : > { %v2490_v33 = vpop.f32.mrb[46].mxu0  ;;  %v2534_v34 = vpop.f32.mrb[44].mxu1 }
0x1130   : > { %v2540_v35 = vpack.c.bf16 %v2534_v34, %v2487_v32  ;;  %v6341_v36 = vpop.f32.mrb[47].mxu0  ;;  %v6346_v37 = vpop.f32.mrb[45].mxu1 }
0x1131   : > { %v2537_v40 = vpop.f32.mrb[46].mxu1 }
0x1132   : > { %2541 = vst.msk [vmem:[#allocation3] sm:$0xff] %vm1121_vm3, %v2540_v35  ;;  %v6347_v41 = vpop.f32.mrb[47].mxu1 }
0x1135   : > { %v2586_v42 = vpop.f32.mrb[48].mxu0 }
0x1136   : > { %v2642_v43 = vmul.f32 0.35355338, %v2586_v42  ;;  %v6352_v44 = vpop.f32.mrb[49].mxu0 }
0x1137   : > { %v2589_v45 = vpop.f32.mrb[50].mxu0  ;;  %v2636_v46 = vpop.f32.mrb[48].mxu1 }
0x1138   : > { %v2643_v48 = vmul.f32 0.35355338, %v2636_v46  ;;  %v6353_v49 = vpop.f32.mrb[51].mxu0  ;;  %v6358_v51 = vpop.f32.mrb[49].mxu1  ;;  %v2644_v53 = vadd.f32 %v7247_v52, %v2642_v43 }
0x1139   : > { %v2639_v54 = vpop.f32.mrb[50].mxu1 }
0x113a   : > { %v6359_v55 = vpop.f32.mrb[51].mxu1  ;;  %v2646_v56 = vsel %vm2421_vm8, %v2644_v53, -inf  ;;  %v2645_v58 = vadd.f32 %v7247_v52, %v2643_v48 }
0x113b   : > { %2647 = vmax.xlane.f32.xlu1 %v2646_v56 }
0x113c   : > { %v2649_v59 = vsel %vm2421_vm8, %v2645_v58, -inf }
0x113d   : > { %2650 = vmax.xlane.f32.xlu0 %v2649_v59 }
0x114c   : > { %2716 = vrot.lane.b32.xlu1 %v7217_v38, %s6721_s6 }
0x1153   : > { %2670 = vrot.lane.b32.xlu0 %v7219_v39, %s6721_s6  ;;  %s7808_s6 = scalar_lea.vmem %s7735_s15, %s6873_s27 }
0x11c8   : > { %v2648_v60 = vpop.xlane.xlu1 %2647 }
0x11c9   : > { %v2652_v63 = vsub.f32 %v2644_v53, %v2648_v60 }
0x11ca   : > { %v2651_v0 = vpop.xlane.xlu0 %2650 }
0x11cb   : > { %v2654_v1 = vmul.f32 1.442695, %v2652_v63  ;;  %v2653_v2 = vsub.f32 %v2645_v58, %v2651_v0 }
0x11cc   : > { %v2717_v4 = vpop.permute.xlu1 %2716 }
0x11cd   : > { %6645 = vpow2.f32 %v2654_v1  ;;  %v2656_v5 = vmul.f32 1.442695, %v2653_v2  ;;  %6367 = vmatpush3.bf16.msra.mxu1 %v2717_v4 }
0x11ce   : > { %v2671_v6 = vpop.permute.xlu0 %2670  ;;  %6378 = vmatprep.subr.bf16.mxu1 %v6717_v3 }
0x11cf   : > { %6647 = vpow2.f32 %v2656_v5  ;;  %6361 = vmatpush3.bf16.msra.mxu0 %v2671_v6 }
0x11d0   : > { %6372 = vmatprep.subr.bf16.mxu0 %v6717_v3 }
0x11d7   : > { %v6646_v7 = vpop.eup %6645 }
0x11d8   : > { %v2658_v8 = vsel %vm2421_vm8, %v6646_v7, 0.0 }
0x11d9   : > { %v6648_v9 = vpop.eup %6647  ;;  %2659 = vadd.xlane.f32.xlu0 %v2658_v8 }
0x11da   : > { %v2661_v10 = vsel %vm2421_vm8, %v6648_v9, 0.0 }
0x11db   : > { %2662 = vadd.xlane.f32.xlu1 %v2661_v10 }
0x11ec   : > { %2770 = vrot.lane.b32.xlu1 %v7219_v39, %s6725_s16 }
0x11ef   : > { %2820 = vrot.lane.b32.xlu0 %v7217_v38, %s6725_s16 }
0x11f0   : > { %2768 = vrot.lane.b32.xlu1 %v7232_v47, %s6725_s16 }
0x11f3   : > { %2818 = vrot.lane.b32.xlu0 %v7234_v50, %s6725_s16 }
0x1266   : > { %v2660_v11 = vpop.xlane.xlu0 %2659 }
0x1267   : > { %6649 = vrcp.f32 %v2660_v11 }
0x1268   : > { %v2663_v22 = vpop.xlane.xlu1 %2662 }
0x1269   : > { %6651 = vrcp.f32 %v2663_v22 }
0x126a   : > { %v2821_v13 = vpop.permute.xlu0 %2820 }
0x126b   : > { %v2826_v62 = vsel %vm1121_vm3, %v2821_v13, 0 }
0x126c   : > { %v2771_v29 = vpop.permute.xlu1 %2770 }
0x126d   : > { %v2776_v57 = vsel %vm1121_vm3, %v2771_v29, 0 }
0x126e   : > { %v2819_v20 = vpop.permute.xlu0 %2818 }
0x1270   : > { %v2769_v19 = vpop.permute.xlu1 %2768 }
0x1271   : > { %v6650_v12 = vpop.eup %6649 }
0x1272   : > { %v2666_v14 = vmul.f32 %v6650_v12, %v6646_v7 }
0x1273   : > { %v6652_v15 = vpop.eup %6651 }
0x1274   : > { %v2667_v17 = vmul.f32 %v6652_v15, %v6648_v9  ;;  %v2668_v18 = vpack.c.bf16 %v2666_v14, %v2666_v14 }
0x1276   : > { %6363 = vmatmul.mubr.msk.bf16.vlgmr.msra.gmra.mrb[52].mxu0 %vm2421_vm8, %v2668_v18  ;;  %v2669_v61 = vpack.c.bf16 %v2667_v17, %v2667_v17 }
0x1277   : > { %6373 = vmatpush3.bf16.xpose.msra.mxu0 %v2776_v57  ;;  %6374 = vmatprep.mubr.msk.bf16.mxu0 %vm6718_vm1, %v6717_v3 }
0x1278   : > { %6369 = vmatmul.mubr.msk.bf16.vlgmr.msra.gmra.mrb[52].mxu1 %vm2421_vm8, %v2669_v61  ;;  %6384 = vmatprep.subr.bf16.mxu0 %v6717_v3 }
0x1279   : > { %6379 = vmatpush3.bf16.xpose.msra.mxu1 %v2826_v62  ;;  %6380 = vmatprep.mubr.msk.bf16.mxu1 %vm6718_vm1, %v6717_v3 }
0x127a   : > { %6390 = vmatprep.subr.bf16.mxu1 %v6717_v3 }
0x127e   : > { %6375 = vmatmul.mubr.msk.bf16.vlgmr.msra.gmra.mrb[56].mxu0 %vm1121_vm3, %v2769_v19 }
0x127f   : > { %6386 = vmatprep.mubr.msk.bf16.mxu0 %vm6718_vm1, %v6717_v3 }
0x1280   : > { %6381 = vmatmul.mubr.msk.bf16.vlgmr.msra.gmra.mrb[56].mxu1 %vm1121_vm3, %v2819_v20 }
0x1281   : > { %6392 = vmatprep.mubr.msk.bf16.mxu1 %vm6718_vm1, %v6717_v3 }
0x1349   : > { %v7322_v21 = vpop.f32.mrb[52].mxu0 }
0x134a   : > { %v6364_v23 = vpop.f32.mrb[53].mxu0 }
0x134b   : > { %v2713_v24 = vpop.f32.mrb[54].mxu0  ;;  %v7324_v25 = vpop.f32.mrb[52].mxu1 }
0x134c   : > { %v2762_v28 = vpack.c.bf16 %v7324_v25, %v7322_v21  ;;  %v6365_v30 = vpop.f32.mrb[55].mxu0  ;;  %v6370_v31 = vpop.f32.mrb[53].mxu1 }
0x134d   : > { %v2759_v32 = vpop.f32.mrb[54].mxu1 }
0x134e   : > { %v6371_v16 = vpop.f32.mrb[55].mxu1 }
0x1351   : > { %v2812_v33 = vpop.f32.mrb[56].mxu0 }
0x1352   : > { %v2868_v34 = vmul.f32 0.35355338, %v2812_v33  ;;  %v6376_v35 = vpop.f32.mrb[57].mxu0 }
0x1353   : > { %v2815_v36 = vpop.f32.mrb[58].mxu0  ;;  %v2862_v37 = vpop.f32.mrb[56].mxu1 }
0x1354   : > { %v2869_v40 = vmul.f32 0.35355338, %v2862_v37  ;;  %v6377_v41 = vpop.f32.mrb[59].mxu0  ;;  %v6382_v42 = vpop.f32.mrb[57].mxu1  ;;  %v2870_v43 = vadd.f32 %v7247_v52, %v2868_v34 }
0x1355   : > { %v2865_v44 = vpop.f32.mrb[58].mxu1 }
0x1356   : > { %v6383_v45 = vpop.f32.mrb[59].mxu1  ;;  %v2872_v46 = vsel %vm2421_vm8, %v2870_v43, -inf  ;;  %v2871_v48 = vadd.f32 %v7247_v52, %v2869_v40 }
0x1357   : > { %2873 = vmax.xlane.f32.xlu1 %v2872_v46 }
0x1358   : > { %v2875_v49 = vsel %vm2421_vm8, %v2871_v48, -inf }
0x1359   : > { %2876 = vmax.xlane.f32.xlu0 %v2875_v49 }
0x1368   : > { %2942 = vrot.lane.b32.xlu1 %v7217_v38, %s6724_s3 }
0x136f   : > { %2896 = vrot.lane.b32.xlu0 %v7219_v39, %s6724_s3 }
0x13e4   : > { %v2874_v51 = vpop.xlane.xlu1 %2873 }
0x13e5   : > { %v2878_v53 = vsub.f32 %v2870_v43, %v2874_v51 }
0x13e6   : > { %v2877_v54 = vpop.xlane.xlu0 %2876 }
0x13e7   : > { %v2880_v55 = vmul.f32 1.442695, %v2878_v53  ;;  %v2879_v56 = vsub.f32 %v2871_v48, %v2877_v54 }
0x13e8   : > { %v2943_v58 = vpop.permute.xlu1 %2942 }
0x13e9   : > { %6653 = vpow2.f32 %v2880_v55  ;;  %v2882_v59 = vmul.f32 1.442695, %v2879_v56  ;;  %6391 = vmatpush3.bf16.msra.mxu1 %v2943_v58 }
0x13ea   : > { %v2897_v60 = vpop.permute.xlu0 %2896  ;;  %6402 = vmatprep.subr.bf16.mxu1 %v6717_v3 }
0x13eb   : > { %6655 = vpow2.f32 %v2882_v59  ;;  %6385 = vmatpush3.bf16.msra.mxu0 %v2897_v60 }
0x13ec   : > { %6396 = vmatprep.subr.bf16.mxu0 %v6717_v3 }
0x13f3   : > { %v6654_v63 = vpop.eup %6653 }
0x13f4   : > { %v2884_v0 = vsel %vm2421_vm8, %v6654_v63, 0.0 }
0x13f5   : > { %v6656_v1 = vpop.eup %6655  ;;  %2885 = vadd.xlane.f32.xlu0 %v2884_v0 }
0x13f6   : > { %v2887_v2 = vsel %vm2421_vm8, %v6656_v1, 0.0 }
0x13f7   : > { %2888 = vadd.xlane.f32.xlu1 %v2887_v2  ;;  %v6472_v2 = vld [vmem:[%s6923_s30 + $0x8] sm:$0xff]  }
0x1408   : > { %2996 = vrot.lane.b32.xlu1 %v7219_v39, %s6728_s18 }
0x140b   : > { %3046 = vrot.lane.b32.xlu0 %v7217_v38, %s6728_s18 }
0x140c   : > { %2994 = vrot.lane.b32.xlu1 %v7232_v47, %s6728_s18 }
0x140f   : > { %3044 = vrot.lane.b32.xlu0 %v7234_v50, %s6728_s18 }
0x1482   : > { %v2886_v4 = vpop.xlane.xlu0 %2885 }
0x1483   : > { %6657 = vrcp.f32 %v2886_v4 }
0x1484   : > { %v2889_v5 = vpop.xlane.xlu1 %2888 }
0x1485   : > { %6659 = vrcp.f32 %v2889_v5 }
0x1486   : > { %v3047_v22 = vpop.permute.xlu0 %3046 }
0x1487   : > { %v3052_v47 = vsel %vm1121_vm3, %v3047_v22, 0 }
0x1488   : > { %v2997_v9 = vpop.permute.xlu1 %2996 }
0x1489   : > { %v3002_v12 = vsel %vm1121_vm3, %v2997_v9, 0 }
0x148a   : > { %v3045_v15 = vpop.permute.xlu0 %3044 }
0x148c   : > { %v2995_v50 = vpop.permute.xlu1 %2994 }
0x148d   : > { %v6658_v6 = vpop.eup %6657 }
0x148e   : > { %v2892_v7 = vmul.f32 %v6658_v6, %v6654_v63 }
0x148f   : > { %v6660_v8 = vpop.eup %6659 }
0x1490   : > { %v2893_v10 = vmul.f32 %v6660_v8, %v6656_v1  ;;  %v2894_v11 = vpack.c.bf16 %v2892_v7, %v2892_v7  ;;  %v6471_v1 = vld [vmem:[%s6923_s30] sm:$0xff]  }
0x1492   : > { %6387 = vmatmul.mubr.msk.bf16.vlgmr.msra.gmra.mrb[60].mxu0 %vm2421_vm8, %v2894_v11  ;;  %v2895_v14 = vpack.c.bf16 %v2893_v10, %v2893_v10 }
0x1493   : > { %6397 = vmatpush3.bf16.xpose.msra.mxu0 %v3002_v12  ;;  %6398 = vmatprep.mubr.msk.bf16.mxu0 %vm6718_vm1, %v6717_v3 }
0x1494   : > { %6393 = vmatmul.mubr.msk.bf16.vlgmr.msra.gmra.mrb[60].mxu1 %vm2421_vm8, %v2895_v14  ;;  %6408 = vmatprep.subr.bf16.mxu0 %v6717_v3 }
0x1495   : > { %6403 = vmatpush3.bf16.xpose.msra.mxu1 %v3052_v47  ;;  %6404 = vmatprep.mubr.msk.bf16.mxu1 %vm6718_vm1, %v6717_v3 }
0x1496   : > { %6414 = vmatprep.subr.bf16.mxu1 %v6717_v3 }
0x149a   : > { %6399 = vmatmul.mubr.msk.bf16.vlgmr.msra.gmra.mrb[64].mxu0 %vm1121_vm3, %v2995_v50 }
0x149b   : > { %6410 = vmatprep.mubr.msk.bf16.mxu0 %vm6718_vm1, %v6717_v3 }
0x149c   : > { %6405 = vmatmul.mubr.msk.bf16.vlgmr.msra.gmra.mrb[64].mxu1 %vm1121_vm3, %v3045_v15 }
0x149d   : > { %6416 = vmatprep.mubr.msk.bf16.mxu1 %vm6718_vm1, %v6717_v3 }
0x1565   : > { %v2936_v29 = vpop.f32.mrb[60].mxu0 }
0x1566   : > { %v6388_v17 = vpop.f32.mrb[61].mxu0 }
0x1567   : > { %v2939_v18 = vpop.f32.mrb[62].mxu0  ;;  %v2982_v13 = vpop.f32.mrb[60].mxu1 }
0x1568   : > { %v2988_v57 = vpack.c.bf16 %v2982_v13, %v2936_v29  ;;  %v6389_v61 = vpop.f32.mrb[63].mxu0  ;;  %v6394_v62 = vpop.f32.mrb[61].mxu1 }
0x1569   : > { %v2985_v19 = vpop.f32.mrb[62].mxu1 }
0x156a   : > { %v6395_v20 = vpop.f32.mrb[63].mxu1 }
0x156d   : > { %v3038_v23 = vpop.f32.mrb[64].mxu0 }
0x156e   : > { %v3094_v24 = vmul.f32 0.35355338, %v3038_v23  ;;  %v6400_v30 = vpop.f32.mrb[65].mxu0 }
0x156f   : > { %v3041_v31 = vpop.f32.mrb[66].mxu0  ;;  %v3088_v32 = vpop.f32.mrb[64].mxu1 }
0x1570   : > { %v3095_v16 = vmul.f32 0.35355338, %v3088_v32  ;;  %v6401_v33 = vpop.f32.mrb[67].mxu0  ;;  %v6406_v34 = vpop.f32.mrb[65].mxu1  ;;  %v3096_v35 = vadd.f32 %v7247_v52, %v3094_v24 }
0x1571   : > { %v3091_v36 = vpop.f32.mrb[66].mxu1  ;;  %v3335_v33 = vld [vmem:[%s7809_s28] sm:$0xff] }
0x1572   : > { %v6407_v37 = vpop.f32.mrb[67].mxu1  ;;  %v3098_v40 = vsel %vm2421_vm8, %v3096_v35, -inf  ;;  %v3097_v41 = vadd.f32 %v7247_v52, %v3095_v16  ;;  %v3337_v34 = vld [vmem:[%s7809_s28 + $0x40] sm:$0xff] }
0x1573   : > { %3099 = vmax.xlane.f32.xlu1 %v3098_v40  ;;  %v5754_v36 = vcombine.high %v3335_v33, %v3337_v34  ;;  %v3338_v37 = vld [vmem:[%s7809_s28 + $0x48] sm:$0xff]  ;;  %v5753_v40 = vcombine.low %v3335_v33, %v3337_v34  ;;  %v6487_v33 = vld [vmem:[%s6956_s26 + $0x118] sm:$0xff]  }
0x1574   : > { %v3101_v42 = vsel %vm2421_vm8, %v3097_v41, -inf  ;;  %v6488_v34 = vld [vmem:[%s6956_s26 + $0x198] sm:$0xff]  }
0x1575   : > { %3102 = vmax.xlane.f32.xlu0 %v3101_v42 }
0x1600   : > { %v3100_v43 = vpop.xlane.xlu1 %3099 }
0x1601   : > { %v3104_v44 = vsub.f32 %v3096_v35, %v3100_v43  ;;  %v3336_v35 = vld [vmem:[%s7809_s28 + $0x8] sm:$0xff]  ;;  %v3339_v43 = vld [vmem:[%s7809_s28 + $0x80] sm:$0xff] }
0x1602   : > { %v3103_v45 = vpop.xlane.xlu0 %3102  ;;  %v5756_v42 = vcombine.high %v3336_v35, %v3338_v37 }
0x1603   : > { %v3106_v46 = vmul.f32 1.442695, %v3104_v44  ;;  %v3105_v48 = vsub.f32 %v3097_v41, %v3103_v45  ;;  %v5755_v41 = vcombine.low %v3336_v35, %v3338_v37  ;;  %v3341_v44 = vld [vmem:[%s7809_s28 + $0xc0] sm:$0xff]  ;;  %v3340_v45 = vld [vmem:[%s7809_s28 + $0x88] sm:$0xff] }
0x1604   : > { %v6489_v35 = vld [vmem:[%s6956_s26 + $0x160] sm:$0xff]  }
0x1605   : > { %6661 = vpow2.f32 %v3106_v46  ;;  %v3108_v49 = vmul.f32 1.442695, %v3105_v48  ;;  %v5758_v46 = vcombine.high %v3339_v43, %v3341_v44  ;;  %v3342_v48 = vld [vmem:[%s7809_s28 + $0xc8] sm:$0xff]  ;;  %v6491_v37 = vld [vmem:[%s6956_s26 + $0x120] sm:$0xff]  }
0x1607   : > { %6663 = vpow2.f32 %v3108_v49  ;;  %v5757_v49 = vcombine.low %v3339_v43, %v3341_v44  ;;  %v6495_v43 = vld [vmem:[%s6956_s26 + $0x128] sm:$0xff]  }
0x1608   : > { %v6496_v44 = vld [vmem:[%s6956_s26 + $0x1a8] sm:$0xff]  }
0x160f   : > { %v6662_v51 = vpop.eup %6661 }
0x1610   : > { %v3110_v53 = vsel %vm2421_vm8, %v6662_v51, 0.0 }
0x1611   : > { %v6664_v54 = vpop.eup %6663  ;;  %3111 = vadd.xlane.f32.xlu0 %v3110_v53  ;;  %v5760_v53 = vcombine.high %v3340_v45, %v3342_v48 }
0x1612   : > { %v3113_v55 = vsel %vm2421_vm8, %v6664_v54, 0.0 }
0x1613   : > { %3114 = vadd.xlane.f32.xlu1 %v3113_v55  ;;  %v3572_v55 = vld [vmem:[%s7809_s28 + $0x50] sm:$0xff] }
0x1624   : > { %3168 = vrot.lane.b32.xlu1 %v7217_v38, %s6727_s17 }
0x1627   : > { %3122 = vrot.lane.b32.xlu0 %v7219_v39, %s6727_s17  ;;  %s7810_s17 = sld [smem:[#allocation22_spill]] }
0x1628   : > { %2764 = vrot.lane.b32.xlu1 %v2762_v28, %s6730_s24 }
0x162b   : > { %2990 = vrot.lane.b32.xlu0 %v2988_v57, %s6731_s0 }
0x162d   : > { %s7811_s18 = scalar_lea.vmem %s7810_s17, %s6873_s27 }
0x169e   : > { %v3112_v52 = vpop.xlane.xlu0 %3111 }
0x169f   : > { %6665 = vrcp.f32 %v3112_v52  ;;  %v3571_v52 = vld [vmem:[%s7809_s28 + $0x18] sm:$0xff] }
0x16a0   : > { %v3115_v56 = vpop.xlane.xlu1 %3114 }
0x16a1   : > { %6667 = vrcp.f32 %v3115_v56  ;;  %v6733_v56 = vmov 0  }
0x16a2   : > { %v3123_v58 = vpop.permute.xlu0 %3122 }
0x16a3   : > { %6409 = vmatpush3.bf16.msra.mxu0 %v3123_v58 }
0x16a4   : > { %v3169_v59 = vpop.permute.xlu1 %3168  ;;  %6420 = vmatprep.subr.bf16.mxu0 %v6717_v3 }
0x16a5   : > { %6415 = vmatpush3.bf16.msra.mxu1 %v3169_v59  ;;  %v3573_v59 = vld [vmem:[%s7809_s28 + $0x58] sm:$0xff] }
0x16a6   : > { %v2991_v60 = vpop.permute.xlu0 %2990  ;;  %3408 = vmatprep.subr.bf16.mxu1 %v5754_v36  ;;  %v6490_v36 = vld [vmem:[%s6956_s26 + $0x1e0] sm:$0xff]  }
0x16a8   : > { %v2765_v38 = vpop.permute.xlu1 %2764 }
0x16a9   : > { %v6666_v39 = vpop.eup %6665  ;;  %2767 = vst.msk [vmem:[#allocation3] sm:$0xff] %vm1572_vm5, %v2765_v38 }
0x16aa   : > { %v3118_v21 = vmul.f32 %v6666_v39, %v6662_v51  ;;  %2993 = vst.msk [vmem:[#allocation3] sm:$0xff] %vm1803_vm6, %v2991_v60  ;;  %v5759_v51 = vcombine.low %v3340_v45, %v3342_v48  ;;  %v5765_v39 = vcombine.low %v3571_v52, %v3573_v59  ;;  %v5766_v60 = vcombine.high %v3571_v52, %v3573_v59  ;;  %v6497_v45 = vld [vmem:[%s6956_s26 + $0x170] sm:$0xff]   ;;  %v6505_v52 = vld [vmem:[%s6956_s26 + $0x40] sm:$0xff]  }
0x16ab   : > { %v6668_v25 = vpop.eup %6667  ;;  %v6499_v48 = vld [vmem:[%s6956_s26 + $0x130] sm:$0xff]   ;;  %v3345_v59 = vlaneseq }
0x16ac   : > { %v3119_v28 = vmul.f32 %v6668_v25, %v6664_v54  ;;  %v3120_v63 = vpack.c.bf16 %v3118_v21, %v3118_v21  ;;  %v3570_v54 = vld [vmem:[%s7809_s28 + $0x10] sm:$0xff] }
0x16ad   : > { %v5764_v58 = vcombine.high %v3570_v54, %v3572_v55  ;;  %v5763_v38 = vcombine.low %v3570_v54, %v3572_v55  ;;  %v6503_v54 = vld [vmem:[%s6956_s26 + $0x138] sm:$0xff]  }
0x16ae   : > { %6411 = vmatmul.mubr.msk.bf16.vlgmr.msra.gmra.mrb[68].mxu0 %vm2421_vm8, %v3120_v63  ;;  %v3121_v0 = vpack.c.bf16 %v3119_v28, %v3119_v28  ;;  %v6504_v55 = vld [vmem:[%s6956_s26 + $0x1b8] sm:$0xff]  }
0x16af   : > { %6424 = vmatprep.mubr.msk.bf16.mxu0 %vm6718_vm1, %v6717_v3  ;;  %6421 = vmatpush3.bf16.msra.mxu0 %v6471_v1 }
0x16b0   : > { %6417 = vmatmul.mubr.msk.bf16.vlgmr.msra.gmra.mrb[68].mxu1 %vm2421_vm8, %v3121_v0  ;;  %6422 = vmatprep.subr.bf16.mxu0 %v6717_v3  ;;  %v5747_v3 = vld [vmem:[%s7808_s6] ss:$0 sm:$0xff] }
0x16b1   : > { %3409 = vmatpush1.bf16.msra.mxu1 %v5753_v40  ;;  %3440 = vmatprep.mubr.bf16.mxu1 %v6733_v56  ;;  %v6492_v40 = vld [vmem:[%s6956_s26 + $0x1a0] sm:$0xff]  }
0x16b2   : > { %3410 = vmatprep.subr.bf16.mxu1 %v5758_v46  ;;  %v6498_v46 = vld [vmem:[%s6956_s26 + $0x1f0] sm:$0xff]  }
0x16b3   : > { %6423 = vmatpush3.bf16.msra.mxu0 %v6472_v2 }
0x16b4   : > { %3451 = vmatprep.subr.bf16.mxu0 %v5756_v42  ;;  %v6494_v42 = vld [vmem:[%s6956_s26 + $0x1e8] sm:$0xff]  }
0x16b5   : > { %3411 = vmatpush1.bf16.msra.mxu1 %v5757_v49  ;;  %v6500_v49 = vld [vmem:[%s6956_s26 + $0x1b0] sm:$0xff]  }
0x16b6   : > { %3640 = vmatprep.subr.bf16.mxu1 %v5764_v58  ;;  %v6506_v58 = vld [vmem:[%s6956_s26 + $0xc0] sm:$0xff]  }
0x1781   : > { %v3162_v4 = vpop.f32.mrb[68].mxu0 }
0x1782   : > { %v6412_v5 = vpop.f32.mrb[69].mxu0 }
0x1783   : > { %v3165_v6 = vpop.f32.mrb[70].mxu0  ;;  %v3208_v7 = vpop.f32.mrb[68].mxu1  ;;  %v5751_v5 = vld [vmem:[%s7811_s18] ss:$0 sm:$0xff] }
0x1784   : > { %v3214_v8 = vpack.c.bf16 %v3208_v7, %v3162_v4  ;;  %v6413_v9 = vpop.f32.mrb[71].mxu0  ;;  %v6418_v10 = vpop.f32.mrb[69].mxu1 }
0x1785   : > { %v3211_v11 = vpop.f32.mrb[70].mxu1  ;;  %v5752_v9 = vld [vmem:[%s7813_s8] ss:$0 sm:$0xff] }
0x1786   : > { %v6419_v22 = vpop.f32.mrb[71].mxu1  ;;  %3216 = vrot.lane.b32.xlu1 %v3214_v8, %s6732_s4  ;;  %v3574_v11 = vld [vmem:[%s7809_s28 + $0x90] sm:$0xff] }
0x1787   : > { %v3576_v22 = vld [vmem:[%s7809_s28 + $0xd0] sm:$0xff] }
0x17f8   : > { %v3217_v12 = vpop.permute.xlu1 %3216 }
0x17f9   : > { %3219 = vst.msk [vmem:[#allocation3] sm:$0xff] %vm2034_vm7, %v3217_v12  ;;  %v3575_v12 = vld [vmem:[%s7809_s28 + $0x98] sm:$0xff] }
0x1800   : > { %v3220_v14 = vld [vmem:[#allocation3] sm:$0xff] }
0x1801   : > { %6425 = vmatmul.mubr.msk.bf16.vlgmr.msra.gmra.mrb[72].mxu0 %vm1068_vm2, %v3220_v14  ;;  %v3577_v14 = vld [vmem:[%s7809_s28 + $0xd8] sm:$0xff] }
0x1802   : > { %3452 = vmatpush1.bf16.msra.mxu0 %v5755_v41  ;;  %3483 = vmatprep.mubr.bf16.mxu0 %v6733_v56  ;;  %v6493_v41 = vld [vmem:[%s6956_s26 + $0x168] sm:$0xff]  }
0x1803   : > { %3453 = vmatprep.subr.bf16.mxu0 %v5760_v53  ;;  %v6502_v53 = vld [vmem:[%s6956_s26 + $0x1f8] sm:$0xff]  }
0x1806   : > { %3454 = vmatpush1.bf16.msra.mxu0 %v5759_v51  ;;  %v6501_v51 = vld [vmem:[%s6956_s26 + $0x178] sm:$0xff]  }
0x1807   : > { %3683 = vmatprep.subr.bf16.mxu0 %v5766_v60 }
0x18d4   : > { %v3281_v47 = vpop.f32.mrb[72].mxu0 }
0x18d5   : > { %v3282_v50 = vadd.f32 %v5747_v3, %v3281_v47  ;;  %v6426_v15 = vpop.f32.mrb[73].mxu0 }
0x18d6   : > { %v3284_v29 = vpop.f32.mrb[74].mxu0  ;;  %v5768_v15 = vcombine.high %v3574_v11, %v3576_v22 }
0x18d7   : > { %v3285_v17 = vadd.f32 %v5747_v3, %v3284_v29  ;;  %v6427_v18 = vpop.f32.mrb[75].mxu0  ;;  %v3288_v13 = vadd.f32 %v3282_v50, %v7203_v26  ;;  %v5770_v29 = vcombine.high %v3575_v12, %v3577_v14 }
0x18d8   : > { %v5769_v18 = vcombine.low %v3575_v12, %v3577_v14 }
0x18d9   : > { %v3292_v57 = vsel %vm1068_vm2, %v3288_v13, 0.0  ;;  %v3289_v61 = vadd.f32 %v3285_v17, %v7205_v27  ;;  %v5767_v17 = vcombine.low %v3574_v11, %v3576_v22 }
0x18da   : > { %3293 = vadd.xlane.f32.xlu0 %v3292_v57  ;;  %v6474_v57 = vld [vmem:[%s6956_s26 + $0x1c0] sm:$0xff]  }
0x18db   : > { %v3295_v62 = vsel %vm1068_vm2, %v3289_v61, 0.0 }
0x18dc   : > { %3296 = vadd.xlane.f32.xlu1 %v3295_v62  ;;  %v6476_v62 = vld [vmem:[%s6956_s26 + $0x180] sm:$0xff]  }
0x1967   : > { %v3294_v19 = vpop.xlane.xlu0 %3293 }
0x1968   : > { %v3298_v20 = vmul.f32 0.03125, %v3294_v19  ;;  %v6477_v19 = vld [vmem:[%s6956_s26 + $0x148] sm:$0xff]  }
0x1969   : > { %v3297_v23 = vpop.xlane.xlu1 %3296 }
0x196a   : > { %v3300_v24 = vsub.f32 %v3288_v13, %v3298_v20  ;;  %v3299_v30 = vmul.f32 0.03125, %v3297_v23  ;;  %v6473_v13 = vld [vmem:[%s6956_s26 + $0x140] sm:$0xff]   ;;  %v6478_v20 = vld [vmem:[%s6956_s26 + $0x1c8] sm:$0xff]  }
0x196b   : > { %v6479_v23 = vld [vmem:[%s6956_s26 + $0x108] sm:$0xff]  }
0x196c   : > { %v3301_v31 = vsub.f32 %v3289_v61, %v3299_v30  ;;  %v3302_v32 = vmul.f32 %v3300_v24, %v3300_v24  ;;  %v6475_v61 = vld [vmem:[%s6956_s26 + $0x100] sm:$0xff]   ;;  %v6481_v30 = vld [vmem:[%s6956_s26 + $0x150] sm:$0xff]  }
0x196e   : > { %v3304_v26 = vsel %vm1068_vm2, %v3302_v32, 0.0  ;;  %v3303_v16 = vmul.f32 %v3301_v31, %v3301_v31  ;;  %v6483_v32 = vld [vmem:[%s6956_s26 + $0x110] sm:$0xff]  }
0x196f   : > { %3305 = vadd.xlane.f32.xlu0 %v3304_v26  ;;  %v6484_v26 = vld [vmem:[%s6956_s26 + $0x190] sm:$0xff]  }
0x1970   : > { %v3307_v27 = vsel %vm1068_vm2, %v3303_v16, 0.0  ;;  %v6485_v16 = vld [vmem:[%s6956_s26 + $0x158] sm:$0xff]  }
0x1973   : > { %3308 = vadd.xlane.f32.xlu0 %v3307_v27  ;;  %v6486_v27 = vld [vmem:[%s6956_s26 + $0x1d8] sm:$0xff]  }
0x19fc   : > { %v3306_v21 = vpop.xlane.xlu0 %3305 }
0x19fd   : > { %v3310_v25 = vmul.f32 0.03125, %v3306_v21  ;;  %v3343_v21 = vld [vmem:[%s6946_s14] sm:$0xf] }
0x19ff   : > { %v3312_v28 = vadd.f32 1e-05, %v3310_v25 }
0x1a00   : > { %v3309_v63 = vpop.xlane.xlu0 %3308 }
0x1a01   : > { %6669 = vrsqrt.f32 %v3312_v28  ;;  %v3311_v0 = vmul.f32 0.03125, %v3309_v63 }
0x1a03   : > { %v3313_v1 = vadd.f32 1e-05, %v3311_v0 }
0x1a05   : > { %6671 = vrsqrt.f32 %v3313_v1 }
0x1a0b   : > { %v6670_v2 = vpop.eup %6669 }
0x1a0c   : > { %v3316_v4 = vmul.f32 %v6670_v2, %v3300_v24  ;;  %v6480_v24 = vld [vmem:[%s6956_s26 + $0x188] sm:$0xff]  }
0x1a0e   : > { %v3324_v7 = vmul.f32 %v5751_v5, %v3316_v4 }
0x1a0f   : > { %v6672_v6 = vpop.eup %6671 }
0x1a10   : > { %v3317_v8 = vmul.f32 %v6672_v6, %v3301_v31  ;;  %v7431_v3 = vadd.f32 %v5752_v9, %v3324_v7  ;;  %v6482_v31 = vld [vmem:[%s6956_s26 + $0x1d0] sm:$0xff]   ;;  %v3578_v6 = vld [vmem:[%s6946_s14 + $0x4] sm:$0xf] }
0x1a12   : > { %v3325_v10 = vmul.f32 %v5751_v5, %v3317_v8 }
0x1a14   : > { %v7433_v47 = vadd.f32 %v5752_v9, %v3325_v10 }
0x1a16   : > { %v7437_v50 = vpack.c.bf16 %v7433_v47, %v7431_v3 }
0x1a18   : > { %5761 = vmatmul.mubr.msk.bf16.vlgmr.msra.gmra.mrb[72].mxu1 %vm1068_vm2, %v7437_v50  ;;  %5762 = vmatmul.mubr.msk.bf16.vlgmr.msra.gmra.mrb[76].mxu0 %vm1068_vm2, %v7437_v50 }
0x1a19   : > { %3641 = vmatpush1.bf16.msra.mxu1 %v5763_v38  ;;  %3684 = vmatpush1.bf16.msra.mxu0 %v5765_v39  ;;  %v3346_v38 = vshrl.u32 %v3345_v59, 7 }
0x1a1a   : > { %3642 = vmatprep.subr.bf16.mxu1 %v5768_v15  ;;  %3685 = vmatprep.subr.bf16.mxu0 %v5770_v29 }
0x1a1b   : > { %3672 = vmatprep.mubr.bf16.mxu1 %v6733_v56  ;;  %3715 = vmatprep.mubr.bf16.mxu0 %v6733_v56  ;;  %v7483_v39 = vsub.s32 0, %v3346_v38  ;;  %v7485_v60 = vsub.s32 2, %v3346_v38  ;;  %v7488_v25 = vsub.s32 1, %v3346_v38  ;;  %v7490_v28 = vsub.s32 3, %v3346_v38 }
0x1a1d   : > { %3643 = vmatpush1.bf16.msra.mxu1 %v5767_v17  ;;  %3686 = vmatpush1.bf16.msra.mxu0 %v5769_v18  ;;  %v3348_v63 = vrot.slane %v3343_v21, %v7483_v39  ;;  %v3356_v0 = vrot.slane %v3343_v21, %v7485_v60  ;;  %v3352_v1 = vrot.slane %v3343_v21, %v7488_v25 }
0x1a1e   : > { %6020 = vmatprep.subr.bf16.mxu1 %v6473_v13  ;;  %6042 = vmatprep.subr.bf16.mxu0 %v6474_v57  ;;  %v3360_v2 = vrot.slane %v3343_v21, %v7490_v28  ;;  %v3583_v13 = vrot.slane %v3578_v6, %v7483_v39  ;;  %v3591_v57 = vrot.slane %v3578_v6, %v7485_v60 }
0x1a20   : > { %5771 = vmatmul.mubr.msk.bf16.vlgmr.msra.gmra.mrb[76].mxu1 %vm1068_vm2, %v7437_v50  ;;  %5772 = vmatmul.mubr.msk.bf16.vlgmr.msra.gmra.mrb[80].mxu0 %vm1068_vm2, %v7437_v50 }
0x1a21   : > { %6021 = vmatpush3.bf16.msra.mxu1 %v6475_v61  ;;  %6043 = vmatpush3.bf16.msra.mxu0 %v6476_v62 }
0x1a22   : > { %6022 = vmatprep.subr.bf16.mxu1 %v6477_v19  ;;  %6044 = vmatprep.subr.bf16.mxu0 %v6478_v20  ;;  %v3587_v19 = vrot.slane %v3578_v6, %v7488_v25  ;;  %v3595_v20 = vrot.slane %v3578_v6, %v7490_v28 }
0x1a25   : > { %6023 = vmatpush3.bf16.msra.mxu1 %v6479_v23  ;;  %6045 = vmatpush3.bf16.msra.mxu0 %v6480_v24 }
0x1a26   : > { %6024 = vmatprep.subr.bf16.mxu1 %v6481_v30  ;;  %6046 = vmatprep.subr.bf16.mxu0 %v6482_v31 }
0x1a29   : > { %6025 = vmatpush3.bf16.msra.mxu1 %v6483_v32  ;;  %6047 = vmatpush3.bf16.msra.mxu0 %v6484_v26 }
0x1a2a   : > { %6026 = vmatprep.subr.bf16.mxu1 %v6485_v16  ;;  %6048 = vmatprep.subr.bf16.mxu0 %v6486_v27 }
0x1a2d   : > { %6027 = vmatpush3.bf16.msra.mxu1 %v6487_v33  ;;  %6049 = vmatpush3.bf16.msra.mxu0 %v6488_v34 }
0x1a2e   : > { %6028 = vmatprep.subr.bf16.mxu1 %v6489_v35  ;;  %6050 = vmatprep.subr.bf16.mxu0 %v6490_v36 }
0x1a31   : > { %6029 = vmatpush3.bf16.msra.mxu1 %v6491_v37  ;;  %6051 = vmatpush3.bf16.msra.mxu0 %v6492_v40 }
0x1a32   : > { %6030 = vmatprep.subr.bf16.mxu1 %v6493_v41  ;;  %6052 = vmatprep.subr.bf16.mxu0 %v6494_v42 }
0x1a35   : > { %6031 = vmatpush3.bf16.msra.mxu1 %v6495_v43  ;;  %6053 = vmatpush3.bf16.msra.mxu0 %v6496_v44 }
0x1a36   : > { %6032 = vmatprep.subr.bf16.mxu1 %v6497_v45  ;;  %6054 = vmatprep.subr.bf16.mxu0 %v6498_v46 }
0x1a39   : > { %6033 = vmatpush3.bf16.msra.mxu1 %v6499_v48  ;;  %6055 = vmatpush3.bf16.msra.mxu0 %v6500_v49 }
0x1a3a   : > { %6034 = vmatprep.subr.bf16.mxu1 %v6501_v51  ;;  %6056 = vmatprep.subr.bf16.mxu0 %v6502_v53 }
0x1a3d   : > { %6035 = vmatpush3.bf16.msra.mxu1 %v6503_v54  ;;  %6057 = vmatpush3.bf16.msra.mxu0 %v6504_v55 }
0x1a3e   : > { %6064 = vmatprep.subr.bf16.mxu1 %v6505_v52  ;;  %6086 = vmatprep.subr.bf16.mxu0 %v6506_v58 }
0x1aeb   : > { %v3442_v4 = vpop.f32.mrb[72].mxu1  ;;  %v3485_v5 = vpop.f32.mrb[76].mxu0 }
0x1aec   : > { %v3443_v7 = vadd.f32 %v3442_v4, %v3348_v63  ;;  %v3486_v8 = vadd.f32 %v3485_v5, %v3356_v0  ;;  %v3444_v9 = vpop.f32.mrb[73].mxu1  ;;  %v3487_v10 = vpop.f32.mrb[77].mxu0 }
0x1aed   : > { %v3445_v11 = vadd.f32 %v3444_v9, %v3352_v1  ;;  %v3488_v22 = vadd.f32 %v3487_v10, %v3360_v2  ;;  %v3446_v12 = vpop.f32.mrb[74].mxu1  ;;  %v3489_v14 = vpop.f32.mrb[78].mxu0  ;;  %v6507_v9 = vld [vmem:[%s6956_s26] sm:$0xff]  }
0x1aee   : > { %v3447_v15 = vadd.f32 %v3446_v12, %v3348_v63  ;;  %v3490_v29 = vadd.f32 %v3489_v14, %v3356_v0  ;;  %v3448_v17 = vpop.f32.mrb[75].mxu1  ;;  %v3491_v18 = vpop.f32.mrb[79].mxu0  ;;  %v3494_v23 = vmax.f32 %v3443_v7, 0.0  ;;  %v3496_v24 = vmax.f32 %v3486_v8, 0.0  ;;  %v6508_v10 = vld [vmem:[%s6956_s26 + $0x80] sm:$0xff]   ;;  %v6511_v12 = vld [vmem:[%s6956_s26 + $0x8] sm:$0xff]  }
0x1aef   : > { %v3449_v61 = vadd.f32 %v3448_v17, %v3352_v1  ;;  %v3492_v62 = vadd.f32 %v3491_v18, %v3360_v2  ;;  %v3495_v32 = vmax.f32 %v3445_v11, 0.0  ;;  %v3497_v26 = vmax.f32 %v3488_v22, 0.0  ;;  %v6509_v11 = vld [vmem:[%s6956_s26 + $0x48] sm:$0xff]   ;;  %v6515_v17 = vld [vmem:[%s6956_s26 + $0x10] sm:$0xff]  }
0x1af0   : > { %v3498_v30 = vmax.f32 %v3447_v15, 0.0  ;;  %v3500_v31 = vmax.f32 %v3490_v29, 0.0  ;;  %v6510_v22 = vld [vmem:[%s6956_s26 + $0xc8] sm:$0xff]   ;;  %v6513_v15 = vld [vmem:[%s6956_s26 + $0x50] sm:$0xff]  }
0x1af1   : > { %v3499_v16 = vmax.f32 %v3449_v61, 0.0  ;;  %v3501_v27 = vmax.f32 %v3492_v62, 0.0  ;;  %v6512_v14 = vld [vmem:[%s6956_s26 + $0x88] sm:$0xff]   ;;  %v6514_v29 = vld [vmem:[%s6956_s26 + $0xd0] sm:$0xff]   ;;  %v6519_v61 = vld [vmem:[%s6956_s26 + $0x18] sm:$0xff]  }
0x1af2   : > { %v7501_v33 = vpack.c.bf16 %v3498_v30, %v3494_v23  ;;  %v7503_v34 = vpack.c.bf16 %v3500_v31, %v3496_v24  ;;  %v6516_v18 = vld [vmem:[%s6956_s26 + $0x90] sm:$0xff]   ;;  %v6520_v62 = vld [vmem:[%s6956_s26 + $0x98] sm:$0xff]   ;;  %v6523_v23 = vld [vmem:[%s6956_s26 + $0x20] sm:$0xff]  }
0x1af3   : > { %v3503_v35 = vpack.c.bf16 %v3499_v16, %v3495_v32  ;;  %v3505_v36 = vpack.c.bf16 %v3501_v27, %v3497_v26  ;;  %v3674_v37 = vpop.f32.mrb[76].mxu1  ;;  %v3717_v40 = vpop.f32.mrb[80].mxu0  ;;  %v6524_v24 = vld [vmem:[%s6956_s26 + $0xa0] sm:$0xff]   ;;  %v6525_v30 = vld [vmem:[%s6956_s26 + $0x68] sm:$0xff]   ;;  %v6529_v16 = vld [vmem:[%s6956_s26 + $0x70] sm:$0xff]  }
0x1af4   : > { %v3675_v41 = vadd.f32 %v3674_v37, %v3583_v13  ;;  %v3718_v42 = vadd.f32 %v3717_v40, %v3591_v57  ;;  %v3676_v43 = vpop.f32.mrb[77].mxu1  ;;  %v3719_v44 = vpop.f32.mrb[81].mxu0  ;;  %v6526_v31 = vld [vmem:[%s6956_s26 + $0xe8] sm:$0xff]   ;;  %v6530_v27 = vld [vmem:[%s6956_s26 + $0xf0] sm:$0xff]   ;;  %v6533_v37 = vld [vmem:[%s6956_s26 + $0x78] sm:$0xff]  }
0x1af5   : > { %v3677_v45 = vadd.f32 %v3676_v43, %v3587_v19  ;;  %v3720_v46 = vadd.f32 %v3719_v44, %v3595_v20  ;;  %v3678_v48 = vpop.f32.mrb[78].mxu1  ;;  %v3721_v49 = vpop.f32.mrb[82].mxu0  ;;  %v6527_v32 = vld [vmem:[%s6956_s26 + $0x28] sm:$0xff]   ;;  %v6534_v40 = vld [vmem:[%s6956_s26 + $0xf8] sm:$0xff]  }
0x1af6   : > { %v3679_v51 = vadd.f32 %v3678_v48, %v3583_v13  ;;  %v3722_v53 = vadd.f32 %v3721_v49, %v3591_v57  ;;  %v3680_v54 = vpop.f32.mrb[79].mxu1  ;;  %v3723_v55 = vpop.f32.mrb[83].mxu0  ;;  %v3726_v59 = vmax.f32 %v3675_v41, 0.0  ;;  %v3728_v38 = vmax.f32 %v3718_v42, 0.0  ;;  %v6517_v13 = vld [vmem:[%s6956_s26 + $0x58] sm:$0xff]   ;;  %v6528_v26 = vld [vmem:[%s6956_s26 + $0xa8] sm:$0xff]  }
0x1af7   : > { %v3681_v52 = vadd.f32 %v3680_v54, %v3587_v19  ;;  %v3724_v58 = vadd.f32 %v3723_v55, %v3595_v20  ;;  %v3727_v0 = vmax.f32 %v3677_v45, 0.0  ;;  %v3729_v1 = vmax.f32 %v3720_v46, 0.0  ;;  %v6518_v57 = vld [vmem:[%s6956_s26 + $0xd8] sm:$0xff]   ;;  %v6521_v19 = vld [vmem:[%s6956_s26 + $0x60] sm:$0xff]   ;;  %v4351_v43 = vld [vmem:[%s7809_s28 + $0x28] sm:$0xff] }
0x1af8   : > { %v3730_v21 = vmax.f32 %v3679_v51, 0.0  ;;  %v3732_v63 = vmax.f32 %v3722_v53, 0.0  ;;  %v6522_v20 = vld [vmem:[%s6956_s26 + $0xe0] sm:$0xff]   ;;  %v4353_v44 = vld [vmem:[%s7809_s28 + $0x68] sm:$0xff]  ;;  %v6535_v45 = vld [vmem:[%s6956_s26 + $0x38] sm:$0xff]  }
0x1af9   : > { %v3731_v2 = vmax.f32 %v3681_v52, 0.0  ;;  %v3733_v4 = vmax.f32 %v3724_v58, 0.0  ;;  %v4350_v41 = vld [vmem:[%s7809_s28 + $0x20] sm:$0xff]  ;;  %v6536_v46 = vld [vmem:[%s6956_s26 + $0xb8] sm:$0xff]   ;;  %v5840_v49 = vcombine.high %v4351_v43, %v4353_v44  ;;  %v4355_v54 = vld [vmem:[%s7809_s28 + $0xa8] sm:$0xff]  ;;  %v5839_v58 = vcombine.low %v4351_v43, %v4353_v44 }
0x1afa   : > { %v3734_v5 = vpack.c.bf16 %v3730_v21, %v3726_v59  ;;  %v3736_v6 = vpack.c.bf16 %v3732_v63, %v3728_v38  ;;  %v4352_v42 = vld [vmem:[%s7809_s28 + $0x60] sm:$0xff]  ;;  %v4357_v55 = vld [vmem:[%s7809_s28 + $0xe8] sm:$0xff] }
0x1afb   : > { %v3735_v7 = vpack.c.bf16 %v3731_v2, %v3727_v0  ;;  %v3737_v8 = vpack.c.bf16 %v3733_v4, %v3729_v1  ;;  %v5838_v48 = vcombine.high %v4350_v41, %v4352_v42  ;;  %v4354_v51 = vld [vmem:[%s7809_s28 + $0xa0] sm:$0xff]  ;;  %v5837_v52 = vcombine.low %v4350_v41, %v4352_v42  ;;  %v6541_v2 = vld [vmem:[%s6956_s26 + $0x248] sm:$0xff]  }
0x1afc   : > { %v4356_v53 = vld [vmem:[%s7809_s28 + $0xe0] sm:$0xff]  ;;  %v5844_v38 = vcombine.high %v4355_v54, %v4357_v55  ;;  %v5843_v63 = vcombine.low %v4355_v54, %v4357_v55  ;;  %v6542_v4 = vld [vmem:[%s6956_s26 + $0x2c8] sm:$0xff]  }
0x1afd   : > { %4026 = vmatprep.mubr.bf16.mxu1 %v3735_v7  ;;  %4067 = vmatprep.mubr.bf16.mxu0 %v3737_v8  ;;  %v5842_v59 = vcombine.high %v4354_v51, %v4356_v53  ;;  %v5841_v21 = vcombine.low %v4354_v51, %v4356_v53  ;;  %v6539_v0 = vld [vmem:[%s6956_s26 + $0x200] sm:$0xff]   ;;  %v6545_v7 = vld [vmem:[%s6956_s26 + $0x250] sm:$0xff]  }
0x1afe   : > { %4027 = vmatmul.mubr.bf16.vlgmr.msra.gmra.mrb[80].mxu1 %v3734_v5  ;;  %4068 = vmatmul.mubr.bf16.vlgmr.msra.gmra.mrb[84].mxu0 %v3736_v6  ;;  %v6540_v1 = vld [vmem:[%s6956_s26 + $0x280] sm:$0xff]   ;;  %v6543_v5 = vld [vmem:[%s6956_s26 + $0x208] sm:$0xff]   ;;  %v6546_v8 = vld [vmem:[%s6956_s26 + $0x2d0] sm:$0xff]  }
0x1aff   : > { %6065 = vmatpush3.bf16.msra.mxu1 %v6507_v9  ;;  %6087 = vmatpush3.bf16.msra.mxu0 %v6508_v10  ;;  %v6544_v6 = vld [vmem:[%s6956_s26 + $0x288] sm:$0xff]   ;;  %v6547_v9 = vld [vmem:[%s6956_s26 + $0x210] sm:$0xff]  }
0x1b00   : > { %4300 = vmatprep.mubr.bf16.mxu1 %v3503_v35  ;;  %4341 = vmatprep.mubr.bf16.mxu0 %v3505_v36  ;;  %v6531_v35 = vld [vmem:[%s6956_s26 + $0x30] sm:$0xff]  }
0x1b01   : > { %6066 = vmatprep.subr.bf16.mxu1 %v6509_v11  ;;  %6088 = vmatprep.subr.bf16.mxu0 %v6510_v22  ;;  %v6532_v36 = vld [vmem:[%s6956_s26 + $0xb0] sm:$0xff]   ;;  %v6549_v11 = vld [vmem:[%s6956_s26 + $0x258] sm:$0xff]  }
0x1b02   : > { %v6548_v10 = vld [vmem:[%s6956_s26 + $0x290] sm:$0xff]   ;;  %v6550_v22 = vld [vmem:[%s6956_s26 + $0x2d8] sm:$0xff]  }
0x1b03   : > { %6067 = vmatpush3.bf16.msra.mxu1 %v6511_v12  ;;  %6089 = vmatpush3.bf16.msra.mxu0 %v6512_v14  ;;  %v6551_v12 = vld [vmem:[%s6956_s26 + $0x218] sm:$0xff]  }
0x1b04   : > { %6068 = vmatprep.subr.bf16.mxu1 %v6513_v15  ;;  %6090 = vmatprep.subr.bf16.mxu0 %v6514_v29  ;;  %v6552_v14 = vld [vmem:[%s6956_s26 + $0x298] sm:$0xff]   ;;  %v6553_v15 = vld [vmem:[%s6956_s26 + $0x260] sm:$0xff]  }
0x1b05   : > { %v6554_v29 = vld [vmem:[%s6956_s26 + $0x2e0] sm:$0xff]  }
0x1b07   : > { %6069 = vmatpush3.bf16.msra.mxu1 %v6515_v17  ;;  %6091 = vmatpush3.bf16.msra.mxu0 %v6516_v18  ;;  %v6555_v17 = vld [vmem:[%s6956_s26 + $0x220] sm:$0xff]  }
0x1b08   : > { %6070 = vmatprep.subr.bf16.mxu1 %v6517_v13  ;;  %6092 = vmatprep.subr.bf16.mxu0 %v6518_v57  ;;  %v6556_v18 = vld [vmem:[%s6956_s26 + $0x2a0] sm:$0xff]   ;;  %v6557_v13 = vld [vmem:[%s6956_s26 + $0x268] sm:$0xff]  }
0x1b09   : > { %v6558_v57 = vld [vmem:[%s6956_s26 + $0x2e8] sm:$0xff]  }
0x1b0b   : > { %6071 = vmatpush3.bf16.msra.mxu1 %v6519_v61  ;;  %6093 = vmatpush3.bf16.msra.mxu0 %v6520_v62  ;;  %v6559_v61 = vld [vmem:[%s6956_s26 + $0x228] sm:$0xff]  }
0x1b0c   : > { %6072 = vmatprep.subr.bf16.mxu1 %v6521_v19  ;;  %6094 = vmatprep.subr.bf16.mxu0 %v6522_v20  ;;  %v6560_v62 = vld [vmem:[%s6956_s26 + $0x2a8] sm:$0xff]   ;;  %v6561_v19 = vld [vmem:[%s6956_s26 + $0x270] sm:$0xff]  }
0x1b0d   : > { %v6562_v20 = vld [vmem:[%s6956_s26 + $0x2f0] sm:$0xff]  }
0x1b0f   : > { %6073 = vmatpush3.bf16.msra.mxu1 %v6523_v23  ;;  %6095 = vmatpush3.bf16.msra.mxu0 %v6524_v24  ;;  %v6563_v23 = vld [vmem:[%s6956_s26 + $0x230] sm:$0xff]  }
0x1b10   : > { %6074 = vmatprep.subr.bf16.mxu1 %v6525_v30  ;;  %6096 = vmatprep.subr.bf16.mxu0 %v6526_v31  ;;  %v6564_v24 = vld [vmem:[%s6956_s26 + $0x2b0] sm:$0xff]   ;;  %v6565_v30 = vld [vmem:[%s6956_s26 + $0x278] sm:$0xff]  }
0x1b11   : > { %v6566_v31 = vld [vmem:[%s6956_s26 + $0x2f8] sm:$0xff]  }
0x1b13   : > { %6075 = vmatpush3.bf16.msra.mxu1 %v6527_v32  ;;  %6097 = vmatpush3.bf16.msra.mxu0 %v6528_v26  ;;  %v6567_v32 = vld [vmem:[%s6956_s26 + $0x238] sm:$0xff]  }
0x1b14   : > { %6076 = vmatprep.subr.bf16.mxu1 %v6529_v16  ;;  %6098 = vmatprep.subr.bf16.mxu0 %v6530_v27  ;;  %v6568_v26 = vld [vmem:[%s6956_s26 + $0x2b8] sm:$0xff]   ;;  %v7584_v16 = vld [vmem:[%s7809_s28 + $0x30] sm:$0xff] }
0x1b15   : > { %v7587_v27 = vld [vmem:[%s7809_s28 + $0x70] sm:$0xff] }
0x1b17   : > { %6077 = vmatpush3.bf16.msra.mxu1 %v6531_v35  ;;  %6099 = vmatpush3.bf16.msra.mxu0 %v6532_v36  ;;  %v7590_v35 = vld [vmem:[%s7809_s28 + $0x38] sm:$0xff]  ;;  %v5880_v36 = vcombine.high %v7584_v16, %v7587_v27 }
0x1b18   : > { %6078 = vmatprep.subr.bf16.mxu1 %v6533_v37  ;;  %6100 = vmatprep.subr.bf16.mxu0 %v6534_v40  ;;  %v7595_v37 = vld [vmem:[%s7809_s28 + $0x78] sm:$0xff]  ;;  %v5879_v40 = vcombine.low %v7584_v16, %v7587_v27  ;;  %v6571_v16 = vld [vmem:[%s6956_s26 + $0x300] sm:$0xff]  }
0x1b19   : > { %v5881_v41 = vcombine.low %v7590_v35, %v7595_v37  ;;  %v5882_v42 = vcombine.high %v7590_v35, %v7595_v37  ;;  %v6572_v27 = vld [vmem:[%s6956_s26 + $0x380] sm:$0xff]   ;;  %v6573_v35 = vld [vmem:[%s6956_s26 + $0x348] sm:$0xff]  }
0x1b1a   : > { %v6574_v37 = vld [vmem:[%s6956_s26 + $0x3c8] sm:$0xff]  }
0x1b1b   : > { %6079 = vmatpush3.bf16.msra.mxu1 %v6535_v45  ;;  %6101 = vmatpush3.bf16.msra.mxu0 %v6536_v46 }
0x1b1c   : > { %4420 = vmatprep.subr.bf16.mxu1 %v5838_v48  ;;  %4463 = vmatprep.subr.bf16.mxu0 %v5840_v49 }
0x1b1e   : > { %4301 = vmatmul.mubr.bf16.vlgmr.msra.gmra.mrb[84].mxu1 %v7501_v33  ;;  %4342 = vmatmul.mubr.bf16.vlgmr.msra.gmra.mrb[88].mxu0 %v7503_v34  ;;  %v6537_v33 = vld [vmem:[%s6956_s26 + $0x240] sm:$0xff]  }
0x1b1f   : > { %4421 = vmatpush1.bf16.msra.mxu1 %v5837_v52  ;;  %4464 = vmatpush1.bf16.msra.mxu0 %v5839_v58  ;;  %v6538_v34 = vld [vmem:[%s6956_s26 + $0x2c0] sm:$0xff]  }
0x1b20   : > { %4422 = vmatprep.subr.bf16.mxu1 %v5842_v59  ;;  %4465 = vmatprep.subr.bf16.mxu0 %v5844_v38 }
0x1b21   : > { %4452 = vmatprep.mubr.bf16.mxu1 %v6733_v56  ;;  %4495 = vmatprep.mubr.bf16.mxu0 %v6733_v56 }
0x1b23   : > { %4423 = vmatpush1.bf16.msra.mxu1 %v5841_v21  ;;  %4466 = vmatpush1.bf16.msra.mxu0 %v5843_v63 }
0x1b24   : > { %6108 = vmatprep.subr.bf16.mxu1 %v6537_v33  ;;  %6130 = vmatprep.subr.bf16.mxu0 %v6538_v34 }
0x1b26   : > { %5845 = vmatmul.mubr.msk.bf16.vlgmr.msra.gmra.mrb[88].mxu1 %vm1068_vm2, %v7437_v50  ;;  %5846 = vmatmul.mubr.msk.bf16.vlgmr.msra.gmra.mrb[92].mxu0 %vm1068_vm2, %v7437_v50 }
0x1b27   : > { %6109 = vmatpush3.bf16.msra.mxu1 %v6539_v0  ;;  %6131 = vmatpush3.bf16.msra.mxu0 %v6540_v1 }
0x1b28   : > { %6110 = vmatprep.subr.bf16.mxu1 %v6541_v2  ;;  %6132 = vmatprep.subr.bf16.mxu0 %v6542_v4 }
0x1b2b   : > { %6111 = vmatpush3.bf16.msra.mxu1 %v6543_v5  ;;  %6133 = vmatpush3.bf16.msra.mxu0 %v6544_v6  ;;  %v4358_v5 = vld [vmem:[%s6946_s14 + $0x8] sm:$0xf] }
0x1b2c   : > { %6112 = vmatprep.subr.bf16.mxu1 %v6545_v7  ;;  %6134 = vmatprep.subr.bf16.mxu0 %v6546_v8 }
0x1b2f   : > { %6113 = vmatpush3.bf16.msra.mxu1 %v6547_v9  ;;  %6135 = vmatpush3.bf16.msra.mxu0 %v6548_v10 }
0x1b30   : > { %6114 = vmatprep.subr.bf16.mxu1 %v6549_v11  ;;  %6136 = vmatprep.subr.bf16.mxu0 %v6550_v22  ;;  %v4363_v11 = vrot.slane %v4358_v5, %v7483_v39  ;;  %v4371_v22 = vrot.slane %v4358_v5, %v7485_v60 }
0x1b33   : > { %6115 = vmatpush3.bf16.msra.mxu1 %v6551_v12  ;;  %6137 = vmatpush3.bf16.msra.mxu0 %v6552_v14 }
0x1b34   : > { %6116 = vmatprep.subr.bf16.mxu1 %v6553_v15  ;;  %6138 = vmatprep.subr.bf16.mxu0 %v6554_v29  ;;  %v4367_v15 = vrot.slane %v4358_v5, %v7488_v25  ;;  %v4375_v29 = vrot.slane %v4358_v5, %v7490_v28  ;;  %v6570_v5 = vld [vmem:[%s6956_s26 + $0x3c0] sm:$0xff]  }
0x1b37   : > { %6117 = vmatpush3.bf16.msra.mxu1 %v6555_v17  ;;  %6139 = vmatpush3.bf16.msra.mxu0 %v6556_v18 }
0x1b38   : > { %6118 = vmatprep.subr.bf16.mxu1 %v6557_v13  ;;  %6140 = vmatprep.subr.bf16.mxu0 %v6558_v57 }
0x1b3b   : > { %6119 = vmatpush3.bf16.msra.mxu1 %v6559_v61  ;;  %6141 = vmatpush3.bf16.msra.mxu0 %v6560_v62 }
0x1b3c   : > { %6120 = vmatprep.subr.bf16.mxu1 %v6561_v19  ;;  %6142 = vmatprep.subr.bf16.mxu0 %v6562_v20 }
0x1b3f   : > { %6121 = vmatpush3.bf16.msra.mxu1 %v6563_v23  ;;  %6143 = vmatpush3.bf16.msra.mxu0 %v6564_v24 }
0x1b40   : > { %6122 = vmatprep.subr.bf16.mxu1 %v6565_v30  ;;  %6144 = vmatprep.subr.bf16.mxu0 %v6566_v31 }
0x1b43   : > { %6123 = vmatpush3.bf16.msra.mxu1 %v6567_v32  ;;  %6145 = vmatpush3.bf16.msra.mxu0 %v6568_v26 }
0x1b44   : > { %4928 = vmatprep.subr.bf16.mxu1 %v5880_v36  ;;  %4971 = vmatprep.subr.bf16.mxu0 %v5882_v42 }
0x1bd1   : > { %v6036_v43 = vpop.f32.mrb[80].mxu1  ;;  %v6058_v44 = vpop.f32.mrb[84].mxu0 }
0x1bd2   : > { %v6037_v45 = vpop.f32.mrb[81].mxu1  ;;  %v6059_v46 = vpop.f32.mrb[85].mxu0 }
0x1bd3   : > { %v6038_v48 = vadd.f32 %v6037_v45, %v6036_v43  ;;  %v6060_v49 = vadd.f32 %v6059_v46, %v6058_v44  ;;  %v6039_v51 = vpop.f32.mrb[82].mxu1  ;;  %v6061_v53 = vpop.f32.mrb[86].mxu0 }
0x1bd4   : > { %v6040_v54 = vpop.f32.mrb[83].mxu1  ;;  %v6062_v55 = vpop.f32.mrb[87].mxu0 }
0x1bd5   : > { %v4070_v52 = vadd.f32 %v6060_v49, %v6038_v48  ;;  %v6041_v58 = vadd.f32 %v6040_v54, %v6039_v51  ;;  %v6063_v59 = vadd.f32 %v6062_v55, %v6061_v53  ;;  %v4862_v49 = vld [vmem:[%s7809_s28 + $0xb0] sm:$0xff] }
0x1bd6   : > { %v4864_v51 = vld [vmem:[%s7809_s28 + $0xf0] sm:$0xff] }
0x1bd7   : > { %v4073_v38 = vadd.f32 %v6063_v59, %v6041_v58  ;;  %v4863_v58 = vld [vmem:[%s7809_s28 + $0xb8] sm:$0xff] }
0x1bd8   : > { %v4865_v59 = vld [vmem:[%s7809_s28 + $0xf8] sm:$0xff] }
0x1bf1   : > { %v6080_v21 = vpop.f32.mrb[84].mxu1  ;;  %v6102_v63 = vpop.f32.mrb[88].mxu0 }
0x1bf2   : > { %v6081_v33 = vpop.f32.mrb[85].mxu1  ;;  %v6103_v34 = vpop.f32.mrb[89].mxu0 }
0x1bf3   : > { %v6082_v0 = vadd.f32 %v6081_v33, %v6080_v21  ;;  %v6104_v1 = vadd.f32 %v6103_v34, %v6102_v63  ;;  %v6083_v2 = vpop.f32.mrb[86].mxu1  ;;  %v6105_v4 = vpop.f32.mrb[90].mxu0  ;;  %v5884_v34 = vcombine.high %v4862_v49, %v4864_v51 }
0x1bf4   : > { %v6084_v6 = vpop.f32.mrb[87].mxu1  ;;  %v6106_v7 = vpop.f32.mrb[91].mxu0 }
0x1bf5   : > { %v4303_v8 = vadd.f32 %v6082_v0, %v4070_v52  ;;  %v6085_v9 = vadd.f32 %v6084_v6, %v6083_v2  ;;  %v6107_v10 = vadd.f32 %v6106_v7, %v6105_v4  ;;  %v5886_v0 = vcombine.high %v4863_v58, %v4865_v59  ;;  %v6569_v4 = vld [vmem:[%s6956_s26 + $0x340] sm:$0xff]   ;;  %v6578_v6 = vld [vmem:[%s6956_s26 + $0x3d0] sm:$0xff]  }
0x1bf6   : > { %v5885_v2 = vcombine.low %v4863_v58, %v4865_v59  ;;  %v6579_v7 = vld [vmem:[%s6956_s26 + $0x310] sm:$0xff]  }
0x1bf7   : > { %v7606_v12 = vadd.f32 %v6104_v1, %v4303_v8  ;;  %v4306_v14 = vadd.f32 %v6085_v9, %v4073_v38  ;;  %v5883_v1 = vcombine.low %v4862_v49, %v4864_v51  ;;  %v6580_v8 = vld [vmem:[%s6956_s26 + $0x390] sm:$0xff]   ;;  %v6582_v9 = vld [vmem:[%s6956_s26 + $0x3d8] sm:$0xff]   ;;  %v4866_v49 = vld [vmem:[%s6946_s14 + $0xc] sm:$0xf] }
0x1bf8   : > { %v4871_v58 = vrot.slane %v4866_v49, %v7483_v39  ;;  %v4879_v59 = vrot.slane %v4866_v49, %v7485_v60 }
0x1bf9   : > { %v7610_v17 = vadd.f32 %v6107_v10, %v4306_v14  ;;  %v4454_v18 = vpop.f32.mrb[88].mxu1  ;;  %v4497_v13 = vpop.f32.mrb[92].mxu0  ;;  %v6583_v10 = vld [vmem:[%s6956_s26 + $0x318] sm:$0xff]   ;;  %v6586_v14 = vld [vmem:[%s6956_s26 + $0x3e0] sm:$0xff]  }
0x1bfa   : > { %v4455_v57 = vadd.f32 %v4454_v18, %v4363_v11  ;;  %v4498_v61 = vadd.f32 %v4497_v13, %v4371_v22  ;;  %v4456_v62 = vpop.f32.mrb[89].mxu1  ;;  %v4499_v19 = vpop.f32.mrb[93].mxu0  ;;  %v6589_v18 = vld [vmem:[%s6956_s26 + $0x368] sm:$0xff]  }
0x1bfb   : > { %v4457_v20 = vadd.f32 %v4456_v62, %v4367_v15  ;;  %v4500_v23 = vadd.f32 %v4499_v19, %v4375_v29  ;;  %v4458_v24 = vpop.f32.mrb[90].mxu1  ;;  %v4501_v30 = vpop.f32.mrb[94].mxu0  ;;  %v6590_v13 = vld [vmem:[%s6956_s26 + $0x3e8] sm:$0xff]   ;;  %v6593_v62 = vld [vmem:[%s6956_s26 + $0x370] sm:$0xff]  }
0x1bfc   : > { %v4459_v31 = vadd.f32 %v4458_v24, %v4363_v11  ;;  %v4502_v32 = vadd.f32 %v4501_v30, %v4371_v22  ;;  %v4460_v26 = vpop.f32.mrb[91].mxu1  ;;  %v4503_v36 = vpop.f32.mrb[95].mxu0  ;;  %v4506_v44 = vmax.f32 %v4455_v57, 0.0  ;;  %v4508_v45 = vmax.f32 %v4498_v61, 0.0  ;;  %v6584_v11 = vld [vmem:[%s6956_s26 + $0x398] sm:$0xff]   ;;  %v6585_v22 = vld [vmem:[%s6956_s26 + $0x360] sm:$0xff]  }
0x1bfd   : > { %v4461_v42 = vadd.f32 %v4460_v26, %v4367_v15  ;;  %v4504_v43 = vadd.f32 %v4503_v36, %v4375_v29  ;;  %v4507_v53 = vmax.f32 %v4457_v20, 0.0  ;;  %v4509_v54 = vmax.f32 %v4500_v23, 0.0  ;;  %v6587_v15 = vld [vmem:[%s6956_s26 + $0x320] sm:$0xff]   ;;  %v6591_v57 = vld [vmem:[%s6956_s26 + $0x328] sm:$0xff]   ;;  %v6594_v19 = vld [vmem:[%s6956_s26 + $0x3f0] sm:$0xff]  }
0x1bfe   : > { %v4510_v46 = vmax.f32 %v4459_v31, 0.0  ;;  %v4512_v48 = vmax.f32 %v4502_v32, 0.0  ;;  %v6588_v29 = vld [vmem:[%s6956_s26 + $0x3a0] sm:$0xff]   ;;  %v6592_v61 = vld [vmem:[%s6956_s26 + $0x3a8] sm:$0xff]   ;;  %v6595_v20 = vld [vmem:[%s6956_s26 + $0x330] sm:$0xff]  }
0x1bff   : > { %v4511_v55 = vmax.f32 %v4461_v42, 0.0  ;;  %v4513_v52 = vmax.f32 %v4504_v43, 0.0  ;;  %v6596_v23 = vld [vmem:[%s6956_s26 + $0x3b0] sm:$0xff]   ;;  %v6597_v24 = vld [vmem:[%s6956_s26 + $0x378] sm:$0xff]  }
0x1c00   : > { %v4514_v38 = vpack.c.bf16 %v4510_v46, %v4506_v44  ;;  %v4516_v21 = vpack.c.bf16 %v4512_v48, %v4508_v45  ;;  %v6598_v30 = vld [vmem:[%s6956_s26 + $0x3f8] sm:$0xff]  }
0x1c01   : > { %v4515_v63 = vpack.c.bf16 %v4511_v55, %v4507_v53  ;;  %v4517_v33 = vpack.c.bf16 %v4513_v52, %v4509_v54  ;;  %v6599_v31 = vld [vmem:[%s6956_s26 + $0x338] sm:$0xff]  }
0x1c02   : > { %v6600_v32 = vld [vmem:[%s6956_s26 + $0x3b8] sm:$0xff]  }
0x1c03   : > { %4806 = vmatprep.mubr.bf16.mxu1 %v4515_v63  ;;  %4847 = vmatprep.mubr.bf16.mxu0 %v4517_v33  ;;  %v4875_v63 = vrot.slane %v4866_v49, %v7488_v25  ;;  %v4883_v33 = vrot.slane %v4866_v49, %v7490_v28 }
0x1c04   : > { %4807 = vmatmul.mubr.bf16.vlgmr.msra.gmra.mrb[92].mxu1 %v4514_v38  ;;  %4848 = vmatmul.mubr.bf16.vlgmr.msra.gmra.mrb[96].mxu0 %v4516_v21 }
0x1c05   : > { %4929 = vmatpush1.bf16.msra.mxu1 %v5879_v40  ;;  %4972 = vmatpush1.bf16.msra.mxu0 %v5881_v41  ;;  %v6576_v40 = vld [vmem:[%s6956_s26 + $0x388] sm:$0xff]   ;;  %v6577_v41 = vld [vmem:[%s6956_s26 + $0x350] sm:$0xff]  }
0x1c06   : > { %4930 = vmatprep.subr.bf16.mxu1 %v5884_v34  ;;  %4973 = vmatprep.subr.bf16.mxu0 %v5886_v0 }
0x1c07   : > { %4960 = vmatprep.mubr.bf16.mxu1 %v6733_v56  ;;  %5003 = vmatprep.mubr.bf16.mxu0 %v6733_v56  ;;  %v6575_v56 = vld [vmem:[%s6956_s26 + $0x308] sm:$0xff]  }
0x1c09   : > { %4931 = vmatpush1.bf16.msra.mxu1 %v5883_v1  ;;  %4974 = vmatpush1.bf16.msra.mxu0 %v5885_v2 }
0x1c0a   : > { %6152 = vmatprep.subr.bf16.mxu1 %v6569_v4  ;;  %6174 = vmatprep.subr.bf16.mxu0 %v6570_v5 }
0x1c0c   : > { %5887 = vmatmul.mubr.msk.bf16.vlgmr.msra.gmra.mrb[96].mxu1 %vm1068_vm2, %v7437_v50  ;;  %5888 = vmatmul.mubr.msk.bf16.vlgmr.msra.gmra.mrb[100].mxu0 %vm1068_vm2, %v7437_v50  ;;  %v6581_v50 = vld [vmem:[%s6956_s26 + $0x358] sm:$0xff]  }
0x1c0d   : > { %6153 = vmatpush3.bf16.msra.mxu1 %v6571_v16  ;;  %6175 = vmatpush3.bf16.msra.mxu0 %v6572_v27 }
0x1c0e   : > { %6154 = vmatprep.subr.bf16.mxu1 %v6573_v35  ;;  %6176 = vmatprep.subr.bf16.mxu0 %v6574_v37 }
0x1c11   : > { %6155 = vmatpush3.bf16.msra.mxu1 %v6575_v56  ;;  %6177 = vmatpush3.bf16.msra.mxu0 %v6576_v40 }
0x1c12   : > { %6156 = vmatprep.subr.bf16.mxu1 %v6577_v41  ;;  %6178 = vmatprep.subr.bf16.mxu0 %v6578_v6 }
0x1c15   : > { %6157 = vmatpush3.bf16.msra.mxu1 %v6579_v7  ;;  %6179 = vmatpush3.bf16.msra.mxu0 %v6580_v8 }
0x1c16   : > { %6158 = vmatprep.subr.bf16.mxu1 %v6581_v50  ;;  %6180 = vmatprep.subr.bf16.mxu0 %v6582_v9 }
0x1c19   : > { %6159 = vmatpush3.bf16.msra.mxu1 %v6583_v10  ;;  %6181 = vmatpush3.bf16.msra.mxu0 %v6584_v11 }
0x1c1a   : > { %6160 = vmatprep.subr.bf16.mxu1 %v6585_v22  ;;  %6182 = vmatprep.subr.bf16.mxu0 %v6586_v14 }
0x1c1d   : > { %6161 = vmatpush3.bf16.msra.mxu1 %v6587_v15  ;;  %6183 = vmatpush3.bf16.msra.mxu0 %v6588_v29 }
0x1c1e   : > { %6162 = vmatprep.subr.bf16.mxu1 %v6589_v18  ;;  %6184 = vmatprep.subr.bf16.mxu0 %v6590_v13 }
0x1c21   : > { %6163 = vmatpush3.bf16.msra.mxu1 %v6591_v57  ;;  %6185 = vmatpush3.bf16.msra.mxu0 %v6592_v61 }
0x1c22   : > { %6164 = vmatprep.subr.bf16.mxu1 %v6593_v62  ;;  %6186 = vmatprep.subr.bf16.mxu0 %v6594_v19 }
0x1c25   : > { %6165 = vmatpush3.bf16.msra.mxu1 %v6595_v20  ;;  %6187 = vmatpush3.bf16.msra.mxu0 %v6596_v23 }
0x1c26   : > { %6166 = vmatprep.subr.bf16.mxu1 %v6597_v24  ;;  %6188 = vmatprep.subr.bf16.mxu0 %v6598_v30 }
0x1c29   : > { %6167 = vmatpush3.bf16.msra.mxu1 %v6599_v31  ;;  %6189 = vmatpush3.bf16.msra.mxu0 %v6600_v32 }
0x1cd7   : > { %v6124_v26 = vpop.f32.mrb[92].mxu1  ;;  %v6146_v36 = vpop.f32.mrb[96].mxu0 }
0x1cd8   : > { %v6125_v42 = vpop.f32.mrb[93].mxu1  ;;  %v6147_v43 = vpop.f32.mrb[97].mxu0 }
0x1cd9   : > { %v6126_v44 = vadd.f32 %v6125_v42, %v6124_v26  ;;  %v6148_v45 = vadd.f32 %v6147_v43, %v6146_v36  ;;  %v6127_v46 = vpop.f32.mrb[94].mxu1  ;;  %v6149_v48 = vpop.f32.mrb[98].mxu0  ;;  %v5921_v26 = vld [vmem:[%s1022_s1] ss:$0 sm:$0xff] }
0x1cda   : > { %v6128_v51 = vpop.f32.mrb[95].mxu1  ;;  %v6150_v53 = vpop.f32.mrb[99].mxu0 }
0x1cdb   : > { %v4850_v54 = vadd.f32 %v6148_v45, %v6126_v44  ;;  %v6129_v55 = vadd.f32 %v6128_v51, %v6127_v46  ;;  %v6151_v52 = vadd.f32 %v6150_v53, %v6149_v48 }
0x1cdd   : > { %v4856_v38 = vadd.f32 %v4850_v54, %v7606_v12  ;;  %v4853_v21 = vadd.f32 %v6151_v52, %v6129_v55 }
0x1cdf   : > { %v4857_v34 = vadd.f32 %v4853_v21, %v7610_v17  ;;  %v4962_v0 = vpop.f32.mrb[96].mxu1  ;;  %v5005_v1 = vpop.f32.mrb[100].mxu0 }
0x1ce0   : > { %v4963_v2 = vadd.f32 %v4962_v0, %v4871_v58  ;;  %v5006_v4 = vadd.f32 %v5005_v1, %v4879_v59  ;;  %v4964_v5 = vpop.f32.mrb[97].mxu1  ;;  %v5007_v16 = vpop.f32.mrb[101].mxu0 }
0x1ce1   : > { %v4965_v27 = vadd.f32 %v4964_v5, %v4875_v63  ;;  %v5008_v35 = vadd.f32 %v5007_v16, %v4883_v33  ;;  %v4966_v39 = vpop.f32.mrb[98].mxu1  ;;  %v5009_v37 = vpop.f32.mrb[102].mxu0  ;;  %v5922_v5 = vld [vmem:[%s1025_s12] ss:$0 sm:$0xff] }
0x1ce2   : > { %v4967_v60 = vadd.f32 %v4966_v39, %v4871_v58  ;;  %v5010_v56 = vadd.f32 %v5009_v37, %v4879_v59  ;;  %v4968_v12 = vpop.f32.mrb[99].mxu1  ;;  %v5011_v40 = vpop.f32.mrb[103].mxu0  ;;  %v5014_v6 = vmax.f32 %v4963_v2, 0.0  ;;  %v5016_v28 = vmax.f32 %v5006_v4, 0.0 }
0x1ce3   : > { %v4969_v41 = vadd.f32 %v4968_v12, %v4875_v63  ;;  %v5012_v25 = vadd.f32 %v5011_v40, %v4883_v33  ;;  %v5015_v8 = vmax.f32 %v4965_v27, 0.0  ;;  %v5017_v50 = vmax.f32 %v5008_v35, 0.0  ;;  %v5923_v35 = vld [vmem:[%s1028_s7] ss:$0 sm:$0xff] }
0x1ce4   : > { %v5018_v7 = vmax.f32 %v4967_v60, 0.0  ;;  %v5020_v17 = vmax.f32 %v5010_v56, 0.0 }
0x1ce5   : > { %v5019_v9 = vmax.f32 %v4969_v41, 0.0  ;;  %v5021_v10 = vmax.f32 %v5012_v25, 0.0 }
0x1ce6   : > { %v5022_v11 = vpack.c.bf16 %v5018_v7, %v5014_v6  ;;  %v5024_v22 = vpack.c.bf16 %v5020_v17, %v5016_v28 }
0x1ce7   : > { %v5023_v14 = vpack.c.bf16 %v5019_v9, %v5015_v8  ;;  %v5025_v15 = vpack.c.bf16 %v5021_v10, %v5017_v50 }
0x1ce9   : > { %5314 = vmatprep.mubr.bf16.mxu1 %v5023_v14  ;;  %5355 = vmatprep.mubr.bf16.mxu0 %v5025_v15 }
0x1cea   : > { %5315 = vmatmul.mubr.bf16.vlgmr.msra.gmra.mrb[100].mxu1 %v5022_v11  ;;  %5356 = vmatmul.mubr.bf16.vlgmr.msra.gmra.mrb[104].mxu0 %v5024_v22 }
0x1dbd   : > { %v6168_v29 = vpop.f32.mrb[100].mxu1  ;;  %v6190_v18 = vpop.f32.mrb[104].mxu0 }
0x1dbe   : > { %v6169_v13 = vpop.f32.mrb[101].mxu1  ;;  %v6191_v57 = vpop.f32.mrb[105].mxu0 }
0x1dbf   : > { %v6170_v61 = vadd.f32 %v6169_v13, %v6168_v29  ;;  %v6192_v62 = vadd.f32 %v6191_v57, %v6190_v18  ;;  %v6171_v19 = vpop.f32.mrb[102].mxu1  ;;  %v6193_v20 = vpop.f32.mrb[106].mxu0 }
0x1dc0   : > { %v6172_v23 = vpop.f32.mrb[103].mxu1  ;;  %v6194_v24 = vpop.f32.mrb[107].mxu0 }
0x1dc1   : > { %v5358_v30 = vadd.f32 %v6192_v62, %v6170_v61  ;;  %v6173_v31 = vadd.f32 %v6172_v23, %v6171_v19  ;;  %v6195_v32 = vadd.f32 %v6194_v24, %v6193_v20 }
0x1dc3   : > { %v5364_v36 = vadd.f32 %v5358_v30, %v4856_v38  ;;  %v5361_v42 = vadd.f32 %v6195_v32, %v6173_v31 }
0x1dc5   : > { %v5365_v43 = vadd.f32 %v5361_v42, %v4857_v34  ;;  %v5373_v44 = vadd.f32 %v5921_v26, %v5364_v36 }
0x1dc7   : > { %v5375_v45 = vadd.f32 %v5373_v44, %v7431_v3  ;;  %v5374_v46 = vadd.f32 %v5921_v26, %v5365_v43 }
0x1dc9   : > { %v5379_v48 = vsel %vm1068_vm2, %v5375_v45, 0.0  ;;  %v5376_v49 = vadd.f32 %v5374_v46, %v7433_v47 }
0x1dca   : > { %5380 = vadd.xlane.f32.xlu1 %v5379_v48 }
0x1dcb   : > { %v5382_v51 = vsel %vm1068_vm2, %v5376_v49, 0.0 }
0x1dcc   : > { %5383 = vadd.xlane.f32.xlu0 %v5382_v51 }
0x1e57   : > { %v5381_v53 = vpop.xlane.xlu1 %5380 }
0x1e58   : > { %v5385_v54 = vmul.f32 0.03125, %v5381_v53 }
0x1e59   : > { %v5384_v55 = vpop.xlane.xlu0 %5383 }
0x1e5a   : > { %v5387_v52 = vsub.f32 %v5375_v45, %v5385_v54  ;;  %v5386_v58 = vmul.f32 0.03125, %v5384_v55 }
0x1e5c   : > { %v5388_v59 = vsub.f32 %v5376_v49, %v5386_v58  ;;  %v5389_v38 = vmul.f32 %v5387_v52, %v5387_v52 }
0x1e5e   : > { %v5391_v21 = vsel %vm1068_vm2, %v5389_v38, 0.0  ;;  %v5390_v3 = vmul.f32 %v5388_v59, %v5388_v59 }
0x1e5f   : > { %5392 = vadd.xlane.f32.xlu1 %v5391_v21 }
0x1e60   : > { %v5394_v63 = vsel %vm1068_vm2, %v5390_v3, 0.0 }
0x1e61   : > { %5395 = vadd.xlane.f32.xlu0 %v5394_v63 }
0x1eec   : > { %v5393_v47 = vpop.xlane.xlu1 %5392 }
0x1eed   : > { %v5397_v33 = vmul.f32 0.03125, %v5393_v47 }
0x1eee   : > { %v5396_v34 = vpop.xlane.xlu0 %5395 }
0x1eef   : > { %v5399_v0 = vadd.f32 1e-05, %v5397_v33  ;;  %v5398_v1 = vmul.f32 0.03125, %v5396_v34 }
0x1ef1   : > { %6673 = vrsqrt.f32 %v5399_v0  ;;  %v5400_v2 = vadd.f32 1e-05, %v5398_v1 }
0x1ef3   : > { %6675 = vrsqrt.f32 %v5400_v2 }
0x1efb   : > { %v6674_v4 = vpop.eup %6673 }
0x1efc   : > { %v5403_v16 = vmul.f32 %v6674_v4, %v5387_v52 }
0x1efd   : > { %v6676_v27 = vpop.eup %6675 }
0x1efe   : > { %v5411_v39 = vmul.f32 %v5922_v5, %v5403_v16  ;;  %v5404_v37 = vmul.f32 %v6676_v27, %v5388_v59  ;;  %5426 = sbr.rel (%p5924_p5) target bundleno = 7941 (0x1f05), region = 124 }
0x1f00   : > { %v5419_v60 = vadd.f32 %v5923_v35, %v5411_v39  ;;  %v5412_v56 = vmul.f32 %v5922_v5, %v5404_v37 }
0x1f02   : > { %5421 = vst.msk [vmem:[#allocation2] sm:$0xff] %vm1068_vm2, %v5419_v60  ;;  %v5420_v12 = vadd.f32 %v5923_v35, %v5412_v56  ;;  %5427 = vst.msk [vmem:[#allocation4] sm:$0xff] (!%p5924_p5), %vm1068_vm2, %v5419_v60 }
0x1f04   : > { %5422 = vst.msk [vmem:[#allocation2 + $0x8] sm:$0xff] %vm1068_vm2, %v5420_v12  ;;  %5428 = vst.msk [vmem:[#allocation4 + $0x8] sm:$0xff] (!%p5924_p5), %vm1068_vm2, %v5420_v12 }
0x1f05 PF: > { %s7818_s12 = sld [smem:[#allocation8_spill]]  ;;  %s6734_s27 = smov [#allocation4]  }
0x1f06   : > { %s5435_s7 = sshll.u32 %s6734_s27, 4  ;;  %s5436_s7 = int_to_ptr.vmem [resolvable:$true] %s5435_s7 }
0x1f07   : > { %s6679_s6 = scalar_lea.vmem %s5436_s7, 256  ;;  %p6686_p10 = scmp.lt.s32.totalorder %s5436_s7, %s5436_s7 }
0x1f08   : > { %p6680_p7 = scmp.ne.s32.totalorder %s5436_s7, %s6679_s6  ;;  %p6687_p11 = scmp.lt.s32.totalorder %s6679_s6, %s6679_s6 }
0x1f0a   : > { %p6688_p12 = por %p6687_p11, %p6686_p10 }
0x1f0b   : > { %p6432_p6 = scmp.eq.s32.totalorder %s7818_s12, 1 }
0x1f0d   : > { %p6681_p8 = pnand %p6680_p7, %p6432_p6 }
0x1f0f   : > { %p6682_p9 = pneg %p6681_p8 }
0x1f11   : > { %p6689_p13 = pnand %p6688_p12, %p6682_p9 }
0x1f13   : > { %6692 = shalt.err (!%p6689_p13)
}
0x1f14   : > { %s7819_s16 = sld [smem:[#allocation30_spill]] }
0x1f1a   : > { %s6693_s17 = scalar_lea.hbm %s7819_s16, 256 }
0x1f1b   : > { %p6694_p0 = scmp.ne.s32.totalorder %s7819_s16, %s6693_s17  ;;  %p6699_p3 = scmp.lt.u32.totalorder %s6693_s17, %s7819_s16 }
0x1f1d   : > { %p6695_p1 = pnand %p6694_p0, %p6432_p6 }
0x1f1f   : > { %p6696_p2 = pneg %p6695_p1 }
0x1f21   : > { %p6701_p4 = pnand %p6699_p3, %p6696_p2 }
0x1f23   : > { %6704 = shalt.err (!%p6701_p4)
}
0x1f24   : > { %s6735_s8 = smov 128  }
0x1f25   : > { %6429 = dma.vmem_to_hbm [thread:$0]  (%p6432_p6), %s5436_s7, 256, %s7819_s16, [#allocation5], %s6735_s8, %s6735_s8, %s6730_s24  }
0x1f26   : > { %6710 = dma.done.wait (%p6432_p6), [#allocation5], 256  }
0x1f27   : > { %6712 = vsyncadd (%p6432_p6), [#allocation5], 4294967040 }
0x1f28 PF: > { %s7820_s5 = sld [smem:[#allocation7_spill]] }
0x1f2e   : > { %s35_s5 = sadd.s32 1, %s7820_s5  }
0x1f2f   : > { %p32_p5 = scmp.ge.s32.totalorder %s35_s5, 4  }
0x1f31   :  { %34 = sbr.rel (!%p32_p5) target bundleno = 23 (0x17), region = 208 }
0x1f38   :  { %5451 = vsyncpa [#allocation5], 1 }
0x1f39   :  { %5453 = vsyncpa [#allocation5 + $0x1], 1 }

</bundles_post_ra>
